<compile_context>
chip_gen: v6e
topology: v6e:2x2x1
jax: 0.10.0
libtpu: 0.0.40
codegen_flags: <defaults>
</compile_context>

<pallas_src>
import functools

import jax
import jax.numpy as jnp
from jax import lax
from jax.experimental import pallas as pl
from jax.experimental.pallas import tpu as pltpu

LRELU_SLOPE = 0.1
BN_EPS = 1e-5


def _lrelu(x):
    return jnp.where(x >= 0, x, LRELU_SLOPE * x)


# ------------------------------------------------------------------------ fused kernel


def _conv3x3(plane, w9, bias, shifts, mm_dtype):
    """3x3 VALID conv in padded-plane coordinates: plane (Cin, L) -> (Cout, L).

    Taps are lane rolls of the padded plane (pltpu.roll, XLU).  When Cin is sublane
    aligned (f32 tile = 8 rows) the 9 taps are stacked into one (9*Cin, L) im2col slab
    and contracted in a single wide-K MXU matmul; otherwise fall back to 9 accumulated
    matmuls.  Only interior positions (1..H, 1..W of each image) of the result are valid.
    """
    cin = plane.shape[0]
    taps = [plane if s == 0 else pltpu.roll(plane, shift=s, axis=1) for s in shifts]
    if cin % 8 == 0:
        stacked = jnp.concatenate(taps, axis=0).astype(mm_dtype)          # (9*Cin, L)
        out = jnp.dot(w9.astype(mm_dtype), stacked,
                      preferred_element_type=jnp.float32)
    else:
        out = jnp.zeros((w9.shape[0], plane.shape[1]), jnp.float32)
        for k, tap in enumerate(taps):
            wk = w9[:, k * cin:(k + 1) * cin].astype(mm_dtype)
            out = out + jnp.dot(wk, tap.astype(mm_dtype),
                                preferred_element_type=jnp.float32)
    return out + bias


def _hfab_kernel(x_ref, mask_ref, bn1s_ref, bn1b_ref, sqw_ref, sqb_ref,
                 we_ref, be_ref, wf_ref, bf_ref, wr_ref, br_ref,
                 bn2s_ref, bn2b_ref, exw_ref, exb_ref, bn3s_ref, bn3b_ref,
                 o_ref, *, shifts, mm_dtype):
    x = x_ref[0]                                   # (n_feats, L), spatial on lanes
    border = mask_ref[...] != 0.0                  # (1, L) bool, hoisted once

    def set_border(plane, bias_col):               # == pad_tensor: ring := per-chan bias
        return jnp.where(border, bias_col, plane)

    def dot1x1(w, act):                            # 1x1 conv: (Cout, Cin) @ (Cin, L)
        return jnp.dot(w.astype(mm_dtype), act.astype(mm_dtype),
                       preferred_element_type=jnp.float32)

    # ---- stage 1: bn1 -> border := bn1_bias -> squeeze 3x3 -> lrelu
    p = set_border(x * bn1s_ref[...] + bn1b_ref[...], bn1b_ref[...])
    out = _lrelu(_conv3x3(p, sqw_ref[...], sqb_ref[...], shifts, mm_dtype))   # (mid, L)

    # ---- stage 2: 2*up_blocks RRRBs (ERB chain).  Statically unrolled: trip count is
    # small and live values are a handful of (<=16, L) slabs, so regalloc pressure is low.
    n_rrrb = we_ref.shape[0]
    for i in range(n_rrrb):
        be = be_ref[i]                                                  # (rm, 1)
        t = dot1x1(we_ref[i], out) + be                                 # expand 1x1
        fea = _conv3x3(set_border(t, be), wf_ref[i], bf_ref[i],
                       shifts, mm_dtype) + t                            # fea 3x3 + ident
        out = dot1x1(wr_ref[i], fea) + br_ref[i] + out                  # reduce 1x1 + skip
        if i % 2 == 0:                       # LeakyReLU between the two RRRBs of an ERB
            out = _lrelu(out)
    out = _lrelu(out)                        # LeakyReLU after the whole ERB chain

    # ---- stage 3: bn2 -> border := bn2_bias -> excitate 3x3 -> bn3 -> sigmoid -> gate*x
    m = set_border(out * bn2s_ref[...] + bn2b_ref[...], bn2b_ref[...])
    a = _conv3x3(m, exw_ref[...], exb_ref[...], shifts, mm_dtype)       # (n_feats, L)
    a = a * bn3s_ref[...] + bn3b_ref[...]
    # sign-stable sigmoid: z = exp(-|a|) in (0,1], denom in [1,2] -> Newton never sees inf
    z = jnp.exp(-jnp.abs(a))
    denom = 1.0 + z
    r = pl.reciprocal(denom, approx=True)
    r = r * (2.0 - denom * r)                # one Newton step -> near-exact
    sig = jnp.where(a >= 0, r, z * r)
    o_ref[0] = (sig * x).astype(o_ref.dtype)


# -------------------------------------------------------------------------- wrapper


def _full_spec(shape):
    nd = len(shape)
    return pl.BlockSpec(tuple(shape), lambda g, _nd=nd: (0,) * _nd)


def _w3x3_to_mat(w_hwio):
    """(3, 3, Cin, Cout) HWIO -> (Cout, 9*Cin), tap-major (k = dy*3 + dx)."""
    cout = w_hwio.shape[-1]
    return jnp.transpose(w_hwio, (3, 0, 1, 2)).reshape(cout, -1)


def hfab_forward(x_nchw, params, *, images_per_step=1, matmul_dtype=jnp.float32):
    N, n_feats, H, W = x_nchw.shape
    nb = images_per_step
    assert N % nb == 0, "images_per_step must divide the batch"
    n_steps = N // nb
    hp, wp = H + 2, W + 2
    npix = hp * wp
    lane_len = nb * npix
    lane_pad = ((lane_len + 127) // 128) * 128     # lane-align -> unmasked stores

    # ---- activations: NCHW -> zero spatial pad -> (steps, C, nb*Hp*Wp), spatial on lanes
    xp = jnp.pad(x_nchw, ((0, 0), (0, 0), (1, 1), (1, 1))).reshape(N, n_feats, npix)
    xg = xp.reshape(n_steps, nb, n_feats, npix).transpose(0, 2, 1, 3)
    xg = xg.reshape(n_steps, n_feats, lane_len)
    xg = jnp.pad(xg, ((0, 0), (0, 0), (0, lane_pad - lane_len)))

    # ---- border mask: 1 on the 1-px pad ring of every image, 0 elsewhere
    yy = lax.broadcasted_iota(jnp.int32, (hp, wp), 0)
    xx = lax.broadcasted_iota(jnp.int32, (hp, wp), 1)
    ring = ((yy == 0) | (yy == hp - 1) | (xx == 0) | (xx == wp - 1)).astype(jnp.float32)
    mask = jnp.tile(ring.reshape(1, npix), (1, nb))
    mask = jnp.pad(mask, ((0, 0), (0, lane_pad - lane_len)))

    # ---- weights: 3x3 -> (Cout, 9*Cin) tap-major; 1x1 -> (Cout, Cin); biases -> (C, 1)
    mmd = matmul_dtype                      # bf16 on v6e/v7x for ~2x MXU; f32 accumulate
    sqw = _w3x3_to_mat(params['squeeze_w']).astype(mmd)
    exw = _w3x3_to_mat(params['excitate_w']).astype(mmd)
    sqb = params['squeeze_b'].reshape(-1, 1)
    exb = params['excitate_b'].reshape(-1, 1)
    rrrbs = params['rrrbs']
    we_s = jnp.stack([p[0].T for p in rrrbs]).astype(mmd)               # (n, rm, mid)
    be_s = jnp.stack([p[1].reshape(-1, 1) for p in rrrbs])              # (n, rm, 1)
    wf_s = jnp.stack([_w3x3_to_mat(p[2]) for p in rrrbs]).astype(mmd)   # (n, rm, 9*rm)
    bf_s = jnp.stack([p[3].reshape(-1, 1) for p in rrrbs])              # (n, rm, 1)
    wr_s = jnp.stack([p[4].T for p in rrrbs]).astype(mmd)               # (n, mid, rm)
    br_s = jnp.stack([p[5].reshape(-1, 1) for p in rrrbs])              # (n, mid, 1)
    bn = lambda k: params[k].reshape(-1, 1)

    # static lane shifts: tap (dy, dx) reads flat index i + (dy-1)*Wp + (dx-1)
    shifts = tuple(int((-((dy - 1) * wp + (dx - 1))) % lane_pad)
                   for dy in range(3) for dx in range(3))

    kernel = functools.partial(_hfab_kernel, shifts=shifts, mm_dtype=mmd)

    operands = (xg, mask, bn('bn1_scale'), bn('bn1_bias'), sqw, sqb,
                we_s, be_s, wf_s, bf_s, wr_s, br_s,
                bn('bn2_scale'), bn('bn2_bias'), exw, exb,
                bn('bn3_scale'), bn('bn3_bias'))

    in_specs = [pl.BlockSpec((1, n_feats, lane_pad), lambda i: (i, 0, 0))]
    in_specs += [_full_spec(op.shape) for op in operands[1:]]

    out = pl.pallas_call(
        kernel,
        out_shape=jax.ShapeDtypeStruct((n_steps, n_feats, lane_pad), x_nchw.dtype),
        grid=(n_steps,),
        in_specs=in_specs,
        out_specs=pl.BlockSpec((1, n_feats, lane_pad), lambda i: (i, 0, 0)),
        compiler_params=pltpu.CompilerParams(dimension_semantics=("parallel",)),
    )(*operands)

    # ---- unpack: (steps, C, nb*Np) -> (N, C, Hp, Wp) -> interior (N, C, H, W)
    out = out[:, :, :lane_len].reshape(n_steps, n_feats, nb, npix).transpose(0, 2, 1, 3)
    out = out.reshape(N, n_feats, hp, wp)
    return out[:, :, 1:H + 1, 1:W + 1]


# ------------------------------------------------------------------ deterministic params


def _bn_scale_bias(key, c):
    k1, k2, k3, k4 = jax.random.split(key, 4)
    gamma = 1.0 + 0.1 * jax.random.normal(k1, (c,), jnp.float32)
    beta = 0.1 * jax.random.normal(k2, (c,), jnp.float32)
    mean = 0.1 * jax.random.normal(k3, (c,), jnp.float32)
    var = jnp.abs(jax.random.normal(k4, (c,), jnp.float32)) + 0.5
    scale = gamma / jnp.sqrt(var + BN_EPS)
    bias = beta - mean * scale                                 # == get_bn_bias(bn)
    return scale.reshape(1, c), bias.reshape(1, c)


def _conv3x3_params(key, cin, cout, wscale=0.1):
    k1, k2 = jax.random.split(key)
    w = wscale * jax.random.normal(k1, (3, 3, cin, cout), jnp.float32)   # HWIO
    b = wscale * jax.random.normal(k2, (1, cout), jnp.float32)
    return w, b


def _conv1x1_params(key, cin, cout, wscale=0.1):
    k1, k2 = jax.random.split(key)
    w = wscale * jax.random.normal(k1, (cin, cout), jnp.float32)
    b = wscale * jax.random.normal(k2, (1, cout), jnp.float32)
    return w, b


def init_hfab_params(key, n_feats, up_blocks, mid_feats, ratio):
    rm = ratio * mid_feats
    keys = list(jax.random.split(key, 5 + 3 * 2 * up_blocks))
    it = iter(keys)
    p = {}
    p['bn1_scale'], p['bn1_bias'] = _bn_scale_bias(next(it), n_feats)
    p['bn2_scale'], p['bn2_bias'] = _bn_scale_bias(next(it), mid_feats)
    p['bn3_scale'], p['bn3_bias'] = _bn_scale_bias(next(it), n_feats)
    p['squeeze_w'], p['squeeze_b'] = _conv3x3_params(next(it), n_feats, mid_feats)
    p['excitate_w'], p['excitate_b'] = _conv3x3_params(next(it), mid_feats, n_feats)
    rrrbs = []
    for _ in range(2 * up_blocks):                             # 2 RRRBs per ERB
        we, be = _conv1x1_params(next(it), mid_feats, rm)
        wf, bf = _conv3x3_params(next(it), rm, rm)
        wr, br = _conv1x1_params(next(it), rm, mid_feats)
        rrrbs.append((we, be, wf, bf, wr, br))
    p['rrrbs'] = rrrbs
    return p


# ---------------------------------------------------------------- pure-JAX reference


def _ref_pad(t, pattern):
    tp = jnp.pad(t, ((0, 0), (1, 1), (1, 1), (0, 0)))
    tp = tp.at[:, 0, :, :].set(pattern)
    tp = tp.at[:, -1, :, :].set(pattern)
    tp = tp.at[:, :, 0, :].set(pattern)
    tp = tp.at[:, :, -1, :].set(pattern)
    return tp


def _ref_conv3x3(tp, w, b):
    y = lax.conv_general_dilated(tp, w, (1, 1), 'VALID',
                                 dimension_numbers=('NHWC', 'HWIO', 'NHWC'),
                                 precision=lax.Precision.HIGHEST)
    return y + b


def _ref_conv1x1(t, w, b):
    return jnp.einsum('nhwc,co->nhwo', t, w, precision=lax.Precision.HIGHEST) + b


def _ref_hfab(x_nchw, params):
    x = jnp.transpose(x_nchw, (0, 2, 3, 1)).astype(jnp.float32)
    s1 = params['bn1_scale'].reshape(-1); b1 = params['bn1_bias'].reshape(-1)
    out = x * s1 + b1
    out = _ref_pad(out, b1)
    out = _lrelu(_ref_conv3x3(out, params['squeeze_w'], params['squeeze_b'].reshape(-1)))
    for idx, (we, be, wf, bf, wr, br) in enumerate(params['rrrbs']):
        t = _ref_conv1x1(out, we, be.reshape(-1))
        ident = t
        t = _ref_pad(t, be.reshape(-1))
        t = _ref_conv3x3(t, wf, bf.reshape(-1)) + ident
        t = _ref_conv1x1(t, wr, br.reshape(-1))
        out = t + out
        if idx % 2 == 0:
            out = _lrelu(out)
    out = _lrelu(out)
    s2 = params['bn2_scale'].reshape(-1); b2 = params['bn2_bias'].reshape(-1)
    out = out * s2 + b2
    out = _ref_pad(out, b2)
    out = _ref_conv3x3(out, params['excitate_w'], params['excitate_b'].reshape(-1))
    s3 = params['bn3_scale'].reshape(-1); b3 = params['bn3_bias'].reshape(-1)
    out = jax.nn.sigmoid(out * s3 + b3) * x
    return jnp.transpose(out, (0, 3, 1, 2))


# --------------------------------------------------------------------------------- main


if __name__ == "__main__":
    N, n_feats, H, W = 2, 4, 16, 16
    up_blocks, mid_feats, ratio = 2, 8, 2

    key = jax.random.PRNGKey(0)
    kx, kp = jax.random.split(key)
    x = jax.random.normal(kx, (N, n_feats, H, W), jnp.float32)      # NCHW, like PyTorch
    params = init_hfab_params(kp, n_feats, up_blocks, mid_feats, ratio)

    # On v6e / v7x pass matmul_dtype=jnp.bfloat16 for ~2x MXU throughput (f32 accumulate);
    # f32 here keeps the correctness check tight on all chips (incl. v5e).
    fwd = jax.jit(lambda xx: hfab_forward(xx, params))
    out = jax.block_until_ready(fwd(x))
    assert out.shape == (N, n_feats, H, W)

    ref = _ref_hfab(x, params)
    err = float(jnp.max(jnp.abs(out - ref)))
    if not err < 1e-2:
        raise AssertionError(f"Pallas HFAB mismatch vs reference: max abs err = {err}")

    print("KERNEL_OK")
</pallas_src>

<mosaic_0001>
module attributes {stable_mosaic.version = 11 : i64} {
  func.func @_hfab_kernel(%arg0: i32, %arg1: memref<1x4x384xf32, #tpu.memory_space<vmem>>, %arg2: memref<1x384xf32, #tpu.memory_space<vmem>>, %arg3: memref<4x1xf32, #tpu.memory_space<vmem>>, %arg4: memref<4x1xf32, #tpu.memory_space<vmem>>, %arg5: memref<8x36xf32, #tpu.memory_space<vmem>>, %arg6: memref<8x1xf32, #tpu.memory_space<vmem>>, %arg7: memref<4x16x8xf32, #tpu.memory_space<vmem>>, %arg8: memref<4x16x1xf32, #tpu.memory_space<vmem>>, %arg9: memref<4x16x144xf32, #tpu.memory_space<vmem>>, %arg10: memref<4x16x1xf32, #tpu.memory_space<vmem>>, %arg11: memref<4x8x16xf32, #tpu.memory_space<vmem>>, %arg12: memref<4x8x1xf32, #tpu.memory_space<vmem>>, %arg13: memref<8x1xf32, #tpu.memory_space<vmem>>, %arg14: memref<8x1xf32, #tpu.memory_space<vmem>>, %arg15: memref<4x72xf32, #tpu.memory_space<vmem>>, %arg16: memref<4x1xf32, #tpu.memory_space<vmem>>, %arg17: memref<4x1xf32, #tpu.memory_space<vmem>>, %arg18: memref<4x1xf32, #tpu.memory_space<vmem>>, %arg19: memref<1x4x384xf32, #tpu.memory_space<vmem>>) attributes {dimension_semantics = [#tpu.dimension_semantics<parallel>], iteration_bounds = array<i64: 2>, scalar_prefetch = 0 : i64, scratch_operands = 0 : i64, tpu.core_type = #tpu.core_type<tc>, window_params = [{transform_indices = @transform_0, window_bounds = array<i64: 1, 4, 384>}, {pipeline_mode = #tpu.pipeline_mode<synchronous>, transform_indices = @transform_1, window_bounds = array<i64: 1, 384>}, {pipeline_mode = #tpu.pipeline_mode<synchronous>, transform_indices = @transform_2, window_bounds = array<i64: 4, 1>}, {pipeline_mode = #tpu.pipeline_mode<synchronous>, transform_indices = @transform_3, window_bounds = array<i64: 4, 1>}, {pipeline_mode = #tpu.pipeline_mode<synchronous>, transform_indices = @transform_4, window_bounds = array<i64: 8, 36>}, {pipeline_mode = #tpu.pipeline_mode<synchronous>, transform_indices = @transform_5, window_bounds = array<i64: 8, 1>}, {pipeline_mode = #tpu.pipeline_mode<synchronous>, transform_indices = @transform_6, window_bounds = array<i64: 4, 16, 8>}, {pipeline_mode = #tpu.pipeline_mode<synchronous>, transform_indices = @transform_7, window_bounds = array<i64: 4, 16, 1>}, {pipeline_mode = #tpu.pipeline_mode<synchronous>, transform_indices = @transform_8, window_bounds = array<i64: 4, 16, 144>}, {pipeline_mode = #tpu.pipeline_mode<synchronous>, transform_indices = @transform_9, window_bounds = array<i64: 4, 16, 1>}, {pipeline_mode = #tpu.pipeline_mode<synchronous>, transform_indices = @transform_10, window_bounds = array<i64: 4, 8, 16>}, {pipeline_mode = #tpu.pipeline_mode<synchronous>, transform_indices = @transform_11, window_bounds = array<i64: 4, 8, 1>}, {pipeline_mode = #tpu.pipeline_mode<synchronous>, transform_indices = @transform_12, window_bounds = array<i64: 8, 1>}, {pipeline_mode = #tpu.pipeline_mode<synchronous>, transform_indices = @transform_13, window_bounds = array<i64: 8, 1>}, {pipeline_mode = #tpu.pipeline_mode<synchronous>, transform_indices = @transform_14, window_bounds = array<i64: 4, 72>}, {pipeline_mode = #tpu.pipeline_mode<synchronous>, transform_indices = @transform_15, window_bounds = array<i64: 4, 1>}, {pipeline_mode = #tpu.pipeline_mode<synchronous>, transform_indices = @transform_16, window_bounds = array<i64: 4, 1>}, {pipeline_mode = #tpu.pipeline_mode<synchronous>, transform_indices = @transform_17, window_bounds = array<i64: 4, 1>}, {transform_indices = @transform_18, window_bounds = array<i64: 1, 4, 384>}]} {
    %c0 = arith.constant 0 : index
    %c0_0 = arith.constant 0 : index
    %c0_1 = arith.constant 0 : index
    %0 = vector.load %arg1[%c0, %c0_0, %c0_1] : memref<1x4x384xf32, #tpu.memory_space<vmem>>, vector<1x4x384xf32>
    %1 = vector.shape_cast %0 : vector<1x4x384xf32> to vector<4x384xf32>
    %c0_2 = arith.constant 0 : index
    %c0_3 = arith.constant 0 : index
    %2 = vector.load %arg2[%c0_2, %c0_3] : memref<1x384xf32, #tpu.memory_space<vmem>>, vector<1x384xf32>
    %cst = arith.constant 0.000000e+00 : f32
    %3 = vector.broadcast %cst : f32 to vector<1x384xf32>
    %4 = arith.cmpf one, %2, %3 : vector<1x384xf32>
    %c0_4 = arith.constant 0 : index
    %c0_5 = arith.constant 0 : index
    %5 = vector.load %arg3[%c0_4, %c0_5] : memref<4x1xf32, #tpu.memory_space<vmem>>, vector<4x1xf32>
    %6 = vector.broadcast %5 : vector<4x1xf32> to vector<4x384xf32>
    %7 = arith.mulf %1, %6 : vector<4x384xf32>
    %c0_6 = arith.constant 0 : index
    %c0_7 = arith.constant 0 : index
    %8 = vector.load %arg4[%c0_6, %c0_7] : memref<4x1xf32, #tpu.memory_space<vmem>>, vector<4x1xf32>
    %9 = vector.broadcast %8 : vector<4x1xf32> to vector<4x384xf32>
    %10 = arith.addf %7, %9 : vector<4x384xf32>
    %c0_8 = arith.constant 0 : index
    %c0_9 = arith.constant 0 : index
    %11 = vector.load %arg4[%c0_8, %c0_9] : memref<4x1xf32, #tpu.memory_space<vmem>>, vector<4x1xf32>
    %12 = vector.shape_cast %4 : vector<1x384xi1> to vector<1x384xi1>
    %13 = vector.broadcast %12 : vector<1x384xi1> to vector<4x384xi1>
    %14 = vector.shape_cast %11 : vector<4x1xf32> to vector<4x1xf32>
    %15 = vector.broadcast %14 : vector<4x1xf32> to vector<4x384xf32>
    %16 = arith.select %13, %15, %10 : vector<4x384xi1>, vector<4x384xf32>
    %c0_10 = arith.constant 0 : index
    %c0_11 = arith.constant 0 : index
    %17 = vector.load %arg5[%c0_10, %c0_11] : memref<8x36xf32, #tpu.memory_space<vmem>>, vector<8x36xf32>
    %c0_12 = arith.constant 0 : index
    %c0_13 = arith.constant 0 : index
    %18 = vector.load %arg6[%c0_12, %c0_13] : memref<8x1xf32, #tpu.memory_space<vmem>>, vector<8x1xf32>
    %c19_i32 = arith.constant 19 : i32
    %19 = tpu.dynamic_rotate %16 by %c19_i32 dim 1 : vector<4x384xf32>, i32 -> vector<4x384xf32>
    %c18_i32 = arith.constant 18 : i32
    %20 = tpu.dynamic_rotate %16 by %c18_i32 dim 1 : vector<4x384xf32>, i32 -> vector<4x384xf32>
    %c17_i32 = arith.constant 17 : i32
    %21 = tpu.dynamic_rotate %16 by %c17_i32 dim 1 : vector<4x384xf32>, i32 -> vector<4x384xf32>
    %c1_i32 = arith.constant 1 : i32
    %22 = tpu.dynamic_rotate %16 by %c1_i32 dim 1 : vector<4x384xf32>, i32 -> vector<4x384xf32>
    %c383_i32 = arith.constant 383 : i32
    %23 = tpu.dynamic_rotate %16 by %c383_i32 dim 1 : vector<4x384xf32>, i32 -> vector<4x384xf32>
    %c367_i32 = arith.constant 367 : i32
    %24 = tpu.dynamic_rotate %16 by %c367_i32 dim 1 : vector<4x384xf32>, i32 -> vector<4x384xf32>
    %c366_i32 = arith.constant 366 : i32
    %25 = tpu.dynamic_rotate %16 by %c366_i32 dim 1 : vector<4x384xf32>, i32 -> vector<4x384xf32>
    %c365_i32 = arith.constant 365 : i32
    %26 = tpu.dynamic_rotate %16 by %c365_i32 dim 1 : vector<4x384xf32>, i32 -> vector<4x384xf32>
    %cst_14 = arith.constant 0.000000e+00 : f32
    %27 = vector.broadcast %cst_14 : f32 to vector<8x384xf32>
    %28 = vector.extract_strided_slice %17 {offsets = [0, 0], sizes = [8, 4], strides = [1, 1]} : vector<8x36xf32> to vector<8x4xf32>
    %cst_15 = arith.constant dense<0.000000e+00> : vector<8x384xf32>
    %29 = tpu.matmul %28, %19, %cst_15 {dimension_numbers = #tpu.dot_dimension_numbers<[1], [0], [0], [1], [0, 0, 1, 1], [], []>} : vector<8x4xf32>, vector<4x384xf32>, vector<8x384xf32> -> vector<8x384xf32>
    %30 = arith.addf %27, %29 : vector<8x384xf32>
    %31 = vector.extract_strided_slice %17 {offsets = [0, 4], sizes = [8, 4], strides = [1, 1]} : vector<8x36xf32> to vector<8x4xf32>
    %cst_16 = arith.constant dense<0.000000e+00> : vector<8x384xf32>
    %32 = tpu.matmul %31, %20, %cst_16 {dimension_numbers = #tpu.dot_dimension_numbers<[1], [0], [0], [1], [0, 0, 1, 1], [], []>} : vector<8x4xf32>, vector<4x384xf32>, vector<8x384xf32> -> vector<8x384xf32>
    %33 = arith.addf %30, %32 : vector<8x384xf32>
    %34 = vector.extract_strided_slice %17 {offsets = [0, 8], sizes = [8, 4], strides = [1, 1]} : vector<8x36xf32> to vector<8x4xf32>
    %cst_17 = arith.constant dense<0.000000e+00> : vector<8x384xf32>
    %35 = tpu.matmul %34, %21, %cst_17 {dimension_numbers = #tpu.dot_dimension_numbers<[1], [0], [0], [1], [0, 0, 1, 1], [], []>} : vector<8x4xf32>, vector<4x384xf32>, vector<8x384xf32> -> vector<8x384xf32>
    %36 = arith.addf %33, %35 : vector<8x384xf32>
    %37 = vector.extract_strided_slice %17 {offsets = [0, 12], sizes = [8, 4], strides = [1, 1]} : vector<8x36xf32> to vector<8x4xf32>
    %cst_18 = arith.constant dense<0.000000e+00> : vector<8x384xf32>
    %38 = tpu.matmul %37, %22, %cst_18 {dimension_numbers = #tpu.dot_dimension_numbers<[1], [0], [0], [1], [0, 0, 1, 1], [], []>} : vector<8x4xf32>, vector<4x384xf32>, vector<8x384xf32> -> vector<8x384xf32>
    %39 = arith.addf %36, %38 : vector<8x384xf32>
    %40 = vector.extract_strided_slice %17 {offsets = [0, 16], sizes = [8, 4], strides = [1, 1]} : vector<8x36xf32> to vector<8x4xf32>
    %cst_19 = arith.constant dense<0.000000e+00> : vector<8x384xf32>
    %41 = tpu.matmul %40, %16, %cst_19 {dimension_numbers = #tpu.dot_dimension_numbers<[1], [0], [0], [1], [0, 0, 1, 1], [], []>} : vector<8x4xf32>, vector<4x384xf32>, vector<8x384xf32> -> vector<8x384xf32>
    %42 = arith.addf %39, %41 : vector<8x384xf32>
    %43 = vector.extract_strided_slice %17 {offsets = [0, 20], sizes = [8, 4], strides = [1, 1]} : vector<8x36xf32> to vector<8x4xf32>
    %cst_20 = arith.constant dense<0.000000e+00> : vector<8x384xf32>
    %44 = tpu.matmul %43, %23, %cst_20 {dimension_numbers = #tpu.dot_dimension_numbers<[1], [0], [0], [1], [0, 0, 1, 1], [], []>} : vector<8x4xf32>, vector<4x384xf32>, vector<8x384xf32> -> vector<8x384xf32>
    %45 = arith.addf %42, %44 : vector<8x384xf32>
    %46 = vector.extract_strided_slice %17 {offsets = [0, 24], sizes = [8, 4], strides = [1, 1]} : vector<8x36xf32> to vector<8x4xf32>
    %cst_21 = arith.constant dense<0.000000e+00> : vector<8x384xf32>
    %47 = tpu.matmul %46, %24, %cst_21 {dimension_numbers = #tpu.dot_dimension_numbers<[1], [0], [0], [1], [0, 0, 1, 1], [], []>} : vector<8x4xf32>, vector<4x384xf32>, vector<8x384xf32> -> vector<8x384xf32>
    %48 = arith.addf %45, %47 : vector<8x384xf32>
    %49 = vector.extract_strided_slice %17 {offsets = [0, 28], sizes = [8, 4], strides = [1, 1]} : vector<8x36xf32> to vector<8x4xf32>
    %cst_22 = arith.constant dense<0.000000e+00> : vector<8x384xf32>
    %50 = tpu.matmul %49, %25, %cst_22 {dimension_numbers = #tpu.dot_dimension_numbers<[1], [0], [0], [1], [0, 0, 1, 1], [], []>} : vector<8x4xf32>, vector<4x384xf32>, vector<8x384xf32> -> vector<8x384xf32>
    %51 = arith.addf %48, %50 : vector<8x384xf32>
    %52 = vector.extract_strided_slice %17 {offsets = [0, 32], sizes = [8, 4], strides = [1, 1]} : vector<8x36xf32> to vector<8x4xf32>
    %cst_23 = arith.constant dense<0.000000e+00> : vector<8x384xf32>
    %53 = tpu.matmul %52, %26, %cst_23 {dimension_numbers = #tpu.dot_dimension_numbers<[1], [0], [0], [1], [0, 0, 1, 1], [], []>} : vector<8x4xf32>, vector<4x384xf32>, vector<8x384xf32> -> vector<8x384xf32>
    %54 = arith.addf %51, %53 : vector<8x384xf32>
    %55 = vector.broadcast %18 : vector<8x1xf32> to vector<8x384xf32>
    %56 = arith.addf %54, %55 : vector<8x384xf32>
    %cst_24 = arith.constant 0.000000e+00 : f32
    %57 = vector.broadcast %cst_24 : f32 to vector<8x384xf32>
    %58 = arith.cmpf oge, %56, %57 : vector<8x384xf32>
    %cst_25 = arith.constant 1.000000e-01 : f32
    %59 = vector.broadcast %cst_25 : f32 to vector<8x384xf32>
    %60 = arith.mulf %59, %56 : vector<8x384xf32>
    %61 = arith.select %58, %56, %60 : vector<8x384xi1>, vector<8x384xf32>
    %c0_26 = arith.constant 0 : index
    %c0_27 = arith.constant 0 : index
    %c0_28 = arith.constant 0 : index
    %62 = vector.load %arg8[%c0_26, %c0_27, %c0_28] : memref<4x16x1xf32, #tpu.memory_space<vmem>>, vector<1x16x1xf32>
    %63 = vector.shape_cast %62 : vector<1x16x1xf32> to vector<16x1xf32>
    %c0_29 = arith.constant 0 : index
    %c0_30 = arith.constant 0 : index
    %c0_31 = arith.constant 0 : index
    %64 = vector.load %arg7[%c0_29, %c0_30, %c0_31] : memref<4x16x8xf32, #tpu.memory_space<vmem>>, vector<1x16x8xf32>
    %65 = vector.shape_cast %64 : vector<1x16x8xf32> to vector<16x8xf32>
    %cst_32 = arith.constant dense<0.000000e+00> : vector<16x384xf32>
    %66 = tpu.matmul %65, %61, %cst_32 {dimension_numbers = #tpu.dot_dimension_numbers<[1], [0], [0], [1], [0, 0, 1, 1], [], []>} : vector<16x8xf32>, vector<8x384xf32>, vector<16x384xf32> -> vector<16x384xf32>
    %67 = vector.broadcast %63 : vector<16x1xf32> to vector<16x384xf32>
    %68 = arith.addf %66, %67 : vector<16x384xf32>
    %69 = vector.shape_cast %4 : vector<1x384xi1> to vector<1x384xi1>
    %70 = vector.broadcast %69 : vector<1x384xi1> to vector<16x384xi1>
    %71 = vector.shape_cast %63 : vector<16x1xf32> to vector<16x1xf32>
    %72 = vector.broadcast %71 : vector<16x1xf32> to vector<16x384xf32>
    %73 = arith.select %70, %72, %68 : vector<16x384xi1>, vector<16x384xf32>
    %c0_33 = arith.constant 0 : index
    %c0_34 = arith.constant 0 : index
    %c0_35 = arith.constant 0 : index
    %74 = vector.load %arg9[%c0_33, %c0_34, %c0_35] : memref<4x16x144xf32, #tpu.memory_space<vmem>>, vector<1x16x144xf32>
    %75 = vector.shape_cast %74 : vector<1x16x144xf32> to vector<16x144xf32>
    %c0_36 = arith.constant 0 : index
    %c0_37 = arith.constant 0 : index
    %c0_38 = arith.constant 0 : index
    %76 = vector.load %arg10[%c0_36, %c0_37, %c0_38] : memref<4x16x1xf32, #tpu.memory_space<vmem>>, vector<1x16x1xf32>
    %77 = vector.shape_cast %76 : vector<1x16x1xf32> to vector<16x1xf32>
    %c19_i32_39 = arith.constant 19 : i32
    %78 = tpu.dynamic_rotate %73 by %c19_i32_39 dim 1 : vector<16x384xf32>, i32 -> vector<16x384xf32>
    %c18_i32_40 = arith.constant 18 : i32
    %79 = tpu.dynamic_rotate %73 by %c18_i32_40 dim 1 : vector<16x384xf32>, i32 -> vector<16x384xf32>
    %c17_i32_41 = arith.constant 17 : i32
    %80 = tpu.dynamic_rotate %73 by %c17_i32_41 dim 1 : vector<16x384xf32>, i32 -> vector<16x384xf32>
    %c1_i32_42 = arith.constant 1 : i32
    %81 = tpu.dynamic_rotate %73 by %c1_i32_42 dim 1 : vector<16x384xf32>, i32 -> vector<16x384xf32>
    %c383_i32_43 = arith.constant 383 : i32
    %82 = tpu.dynamic_rotate %73 by %c383_i32_43 dim 1 : vector<16x384xf32>, i32 -> vector<16x384xf32>
    %c367_i32_44 = arith.constant 367 : i32
    %83 = tpu.dynamic_rotate %73 by %c367_i32_44 dim 1 : vector<16x384xf32>, i32 -> vector<16x384xf32>
    %c366_i32_45 = arith.constant 366 : i32
    %84 = tpu.dynamic_rotate %73 by %c366_i32_45 dim 1 : vector<16x384xf32>, i32 -> vector<16x384xf32>
    %c365_i32_46 = arith.constant 365 : i32
    %85 = tpu.dynamic_rotate %73 by %c365_i32_46 dim 1 : vector<16x384xf32>, i32 -> vector<16x384xf32>
    %86 = tpu.concatenate %78, %79, %80, %81, %73, %82, %83, %84, %85 in 0 : vector<16x384xf32>, vector<16x384xf32>, vector<16x384xf32>, vector<16x384xf32>, vector<16x384xf32>, vector<16x384xf32>, vector<16x384xf32>, vector<16x384xf32>, vector<16x384xf32> -> vector<144x384xf32>
    %cst_47 = arith.constant dense<0.000000e+00> : vector<16x384xf32>
    %87 = tpu.matmul %75, %86, %cst_47 {dimension_numbers = #tpu.dot_dimension_numbers<[1], [0], [0], [1], [0, 0, 1, 1], [], []>} : vector<16x144xf32>, vector<144x384xf32>, vector<16x384xf32> -> vector<16x384xf32>
    %88 = vector.broadcast %77 : vector<16x1xf32> to vector<16x384xf32>
    %89 = arith.addf %87, %88 : vector<16x384xf32>
    %90 = arith.addf %89, %68 : vector<16x384xf32>
    %c0_48 = arith.constant 0 : index
    %c0_49 = arith.constant 0 : index
    %c0_50 = arith.constant 0 : index
    %91 = vector.load %arg11[%c0_48, %c0_49, %c0_50] : memref<4x8x16xf32, #tpu.memory_space<vmem>>, vector<1x8x16xf32>
    %92 = vector.shape_cast %91 : vector<1x8x16xf32> to vector<8x16xf32>
    %cst_51 = arith.constant dense<0.000000e+00> : vector<8x384xf32>
    %93 = tpu.matmul %92, %90, %cst_51 {dimension_numbers = #tpu.dot_dimension_numbers<[1], [0], [0], [1], [0, 0, 1, 1], [], []>} : vector<8x16xf32>, vector<16x384xf32>, vector<8x384xf32> -> vector<8x384xf32>
    %c0_52 = arith.constant 0 : index
    %c0_53 = arith.constant 0 : index
    %c0_54 = arith.constant 0 : index
    %94 = vector.load %arg12[%c0_52, %c0_53, %c0_54] : memref<4x8x1xf32, #tpu.memory_space<vmem>>, vector<1x8x1xf32>
    %95 = vector.shape_cast %94 : vector<1x8x1xf32> to vector<8x1xf32>
    %96 = vector.broadcast %95 : vector<8x1xf32> to vector<8x384xf32>
    %97 = arith.addf %93, %96 : vector<8x384xf32>
    %98 = arith.addf %97, %61 : vector<8x384xf32>
    %cst_55 = arith.constant 0.000000e+00 : f32
    %99 = vector.broadcast %cst_55 : f32 to vector<8x384xf32>
    %100 = arith.cmpf oge, %98, %99 : vector<8x384xf32>
    %cst_56 = arith.constant 1.000000e-01 : f32
    %101 = vector.broadcast %cst_56 : f32 to vector<8x384xf32>
    %102 = arith.mulf %101, %98 : vector<8x384xf32>
    %103 = arith.select %100, %98, %102 : vector<8x384xi1>, vector<8x384xf32>
    %c1 = arith.constant 1 : index
    %c0_57 = arith.constant 0 : index
    %c0_58 = arith.constant 0 : index
    %104 = vector.load %arg8[%c1, %c0_57, %c0_58] : memref<4x16x1xf32, #tpu.memory_space<vmem>>, vector<1x16x1xf32>
    %105 = vector.shape_cast %104 : vector<1x16x1xf32> to vector<16x1xf32>
    %c1_59 = arith.constant 1 : index
    %c0_60 = arith.constant 0 : index
    %c0_61 = arith.constant 0 : index
    %106 = vector.load %arg7[%c1_59, %c0_60, %c0_61] : memref<4x16x8xf32, #tpu.memory_space<vmem>>, vector<1x16x8xf32>
    %107 = vector.shape_cast %106 : vector<1x16x8xf32> to vector<16x8xf32>
    %cst_62 = arith.constant dense<0.000000e+00> : vector<16x384xf32>
    %108 = tpu.matmul %107, %103, %cst_62 {dimension_numbers = #tpu.dot_dimension_numbers<[1], [0], [0], [1], [0, 0, 1, 1], [], []>} : vector<16x8xf32>, vector<8x384xf32>, vector<16x384xf32> -> vector<16x384xf32>
    %109 = vector.broadcast %105 : vector<16x1xf32> to vector<16x384xf32>
    %110 = arith.addf %108, %109 : vector<16x384xf32>
    %111 = vector.shape_cast %4 : vector<1x384xi1> to vector<1x384xi1>
    %112 = vector.broadcast %111 : vector<1x384xi1> to vector<16x384xi1>
    %113 = vector.shape_cast %105 : vector<16x1xf32> to vector<16x1xf32>
    %114 = vector.broadcast %113 : vector<16x1xf32> to vector<16x384xf32>
    %115 = arith.select %112, %114, %110 : vector<16x384xi1>, vector<16x384xf32>
    %c1_63 = arith.constant 1 : index
    %c0_64 = arith.constant 0 : index
    %c0_65 = arith.constant 0 : index
    %116 = vector.load %arg9[%c1_63, %c0_64, %c0_65] : memref<4x16x144xf32, #tpu.memory_space<vmem>>, vector<1x16x144xf32>
    %117 = vector.shape_cast %116 : vector<1x16x144xf32> to vector<16x144xf32>
    %c1_66 = arith.constant 1 : index
    %c0_67 = arith.constant 0 : index
    %c0_68 = arith.constant 0 : index
    %118 = vector.load %arg10[%c1_66, %c0_67, %c0_68] : memref<4x16x1xf32, #tpu.memory_space<vmem>>, vector<1x16x1xf32>
    %119 = vector.shape_cast %118 : vector<1x16x1xf32> to vector<16x1xf32>
    %c19_i32_69 = arith.constant 19 : i32
    %120 = tpu.dynamic_rotate %115 by %c19_i32_69 dim 1 : vector<16x384xf32>, i32 -> vector<16x384xf32>
    %c18_i32_70 = arith.constant 18 : i32
    %121 = tpu.dynamic_rotate %115 by %c18_i32_70 dim 1 : vector<16x384xf32>, i32 -> vector<16x384xf32>
    %c17_i32_71 = arith.constant 17 : i32
    %122 = tpu.dynamic_rotate %115 by %c17_i32_71 dim 1 : vector<16x384xf32>, i32 -> vector<16x384xf32>
    %c1_i32_72 = arith.constant 1 : i32
    %123 = tpu.dynamic_rotate %115 by %c1_i32_72 dim 1 : vector<16x384xf32>, i32 -> vector<16x384xf32>
    %c383_i32_73 = arith.constant 383 : i32
    %124 = tpu.dynamic_rotate %115 by %c383_i32_73 dim 1 : vector<16x384xf32>, i32 -> vector<16x384xf32>
    %c367_i32_74 = arith.constant 367 : i32
    %125 = tpu.dynamic_rotate %115 by %c367_i32_74 dim 1 : vector<16x384xf32>, i32 -> vector<16x384xf32>
    %c366_i32_75 = arith.constant 366 : i32
    %126 = tpu.dynamic_rotate %115 by %c366_i32_75 dim 1 : vector<16x384xf32>, i32 -> vector<16x384xf32>
    %c365_i32_76 = arith.constant 365 : i32
    %127 = tpu.dynamic_rotate %115 by %c365_i32_76 dim 1 : vector<16x384xf32>, i32 -> vector<16x384xf32>
    %128 = tpu.concatenate %120, %121, %122, %123, %115, %124, %125, %126, %127 in 0 : vector<16x384xf32>, vector<16x384xf32>, vector<16x384xf32>, vector<16x384xf32>, vector<16x384xf32>, vector<16x384xf32>, vector<16x384xf32>, vector<16x384xf32>, vector<16x384xf32> -> vector<144x384xf32>
    %cst_77 = arith.constant dense<0.000000e+00> : vector<16x384xf32>
    %129 = tpu.matmul %117, %128, %cst_77 {dimension_numbers = #tpu.dot_dimension_numbers<[1], [0], [0], [1], [0, 0, 1, 1], [], []>} : vector<16x144xf32>, vector<144x384xf32>, vector<16x384xf32> -> vector<16x384xf32>
    %130 = vector.broadcast %119 : vector<16x1xf32> to vector<16x384xf32>
    %131 = arith.addf %129, %130 : vector<16x384xf32>
    %132 = arith.addf %131, %110 : vector<16x384xf32>
    %c1_78 = arith.constant 1 : index
    %c0_79 = arith.constant 0 : index
    %c0_80 = arith.constant 0 : index
    %133 = vector.load %arg11[%c1_78, %c0_79, %c0_80] : memref<4x8x16xf32, #tpu.memory_space<vmem>>, vector<1x8x16xf32>
    %134 = vector.shape_cast %133 : vector<1x8x16xf32> to vector<8x16xf32>
    %cst_81 = arith.constant dense<0.000000e+00> : vector<8x384xf32>
    %135 = tpu.matmul %134, %132, %cst_81 {dimension_numbers = #tpu.dot_dimension_numbers<[1], [0], [0], [1], [0, 0, 1, 1], [], []>} : vector<8x16xf32>, vector<16x384xf32>, vector<8x384xf32> -> vector<8x384xf32>
    %c1_82 = arith.constant 1 : index
    %c0_83 = arith.constant 0 : index
    %c0_84 = arith.constant 0 : index
    %136 = vector.load %arg12[%c1_82, %c0_83, %c0_84] : memref<4x8x1xf32, #tpu.memory_space<vmem>>, vector<1x8x1xf32>
    %137 = vector.shape_cast %136 : vector<1x8x1xf32> to vector<8x1xf32>
    %138 = vector.broadcast %137 : vector<8x1xf32> to vector<8x384xf32>
    %139 = arith.addf %135, %138 : vector<8x384xf32>
    %140 = arith.addf %139, %103 : vector<8x384xf32>
    %c2 = arith.constant 2 : index
    %c0_85 = arith.constant 0 : index
    %c0_86 = arith.constant 0 : index
    %141 = vector.load %arg8[%c2, %c0_85, %c0_86] : memref<4x16x1xf32, #tpu.memory_space<vmem>>, vector<1x16x1xf32>
    %142 = vector.shape_cast %141 : vector<1x16x1xf32> to vector<16x1xf32>
    %c2_87 = arith.constant 2 : index
    %c0_88 = arith.constant 0 : index
    %c0_89 = arith.constant 0 : index
    %143 = vector.load %arg7[%c2_87, %c0_88, %c0_89] : memref<4x16x8xf32, #tpu.memory_space<vmem>>, vector<1x16x8xf32>
    %144 = vector.shape_cast %143 : vector<1x16x8xf32> to vector<16x8xf32>
    %cst_90 = arith.constant dense<0.000000e+00> : vector<16x384xf32>
    %145 = tpu.matmul %144, %140, %cst_90 {dimension_numbers = #tpu.dot_dimension_numbers<[1], [0], [0], [1], [0, 0, 1, 1], [], []>} : vector<16x8xf32>, vector<8x384xf32>, vector<16x384xf32> -> vector<16x384xf32>
    %146 = vector.broadcast %142 : vector<16x1xf32> to vector<16x384xf32>
    %147 = arith.addf %145, %146 : vector<16x384xf32>
    %148 = vector.shape_cast %4 : vector<1x384xi1> to vector<1x384xi1>
    %149 = vector.broadcast %148 : vector<1x384xi1> to vector<16x384xi1>
    %150 = vector.shape_cast %142 : vector<16x1xf32> to vector<16x1xf32>
    %151 = vector.broadcast %150 : vector<16x1xf32> to vector<16x384xf32>
    %152 = arith.select %149, %151, %147 : vector<16x384xi1>, vector<16x384xf32>
    %c2_91 = arith.constant 2 : index
    %c0_92 = arith.constant 0 : index
    %c0_93 = arith.constant 0 : index
    %153 = vector.load %arg9[%c2_91, %c0_92, %c0_93] : memref<4x16x144xf32, #tpu.memory_space<vmem>>, vector<1x16x144xf32>
    %154 = vector.shape_cast %153 : vector<1x16x144xf32> to vector<16x144xf32>
    %c2_94 = arith.constant 2 : index
    %c0_95 = arith.constant 0 : index
    %c0_96 = arith.constant 0 : index
    %155 = vector.load %arg10[%c2_94, %c0_95, %c0_96] : memref<4x16x1xf32, #tpu.memory_space<vmem>>, vector<1x16x1xf32>
    %156 = vector.shape_cast %155 : vector<1x16x1xf32> to vector<16x1xf32>
    %c19_i32_97 = arith.constant 19 : i32
    %157 = tpu.dynamic_rotate %152 by %c19_i32_97 dim 1 : vector<16x384xf32>, i32 -> vector<16x384xf32>
    %c18_i32_98 = arith.constant 18 : i32
    %158 = tpu.dynamic_rotate %152 by %c18_i32_98 dim 1 : vector<16x384xf32>, i32 -> vector<16x384xf32>
    %c17_i32_99 = arith.constant 17 : i32
    %159 = tpu.dynamic_rotate %152 by %c17_i32_99 dim 1 : vector<16x384xf32>, i32 -> vector<16x384xf32>
    %c1_i32_100 = arith.constant 1 : i32
    %160 = tpu.dynamic_rotate %152 by %c1_i32_100 dim 1 : vector<16x384xf32>, i32 -> vector<16x384xf32>
    %c383_i32_101 = arith.constant 383 : i32
    %161 = tpu.dynamic_rotate %152 by %c383_i32_101 dim 1 : vector<16x384xf32>, i32 -> vector<16x384xf32>
    %c367_i32_102 = arith.constant 367 : i32
    %162 = tpu.dynamic_rotate %152 by %c367_i32_102 dim 1 : vector<16x384xf32>, i32 -> vector<16x384xf32>
    %c366_i32_103 = arith.constant 366 : i32
    %163 = tpu.dynamic_rotate %152 by %c366_i32_103 dim 1 : vector<16x384xf32>, i32 -> vector<16x384xf32>
    %c365_i32_104 = arith.constant 365 : i32
    %164 = tpu.dynamic_rotate %152 by %c365_i32_104 dim 1 : vector<16x384xf32>, i32 -> vector<16x384xf32>
    %165 = tpu.concatenate %157, %158, %159, %160, %152, %161, %162, %163, %164 in 0 : vector<16x384xf32>, vector<16x384xf32>, vector<16x384xf32>, vector<16x384xf32>, vector<16x384xf32>, vector<16x384xf32>, vector<16x384xf32>, vector<16x384xf32>, vector<16x384xf32> -> vector<144x384xf32>
    %cst_105 = arith.constant dense<0.000000e+00> : vector<16x384xf32>
    %166 = tpu.matmul %154, %165, %cst_105 {dimension_numbers = #tpu.dot_dimension_numbers<[1], [0], [0], [1], [0, 0, 1, 1], [], []>} : vector<16x144xf32>, vector<144x384xf32>, vector<16x384xf32> -> vector<16x384xf32>
    %167 = vector.broadcast %156 : vector<16x1xf32> to vector<16x384xf32>
    %168 = arith.addf %166, %167 : vector<16x384xf32>
    %169 = arith.addf %168, %147 : vector<16x384xf32>
    %c2_106 = arith.constant 2 : index
    %c0_107 = arith.constant 0 : index
    %c0_108 = arith.constant 0 : index
    %170 = vector.load %arg11[%c2_106, %c0_107, %c0_108] : memref<4x8x16xf32, #tpu.memory_space<vmem>>, vector<1x8x16xf32>
    %171 = vector.shape_cast %170 : vector<1x8x16xf32> to vector<8x16xf32>
    %cst_109 = arith.constant dense<0.000000e+00> : vector<8x384xf32>
    %172 = tpu.matmul %171, %169, %cst_109 {dimension_numbers = #tpu.dot_dimension_numbers<[1], [0], [0], [1], [0, 0, 1, 1], [], []>} : vector<8x16xf32>, vector<16x384xf32>, vector<8x384xf32> -> vector<8x384xf32>
    %c2_110 = arith.constant 2 : index
    %c0_111 = arith.constant 0 : index
    %c0_112 = arith.constant 0 : index
    %173 = vector.load %arg12[%c2_110, %c0_111, %c0_112] : memref<4x8x1xf32, #tpu.memory_space<vmem>>, vector<1x8x1xf32>
    %174 = vector.shape_cast %173 : vector<1x8x1xf32> to vector<8x1xf32>
    %175 = vector.broadcast %174 : vector<8x1xf32> to vector<8x384xf32>
    %176 = arith.addf %172, %175 : vector<8x384xf32>
    %177 = arith.addf %176, %140 : vector<8x384xf32>
    %cst_113 = arith.constant 0.000000e+00 : f32
    %178 = vector.broadcast %cst_113 : f32 to vector<8x384xf32>
    %179 = arith.cmpf oge, %177, %178 : vector<8x384xf32>
    %cst_114 = arith.constant 1.000000e-01 : f32
    %180 = vector.broadcast %cst_114 : f32 to vector<8x384xf32>
    %181 = arith.mulf %180, %177 : vector<8x384xf32>
    %182 = arith.select %179, %177, %181 : vector<8x384xi1>, vector<8x384xf32>
    %c3 = arith.constant 3 : index
    %c0_115 = arith.constant 0 : index
    %c0_116 = arith.constant 0 : index
    %183 = vector.load %arg8[%c3, %c0_115, %c0_116] : memref<4x16x1xf32, #tpu.memory_space<vmem>>, vector<1x16x1xf32>
    %184 = vector.shape_cast %183 : vector<1x16x1xf32> to vector<16x1xf32>
    %c3_117 = arith.constant 3 : index
    %c0_118 = arith.constant 0 : index
    %c0_119 = arith.constant 0 : index
    %185 = vector.load %arg7[%c3_117, %c0_118, %c0_119] : memref<4x16x8xf32, #tpu.memory_space<vmem>>, vector<1x16x8xf32>
    %186 = vector.shape_cast %185 : vector<1x16x8xf32> to vector<16x8xf32>
    %cst_120 = arith.constant dense<0.000000e+00> : vector<16x384xf32>
    %187 = tpu.matmul %186, %182, %cst_120 {dimension_numbers = #tpu.dot_dimension_numbers<[1], [0], [0], [1], [0, 0, 1, 1], [], []>} : vector<16x8xf32>, vector<8x384xf32>, vector<16x384xf32> -> vector<16x384xf32>
    %188 = vector.broadcast %184 : vector<16x1xf32> to vector<16x384xf32>
    %189 = arith.addf %187, %188 : vector<16x384xf32>
    %190 = vector.shape_cast %4 : vector<1x384xi1> to vector<1x384xi1>
    %191 = vector.broadcast %190 : vector<1x384xi1> to vector<16x384xi1>
    %192 = vector.shape_cast %184 : vector<16x1xf32> to vector<16x1xf32>
    %193 = vector.broadcast %192 : vector<16x1xf32> to vector<16x384xf32>
    %194 = arith.select %191, %193, %189 : vector<16x384xi1>, vector<16x384xf32>
    %c3_121 = arith.constant 3 : index
    %c0_122 = arith.constant 0 : index
    %c0_123 = arith.constant 0 : index
    %195 = vector.load %arg9[%c3_121, %c0_122, %c0_123] : memref<4x16x144xf32, #tpu.memory_space<vmem>>, vector<1x16x144xf32>
    %196 = vector.shape_cast %195 : vector<1x16x144xf32> to vector<16x144xf32>
    %c3_124 = arith.constant 3 : index
    %c0_125 = arith.constant 0 : index
    %c0_126 = arith.constant 0 : index
    %197 = vector.load %arg10[%c3_124, %c0_125, %c0_126] : memref<4x16x1xf32, #tpu.memory_space<vmem>>, vector<1x16x1xf32>
    %198 = vector.shape_cast %197 : vector<1x16x1xf32> to vector<16x1xf32>
    %c19_i32_127 = arith.constant 19 : i32
    %199 = tpu.dynamic_rotate %194 by %c19_i32_127 dim 1 : vector<16x384xf32>, i32 -> vector<16x384xf32>
    %c18_i32_128 = arith.constant 18 : i32
    %200 = tpu.dynamic_rotate %194 by %c18_i32_128 dim 1 : vector<16x384xf32>, i32 -> vector<16x384xf32>
    %c17_i32_129 = arith.constant 17 : i32
    %201 = tpu.dynamic_rotate %194 by %c17_i32_129 dim 1 : vector<16x384xf32>, i32 -> vector<16x384xf32>
    %c1_i32_130 = arith.constant 1 : i32
    %202 = tpu.dynamic_rotate %194 by %c1_i32_130 dim 1 : vector<16x384xf32>, i32 -> vector<16x384xf32>
    %c383_i32_131 = arith.constant 383 : i32
    %203 = tpu.dynamic_rotate %194 by %c383_i32_131 dim 1 : vector<16x384xf32>, i32 -> vector<16x384xf32>
    %c367_i32_132 = arith.constant 367 : i32
    %204 = tpu.dynamic_rotate %194 by %c367_i32_132 dim 1 : vector<16x384xf32>, i32 -> vector<16x384xf32>
    %c366_i32_133 = arith.constant 366 : i32
    %205 = tpu.dynamic_rotate %194 by %c366_i32_133 dim 1 : vector<16x384xf32>, i32 -> vector<16x384xf32>
    %c365_i32_134 = arith.constant 365 : i32
    %206 = tpu.dynamic_rotate %194 by %c365_i32_134 dim 1 : vector<16x384xf32>, i32 -> vector<16x384xf32>
    %207 = tpu.concatenate %199, %200, %201, %202, %194, %203, %204, %205, %206 in 0 : vector<16x384xf32>, vector<16x384xf32>, vector<16x384xf32>, vector<16x384xf32>, vector<16x384xf32>, vector<16x384xf32>, vector<16x384xf32>, vector<16x384xf32>, vector<16x384xf32> -> vector<144x384xf32>
    %cst_135 = arith.constant dense<0.000000e+00> : vector<16x384xf32>
    %208 = tpu.matmul %196, %207, %cst_135 {dimension_numbers = #tpu.dot_dimension_numbers<[1], [0], [0], [1], [0, 0, 1, 1], [], []>} : vector<16x144xf32>, vector<144x384xf32>, vector<16x384xf32> -> vector<16x384xf32>
    %209 = vector.broadcast %198 : vector<16x1xf32> to vector<16x384xf32>
    %210 = arith.addf %208, %209 : vector<16x384xf32>
    %211 = arith.addf %210, %189 : vector<16x384xf32>
    %c3_136 = arith.constant 3 : index
    %c0_137 = arith.constant 0 : index
    %c0_138 = arith.constant 0 : index
    %212 = vector.load %arg11[%c3_136, %c0_137, %c0_138] : memref<4x8x16xf32, #tpu.memory_space<vmem>>, vector<1x8x16xf32>
    %213 = vector.shape_cast %212 : vector<1x8x16xf32> to vector<8x16xf32>
    %cst_139 = arith.constant dense<0.000000e+00> : vector<8x384xf32>
    %214 = tpu.matmul %213, %211, %cst_139 {dimension_numbers = #tpu.dot_dimension_numbers<[1], [0], [0], [1], [0, 0, 1, 1], [], []>} : vector<8x16xf32>, vector<16x384xf32>, vector<8x384xf32> -> vector<8x384xf32>
    %c3_140 = arith.constant 3 : index
    %c0_141 = arith.constant 0 : index
    %c0_142 = arith.constant 0 : index
    %215 = vector.load %arg12[%c3_140, %c0_141, %c0_142] : memref<4x8x1xf32, #tpu.memory_space<vmem>>, vector<1x8x1xf32>
    %216 = vector.shape_cast %215 : vector<1x8x1xf32> to vector<8x1xf32>
    %217 = vector.broadcast %216 : vector<8x1xf32> to vector<8x384xf32>
    %218 = arith.addf %214, %217 : vector<8x384xf32>
    %219 = arith.addf %218, %182 : vector<8x384xf32>
    %cst_143 = arith.constant 0.000000e+00 : f32
    %220 = vector.broadcast %cst_143 : f32 to vector<8x384xf32>
    %221 = arith.cmpf oge, %219, %220 : vector<8x384xf32>
    %cst_144 = arith.constant 1.000000e-01 : f32
    %222 = vector.broadcast %cst_144 : f32 to vector<8x384xf32>
    %223 = arith.mulf %222, %219 : vector<8x384xf32>
    %224 = arith.select %221, %219, %223 : vector<8x384xi1>, vector<8x384xf32>
    %c0_145 = arith.constant 0 : index
    %c0_146 = arith.constant 0 : index
    %225 = vector.load %arg13[%c0_145, %c0_146] : memref<8x1xf32, #tpu.memory_space<vmem>>, vector<8x1xf32>
    %226 = vector.broadcast %225 : vector<8x1xf32> to vector<8x384xf32>
    %227 = arith.mulf %224, %226 : vector<8x384xf32>
    %c0_147 = arith.constant 0 : index
    %c0_148 = arith.constant 0 : index
    %228 = vector.load %arg14[%c0_147, %c0_148] : memref<8x1xf32, #tpu.memory_space<vmem>>, vector<8x1xf32>
    %229 = vector.broadcast %228 : vector<8x1xf32> to vector<8x384xf32>
    %230 = arith.addf %227, %229 : vector<8x384xf32>
    %c0_149 = arith.constant 0 : index
    %c0_150 = arith.constant 0 : index
    %231 = vector.load %arg14[%c0_149, %c0_150] : memref<8x1xf32, #tpu.memory_space<vmem>>, vector<8x1xf32>
    %232 = vector.shape_cast %4 : vector<1x384xi1> to vector<1x384xi1>
    %233 = vector.broadcast %232 : vector<1x384xi1> to vector<8x384xi1>
    %234 = vector.shape_cast %231 : vector<8x1xf32> to vector<8x1xf32>
    %235 = vector.broadcast %234 : vector<8x1xf32> to vector<8x384xf32>
    %236 = arith.select %233, %235, %230 : vector<8x384xi1>, vector<8x384xf32>
    %c0_151 = arith.constant 0 : index
    %c0_152 = arith.constant 0 : index
    %237 = vector.load %arg15[%c0_151, %c0_152] : memref<4x72xf32, #tpu.memory_space<vmem>>, vector<4x72xf32>
    %c0_153 = arith.constant 0 : index
    %c0_154 = arith.constant 0 : index
    %238 = vector.load %arg16[%c0_153, %c0_154] : memref<4x1xf32, #tpu.memory_space<vmem>>, vector<4x1xf32>
    %c19_i32_155 = arith.constant 19 : i32
    %239 = tpu.dynamic_rotate %236 by %c19_i32_155 dim 1 : vector<8x384xf32>, i32 -> vector<8x384xf32>
    %c18_i32_156 = arith.constant 18 : i32
    %240 = tpu.dynamic_rotate %236 by %c18_i32_156 dim 1 : vector<8x384xf32>, i32 -> vector<8x384xf32>
    %c17_i32_157 = arith.constant 17 : i32
    %241 = tpu.dynamic_rotate %236 by %c17_i32_157 dim 1 : vector<8x384xf32>, i32 -> vector<8x384xf32>
    %c1_i32_158 = arith.constant 1 : i32
    %242 = tpu.dynamic_rotate %236 by %c1_i32_158 dim 1 : vector<8x384xf32>, i32 -> vector<8x384xf32>
    %c383_i32_159 = arith.constant 383 : i32
    %243 = tpu.dynamic_rotate %236 by %c383_i32_159 dim 1 : vector<8x384xf32>, i32 -> vector<8x384xf32>
    %c367_i32_160 = arith.constant 367 : i32
    %244 = tpu.dynamic_rotate %236 by %c367_i32_160 dim 1 : vector<8x384xf32>, i32 -> vector<8x384xf32>
    %c366_i32_161 = arith.constant 366 : i32
    %245 = tpu.dynamic_rotate %236 by %c366_i32_161 dim 1 : vector<8x384xf32>, i32 -> vector<8x384xf32>
    %c365_i32_162 = arith.constant 365 : i32
    %246 = tpu.dynamic_rotate %236 by %c365_i32_162 dim 1 : vector<8x384xf32>, i32 -> vector<8x384xf32>
    %247 = tpu.concatenate %239, %240, %241, %242, %236, %243, %244, %245, %246 in 0 : vector<8x384xf32>, vector<8x384xf32>, vector<8x384xf32>, vector<8x384xf32>, vector<8x384xf32>, vector<8x384xf32>, vector<8x384xf32>, vector<8x384xf32>, vector<8x384xf32> -> vector<72x384xf32>
    %cst_163 = arith.constant dense<0.000000e+00> : vector<4x384xf32>
    %248 = tpu.matmul %237, %247, %cst_163 {dimension_numbers = #tpu.dot_dimension_numbers<[1], [0], [0], [1], [0, 0, 1, 1], [], []>} : vector<4x72xf32>, vector<72x384xf32>, vector<4x384xf32> -> vector<4x384xf32>
    %249 = vector.broadcast %238 : vector<4x1xf32> to vector<4x384xf32>
    %250 = arith.addf %248, %249 : vector<4x384xf32>
    %c0_164 = arith.constant 0 : index
    %c0_165 = arith.constant 0 : index
    %251 = vector.load %arg17[%c0_164, %c0_165] : memref<4x1xf32, #tpu.memory_space<vmem>>, vector<4x1xf32>
    %252 = vector.broadcast %251 : vector<4x1xf32> to vector<4x384xf32>
    %253 = arith.mulf %250, %252 : vector<4x384xf32>
    %c0_166 = arith.constant 0 : index
    %c0_167 = arith.constant 0 : index
    %254 = vector.load %arg18[%c0_166, %c0_167] : memref<4x1xf32, #tpu.memory_space<vmem>>, vector<4x1xf32>
    %255 = vector.broadcast %254 : vector<4x1xf32> to vector<4x384xf32>
    %256 = arith.addf %253, %255 : vector<4x384xf32>
    %257 = math.absf %256 : vector<4x384xf32>
    %cst_168 = arith.constant 0.000000e+00 : f32
    %258 = vector.broadcast %cst_168 : f32 to vector<4x384xf32>
    %259 = arith.subf %258, %257 : vector<4x384xf32>
    %260 = math.exp %259 : vector<4x384xf32>
    %cst_169 = arith.constant 1.000000e+00 : f32
    %261 = vector.broadcast %cst_169 : f32 to vector<4x384xf32>
    %262 = arith.addf %261, %260 : vector<4x384xf32>
    %263 = tpu.reciprocal %262 {approx = true} : vector<4x384xf32> -> vector<4x384xf32>
    %264 = arith.mulf %262, %263 : vector<4x384xf32>
    %cst_170 = arith.constant 2.000000e+00 : f32
    %265 = vector.broadcast %cst_170 : f32 to vector<4x384xf32>
    %266 = arith.subf %265, %264 : vector<4x384xf32>
    %267 = arith.mulf %263, %266 : vector<4x384xf32>
    %cst_171 = arith.constant 0.000000e+00 : f32
    %268 = vector.broadcast %cst_171 : f32 to vector<4x384xf32>
    %269 = arith.cmpf oge, %256, %268 : vector<4x384xf32>
    %270 = arith.mulf %260, %267 : vector<4x384xf32>
    %271 = arith.select %269, %267, %270 : vector<4x384xi1>, vector<4x384xf32>
    %272 = arith.mulf %271, %1 : vector<4x384xf32>
    %c0_172 = arith.constant 0 : index
    %c0_173 = arith.constant 0 : index
    %c0_174 = arith.constant 0 : index
    %273 = vector.load %arg19[%c0_172, %c0_173, %c0_174] : memref<1x4x384xf32, #tpu.memory_space<vmem>>, vector<1x4x384xf32>
    %274 = vector.shape_cast %273 : vector<1x4x384xf32> to vector<4x384xf32>
    %275 = vector.shape_cast %272 : vector<4x384xf32> to vector<1x4x384xf32>
    tpu.vector_store %arg19[%c0_172, %c0_173, %c0_174], %275 {strides = array<i32>} : memref<1x4x384xf32, #tpu.memory_space<vmem>>, vector<1x4x384xf32>,
    return
  }
  func.func @transform_0(%arg0: i32) -> (i32, i32, i32) {
    %c0_i32 = arith.constant 0 : i32
    %c0_i32_0 = arith.constant 0 : i32
    %c0_i32_1 = arith.constant 0 : i32
    return %arg0, %c0_i32, %c0_i32_0 : i32, i32, i32
  }
  func.func @transform_1(%arg0: i32) -> (i32, i32) {
    %c0_i32 = arith.constant 0 : i32
    %c0_i32_0 = arith.constant 0 : i32
    %c0_i32_1 = arith.constant 0 : i32
    return %c0_i32, %c0_i32_0 : i32, i32
  }
  func.func @transform_2(%arg0: i32) -> (i32, i32) {
    %c0_i32 = arith.constant 0 : i32
    %c0_i32_0 = arith.constant 0 : i32
    %c0_i32_1 = arith.constant 0 : i32
    return %c0_i32, %c0_i32_0 : i32, i32
  }
  func.func @transform_3(%arg0: i32) -> (i32, i32) {
    %c0_i32 = arith.constant 0 : i32
    %c0_i32_0 = arith.constant 0 : i32
    %c0_i32_1 = arith.constant 0 : i32
    return %c0_i32, %c0_i32_0 : i32, i32
  }
  func.func @transform_4(%arg0: i32) -> (i32, i32) {
    %c0_i32 = arith.constant 0 : i32
    %c0_i32_0 = arith.constant 0 : i32
    %c0_i32_1 = arith.constant 0 : i32
    return %c0_i32, %c0_i32_0 : i32, i32
  }
  func.func @transform_5(%arg0: i32) -> (i32, i32) {
    %c0_i32 = arith.constant 0 : i32
    %c0_i32_0 = arith.constant 0 : i32
    %c0_i32_1 = arith.constant 0 : i32
    return %c0_i32, %c0_i32_0 : i32, i32
  }
  func.func @transform_6(%arg0: i32) -> (i32, i32, i32) {
    %c0_i32 = arith.constant 0 : i32
    %c0_i32_0 = arith.constant 0 : i32
    %c0_i32_1 = arith.constant 0 : i32
    %c0_i32_2 = arith.constant 0 : i32
    return %c0_i32, %c0_i32_0, %c0_i32_1 : i32, i32, i32
  }
  func.func @transform_7(%arg0: i32) -> (i32, i32, i32) {
    %c0_i32 = arith.constant 0 : i32
    %c0_i32_0 = arith.constant 0 : i32
    %c0_i32_1 = arith.constant 0 : i32
    %c0_i32_2 = arith.constant 0 : i32
    return %c0_i32, %c0_i32_0, %c0_i32_1 : i32, i32, i32
  }
  func.func @transform_8(%arg0: i32) -> (i32, i32, i32) {
    %c0_i32 = arith.constant 0 : i32
    %c0_i32_0 = arith.constant 0 : i32
    %c0_i32_1 = arith.constant 0 : i32
    %c0_i32_2 = arith.constant 0 : i32
    return %c0_i32, %c0_i32_0, %c0_i32_1 : i32, i32, i32
  }
  func.func @transform_9(%arg0: i32) -> (i32, i32, i32) {
    %c0_i32 = arith.constant 0 : i32
    %c0_i32_0 = arith.constant 0 : i32
    %c0_i32_1 = arith.constant 0 : i32
    %c0_i32_2 = arith.constant 0 : i32
    return %c0_i32, %c0_i32_0, %c0_i32_1 : i32, i32, i32
  }
  func.func @transform_10(%arg0: i32) -> (i32, i32, i32) {
    %c0_i32 = arith.constant 0 : i32
    %c0_i32_0 = arith.constant 0 : i32
    %c0_i32_1 = arith.constant 0 : i32
    %c0_i32_2 = arith.constant 0 : i32
    return %c0_i32, %c0_i32_0, %c0_i32_1 : i32, i32, i32
  }
  func.func @transform_11(%arg0: i32) -> (i32, i32, i32) {
    %c0_i32 = arith.constant 0 : i32
    %c0_i32_0 = arith.constant 0 : i32
    %c0_i32_1 = arith.constant 0 : i32
    %c0_i32_2 = arith.constant 0 : i32
    return %c0_i32, %c0_i32_0, %c0_i32_1 : i32, i32, i32
  }
  func.func @transform_12(%arg0: i32) -> (i32, i32) {
    %c0_i32 = arith.constant 0 : i32
    %c0_i32_0 = arith.constant 0 : i32
    %c0_i32_1 = arith.constant 0 : i32
    return %c0_i32, %c0_i32_0 : i32, i32
  }
  func.func @transform_13(%arg0: i32) -> (i32, i32) {
    %c0_i32 = arith.constant 0 : i32
    %c0_i32_0 = arith.constant 0 : i32
    %c0_i32_1 = arith.constant 0 : i32
    return %c0_i32, %c0_i32_0 : i32, i32
  }
  func.func @transform_14(%arg0: i32) -> (i32, i32) {
    %c0_i32 = arith.constant 0 : i32
    %c0_i32_0 = arith.constant 0 : i32
    %c0_i32_1 = arith.constant 0 : i32
    return %c0_i32, %c0_i32_0 : i32, i32
  }
  func.func @transform_15(%arg0: i32) -> (i32, i32) {
    %c0_i32 = arith.constant 0 : i32
    %c0_i32_0 = arith.constant 0 : i32
    %c0_i32_1 = arith.constant 0 : i32
    return %c0_i32, %c0_i32_0 : i32, i32
  }
  func.func @transform_16(%arg0: i32) -> (i32, i32) {
    %c0_i32 = arith.constant 0 : i32
    %c0_i32_0 = arith.constant 0 : i32
    %c0_i32_1 = arith.constant 0 : i32
    return %c0_i32, %c0_i32_0 : i32, i32
  }
  func.func @transform_17(%arg0: i32) -> (i32, i32) {
    %c0_i32 = arith.constant 0 : i32
    %c0_i32_0 = arith.constant 0 : i32
    %c0_i32_1 = arith.constant 0 : i32
    return %c0_i32, %c0_i32_0 : i32, i32
  }
  func.func @transform_18(%arg0: i32) -> (i32, i32, i32) {
    %c0_i32 = arith.constant 0 : i32
    %c0_i32_0 = arith.constant 0 : i32
    %c0_i32_1 = arith.constant 0 : i32
    return %arg0, %c0_i32, %c0_i32_0 : i32, i32, i32
  }
}

</mosaic_0001>

<bundles_post_ra>
// kernel: _lambda_.1
= control target key start
LH: loop header
LB: loop body
LE: loop exit
PB: predicated region body
PF: predicated region fallthrough
CT: control target
= control target key end

     0   :  { %s5646_s27 = smov 0   ;;  %s7709_s0 = inlined_call_operand.vmem [shape: f32[2,4,384], index: 0, kind: input, shape index: {}]   ;;  %s7710_s1 = inlined_call_operand.vmem [shape: f32[1,384], index: 1, kind: input, shape index: {}]   ;;  %s7711_s2 = inlined_call_operand.vmem [shape: f32[4,1], index: 2, kind: input, shape index: {}]   ;;  %s7712_s3 = inlined_call_operand.vmem [shape: f32[4,1], index: 3, kind: input, shape index: {}]   ;;  %s7713_s4 = inlined_call_operand.vmem [shape: f32[8,36], index: 4, kind: input, shape index: {}]   ;;  %s7714_s5 = inlined_call_operand.vmem [shape: f32[8,1], index: 5, kind: input, shape index: {}]   ;;  %s7715_s6 = inlined_call_operand.vmem [shape: f32[4,16,8], index: 6, kind: input, shape index: {}]   ;;  %s7716_s7 = inlined_call_operand.vmem [shape: f32[4,16,1], index: 7, kind: input, shape index: {}]   ;;  %s7717_s8 = inlined_call_operand.vmem [shape: f32[4,16,144], index: 8, kind: input, shape index: {}]   ;;  %s7718_s9 = inlined_call_operand.vmem [shape: f32[4,16,1], index: 9, kind: input, shape index: {}]   ;;  %s7719_s10 = inlined_call_operand.vmem [shape: f32[4,8,16], index: 10, kind: input, shape index: {}]   ;;  %s7720_s11 = inlined_call_operand.vmem [shape: f32[4,8,1], index: 11, kind: input, shape index: {}]   ;;  %s7721_s12 = inlined_call_operand.vmem [shape: f32[8,1], index: 12, kind: input, shape index: {}]   ;;  %s7722_s13 = inlined_call_operand.vmem [shape: f32[8,1], index: 13, kind: input, shape index: {}]   ;;  %s7723_s14 = inlined_call_operand.vmem [shape: f32[4,72], index: 14, kind: input, shape index: {}]   ;;  %s7724_s15 = inlined_call_operand.vmem [shape: f32[4,1], index: 15, kind: input, shape index: {}]   ;;  %s7725_s16 = inlined_call_operand.vmem [shape: f32[4,1], index: 16, kind: input, shape index: {}]   ;;  %s7726_s17 = inlined_call_operand.vmem [shape: f32[4,1], index: 17, kind: input, shape index: {}]   ;;  %s7727_s18 = inlined_call_operand.vmem [shape: f32[2,4,384], index: 18, kind: output, shape index: {}]  }
   0x1   :  { %7751 = sst [smem:[#allocation4_spill]] %s7709_s0 }
   0x2   :  { %7752 = sst [smem:[#allocation5_spill]] %s7710_s1 }
   0x3   :  { %7753 = sst [smem:[#allocation6_spill]] %s7711_s2 }
   0x4   :  { %7754 = sst [smem:[#allocation7_spill]] %s7712_s3 }
   0x5   :  { %7755 = sst [smem:[#allocation8_spill]] %s7713_s4 }
   0x6   :  { %7756 = sst [smem:[#allocation9_spill]] %s7714_s5 }
   0x7   :  { %7757 = sst [smem:[#allocation10_spill]] %s7727_s18 }
   0x8 LB: > { %7758 = sst [smem:[#allocation2_spill]] %s5529_s27  ;;  %s5179_s28 = sadd.s32 4294967295, %s5529_s27   ;;  %s5529_s27 = sphi %s5646_s27, %s28_s27  }
   0x9   : > { %p5183_p0 = scmp.ge.s32.totalorder %s5529_s27, 1  ;;  %p512_p1 = scmp.lt.s32.totalorder %s5529_s27, 3 }
   0xb   : > { %p513_p2 = pnand %p5183_p0, %p512_p1 }
   0xd   : > { %516 = sbr.rel (%p513_p2) target bundleno = 4188 (0x105c), region = 92 }
  0x12   : > { %s7759_s0 = sld [smem:[#allocation6_spill]]  ;;  %v5531_v1 = vmov 0   ;;  %s5532_s22 = smov 124   ;;  %v588_v4 = vlaneseq  ;;  %v5536_v5 = vmov 839922192   ;;  %v5540_v28 = vmov 0.0  }
  0x13   : > { %5506 = vset.pattern.permute.xlu0 %v5531_v1  ;;  %s7760_s4 = sld [smem:[#allocation8_spill]]  ;;  %5507 = vset.pattern.permute.xlu1 %v5531_v1  ;;  %s5533_s2 = smov 112   ;;  %v586_v6 = vunpack.c.l.s4 %v5536_v5  ;;  %vm7745_vm3 = vmmov 0   ;;  %v2142_v34 = vld [vmem:[%s7716_s7] sm:$0xff]  ;;  %vm723_vm6 = vcmask 1043456   ;;  %vm720_vm7 = vcmask 31744  }
  0x14   : > { %s7761_s3 = sld [smem:[#allocation7_spill]]  ;;  %s5534_s23 = smov 120   ;;  %v589_v7 = vshrl.u32 %v588_v4, 7  ;;  %5363 = vmatprep.subr.mxu1 %v5540_v28  ;;  %797 = vmatprep.mubr.f32.mxu0 %v5540_v28  ;;  %v5777_v47 = vand.u32 127, %v588_v4  ;;  %vm2156_vm15 = vcmask 64512  }
  0x15   : > { %s5535_s24 = smov 116   ;;  %p566_p3 = scmp.lt.s32.totalorder %s5179_s28, 1  ;;  %v587_v9 = vunpack.c.0.s8 %v586_v6  ;;  %5365 = vmatprep.mubr.msk.f32.mxu1 %vm7745_vm3, %v5540_v28 }
  0x16   : > { %s7762_s29 = sld [smem:[#allocation5_spill]]  ;;  %v614_v11 = vsub.s32 0, %v589_v7  ;;  %v622_v12 = vsub.s32 2, %v589_v7  ;;  %s7733_s21 = smov 18   ;;  %v618_v29 = vsub.s32 1, %v589_v7  ;;  %vm653_vm5 = vcmp.lt.s32.totalorder %v5777_v47, 18 }
  0x17   : > { %s7789_s28 = smov (!%p566_p3, %s5179_s28), 1  ;;  %v590_v10 = vsub.s32 %v587_v9, %v589_v7  ;;  %s7763_s1 = sld [smem:[#allocation4_spill]]  ;;  %vm643_vm8 = vcmp.lt.s32.totalorder %v5777_v47, 19  ;;  %vm663_vm9 = vcmp.lt.s32.totalorder %v5777_v47, 17  ;;  %vm673_vm10 = vcmp.lt.s32.totalorder %v5777_v47, 1 }
  0x18   : > { %v580_v0 = vld [vmem:[%s7759_s0] sm:$0xf]  ;;  %s7728_s30 = smul.u32 12, %s7789_s28  ;;  %s7735_s25 = smov 111   ;;  %vm683_vm11 = vcmp.lt.s32.totalorder %v5777_v47, 127  ;;  %vm693_vm12 = vcmp.lt.s32.totalorder %v5777_v47, 111 }
  0x19   : > { %v5660_v2 = vld [vmem:[%s7760_s4] sm:$0xff]  ;;  %583 = vperm.xlu0 %5506, %v580_v0   ;;  %s7739_s26 = smov 110   ;;  %s5547_s0 = smov 104   ;;  %vm703_vm13 = vcmp.lt.s32.totalorder %v5777_v47, 110  ;;  %vm7750_vm14 = vcmp.lt.s32.totalorder %v5777_v47, 109 }
  0x1a   : > { %v595_v3 = vld [vmem:[%s7761_s3] sm:$0xf]  ;;  %718 = vrot.lane.b32.xlu1 %v5660_v2, %s5532_s22  ;;  %s7729_s22 = smov 19   ;;  %s7741_s19 = smov 109  }
  0x1b   : > { %s7765_s5 = sld [smem:[#allocation9_spill]] }
  0x1c   : > { %v578_v8 = vld [vmem:[%s7762_s29] sm:$0x7]  ;;  %s5546_s29 = smov 108   ;;  %s7786_s3 = sld [smem:[#allocation10_spill]] }
  0x1d   : > { %598 = vperm.xlu0 %5506, %v595_v3   ;;  %vm579_vm0 = vcmp.ne.f32.partialorder %v578_v8, 0.0  ;;  %s5681_s20 = scalar_lea.vmem %s7763_s1, %s7728_s30  ;;  %s5549_s1 = smov 100  }
  0x1e   : > { %1340 = vrot.lane.b32.xlu1 %v5660_v2, %s5533_s2  ;;  %v611_v13 = vsel %vm579_vm0, 1, %v5531_v1  ;;  %7764 = sst [smem:[#allocation3_spill]] %s5681_s20  ;;  %v576_v18 = vld [vmem:[%s5681_s20] sm:$0xff]  ;;  %v577_v19 = vld [vmem:[%s5681_s20 + $0x8] sm:$0xf]  ;;  %s7737_s2 = smov 17  }
  0x1f   : > { %v5683_v16 = vrot.slane %v611_v13, %v614_v11  ;;  %v5685_v17 = vrot.slane %v611_v13, %v622_v12  ;;  %v5715_v30 = vrot.slane %v611_v13, %v618_v29  ;;  %s7766_s30 = smov 127  }
  0x21   : > { %1026 = vrot.lane.b32.xlu0 %v5660_v2, %s5534_s23  ;;  %vm624_vm1 = vcmp.eq.s32.totalorder %v5683_v16, 1  ;;  %vm626_vm2 = vcmp.eq.s32.totalorder %v5685_v17, 1  ;;  %s7731_s23 = smov 127   ;;  %vm625_vm4 = vcmp.eq.s32.totalorder %v5715_v30, 1  ;;  %v634_v33 = vld [vmem:[%s7765_s5] sm:$0xff] }
  0x22   : > { %v5058_v30 = vld [vmem:[%s7725_s16] sm:$0xf] }
  0x25   : > { %1183 = vrot.lane.b32.xlu0 %v5660_v2, %s5535_s24  ;;  %s7743_s24 = smov 1  }
  0x8c   : > { %v719_v35 = vpop.permute.xlu1 %718 }
  0x90   : > { %v5770_v37 = vpop.permute.xlu1 %1340 }
  0x94   : > { %v584_v14 = vpop.permute.xlu0 %583 }
  0x95   : > { %v591_v15 = vrot.slane %v584_v14, %v590_v10 }
  0x97   : > { %v593_v21 = vmul.f32 %v591_v15, %v576_v18  ;;  %v594_v22 = vmul.f32 %v591_v15, %v577_v19 }
  0x98   : > { %v599_v20 = vpop.permute.xlu0 %598 }
  0x99   : > { %v607_v23 = vrot.slane %v599_v20, %v590_v10 }
  0x9b   : > { %v609_v24 = vadd.f32 %v607_v23, %v593_v21  ;;  %v610_v25 = vadd.f32 %v607_v23, %v594_v22 }
  0x9c   : > { %v5768_v36 = vpop.permute.xlu0 %1026 }
  0x9d   : > { %v5693_v26 = vsel %vm624_vm1, %v599_v20, %v609_v24  ;;  %v5697_v27 = vsel %vm626_vm2, %v599_v20, %v610_v25  ;;  %v628_v31 = vcombine.high %v609_v24, %v609_v24 }
  0x9e   : > { %651 = vrot.lane.b32.xlu0 %v5697_v27, %s7733_s21  ;;  %647 = vrot.lane.b32.xlu1 %v5693_v26, %s7733_s21 }
  0x9f   : > { %v5728_v32 = vsel %vm625_vm4, %v599_v20, %v628_v31 }
  0xa0   : > { %v5772_v38 = vpop.permute.xlu0 %1183 }
  0xa2   : > { %635 = vrot.lane.b32.xlu0 %v5693_v26, %s7729_s22  ;;  %657 = vrot.lane.b32.xlu1 %v5693_v26, %s7737_s2 }
  0xa6   : > { %639 = vrot.lane.b32.xlu0 %v5697_v27, %s7729_s22  ;;  %661 = vrot.lane.b32.xlu1 %v5697_v27, %s7737_s2 }
  0xaa   : > { %677 = vrot.lane.b32.xlu0 %v5693_v26, %s7731_s23  ;;  %667 = vrot.lane.b32.xlu1 %v5693_v26, %s7743_s24 }
  0xae   : > { %687 = vrot.lane.b32.xlu0 %v5693_v26, %s7735_s25  ;;  %671 = vrot.lane.b32.xlu1 %v5697_v27, %s7743_s24 }
  0xb2   : > { %659 = vrot.lane.b32.xlu0 %v5728_v32, %s7737_s2  ;;  %649 = vrot.lane.b32.xlu1 %v5728_v32, %s7733_s21 }
  0xb6   : > { %669 = vrot.lane.b32.xlu0 %v5728_v32, %s7743_s24  ;;  %637 = vrot.lane.b32.xlu1 %v5728_v32, %s7729_s22  ;;  %s7767_s22 = smov 19  }
  0xba   : > { %697 = vrot.lane.b32.xlu0 %v5693_v26, %s7739_s26  ;;  %681 = vrot.lane.b32.xlu1 %v5697_v27, %s7731_s23 }
  0xbe   : > { %679 = vrot.lane.b32.xlu0 %v5728_v32, %s7731_s23  ;;  %1497 = vrot.lane.b32.xlu1 %v5660_v2, %s5546_s29  ;;  %s5550_s23 = smov 96   ;;  %s7772_s29 = smov 18  }
  0xc2   : > { %689 = vrot.lane.b32.xlu0 %v5728_v32, %s7735_s25  ;;  %691 = vrot.lane.b32.xlu1 %v5697_v27, %s7735_s25 }
  0xc6   : > { %699 = vrot.lane.b32.xlu0 %v5728_v32, %s7739_s26  ;;  %1654 = vrot.lane.b32.xlu1 %v5660_v2, %s5547_s0  ;;  %s7773_s0 = smov 109  }
  0xca   : > { %709 = vrot.lane.b32.xlu0 %v5728_v32, %s7741_s19  ;;  %701 = vrot.lane.b32.xlu1 %v5697_v27, %s7739_s26 }
  0xce   : > { %707 = vrot.lane.b32.xlu0 %v5693_v26, %s7741_s19  ;;  %1811 = vrot.lane.b32.xlu1 %v5660_v2, %s5549_s1 }
  0xd2   : > { %2127 = vperm.xlu0 %5506, %v634_v33   ;;  %711 = vrot.lane.b32.xlu1 %v5697_v27, %s7741_s19  ;;  %v2143_v33 = vld [vmem:[%s7716_s7 + $0x8] sm:$0xff] }
  0xd6   : > { %2148 = vperm.xlu0 %5506, %v2142_v34   ;;  %1968 = vrot.lane.b32.xlu1 %v5660_v2, %s5550_s23 }
  0xda   : > { %2153 = vperm.xlu1 %5507, %v2143_v33  }
 0x110   : > { %v652_v39 = vpop.permute.xlu0 %651  ;;  %v648_v40 = vpop.permute.xlu1 %647 }
 0x111   : > { %v656_v54 = vsel %vm653_vm5, %v652_v39, %v648_v40 }
 0x114   : > { %v636_v41 = vpop.permute.xlu0 %635  ;;  %v658_v42 = vpop.permute.xlu1 %657 }
 0x118   : > { %v640_v43 = vpop.permute.xlu0 %639  ;;  %v662_v44 = vpop.permute.xlu1 %661 }
 0x119   : > { %v646_v59 = vsel %vm643_vm8, %v640_v43, %v636_v41  ;;  %v666_v0 = vsel %vm663_vm9, %v662_v44, %v658_v42 }
 0x11c   : > { %v5774_v45 = vpop.permute.xlu0 %677  ;;  %v668_v46 = vpop.permute.xlu1 %667 }
 0x120   : > { %v5779_v48 = vpop.permute.xlu0 %687  ;;  %v672_v49 = vpop.permute.xlu1 %671 }
 0x121   : > { %v676_v5 = vsel %vm673_vm10, %v672_v49, %v668_v46 }
 0x124   : > { %v660_v50 = vpop.permute.xlu0 %659  ;;  %v650_v51 = vpop.permute.xlu1 %649 }
 0x125   : > { %v655_v52 = vsel %vm653_vm5, %v648_v40, %v650_v51  ;;  %v654_v53 = vsel %vm653_vm5, %v650_v51, %v652_v39  ;;  %v664_v60 = vsel %vm663_vm9, %v660_v50, %v662_v44  ;;  %v665_v62 = vsel %vm663_vm9, %v658_v42, %v660_v50 }
 0x126   : > { %5186 = vmatprep.subr.msk.mxu0 %vm723_vm6, %v655_v52  ;;  %5364 = vmatpush3.msk.msra.mxu1 %vm723_vm6, %v654_v53 }
 0x127   : > { %5187 = vmatpush1.msk.msra.mxu0 %vm723_vm6, %v656_v54  ;;  %5366 = vmatmul.mubr.msk.f32.vlgmr.msra.gmra.mxu1 %vm720_vm7, %v719_v35 }
 0x128   : > { %v670_v55 = vpop.permute.xlu0 %669  ;;  %5188 = vmatmul.mubr.msk.f32.vlgmr.msra.gmra.mxu0 %vm720_vm7, %v719_v35  ;;  %v638_v56 = vpop.permute.xlu1 %637  ;;  %5368 = vmatprep.subr.mxu1 %v5540_v28 }
 0x129   : > { %v644_v57 = vsel %vm643_vm8, %v638_v56, %v640_v43  ;;  %v645_v58 = vsel %vm643_vm8, %v636_v41, %v638_v56  ;;  %5370 = vmatprep.mubr.msk.f32.mxu1 %vm7745_vm3, %v5540_v28  ;;  %949 = vmatprep.mubr.f32.mxu0 %v5540_v28  ;;  %v675_v1 = vsel %vm673_vm10, %v668_v46, %v670_v55 }
 0x12a   : > { %5191 = vmatprep.subr.msk.mxu0 %vm723_vm6, %v645_v58  ;;  %5369 = vmatpush3.msk.msra.mxu1 %vm723_vm6, %v644_v57 }
 0x12b   : > { %5192 = vmatpush1.msk.msra.mxu0 %vm723_vm6, %v646_v59  ;;  %5371 = vmatmul.mubr.msk.f32.vlgmr.msra.gmra.mxu1 %vm720_vm7, %v5660_v2 }
 0x12c   : > { %5373 = vmatprep.subr.mxu1 %v5540_v28  ;;  %v5813_v61 = vpop.permute.xlu0 %697  ;;  %5193 = vmatmul.mubr.msk.f32.vlgmr.msra.gmra.mxu0 %vm720_vm7, %v5660_v2  ;;  %v682_v63 = vpop.permute.xlu1 %681  ;;  %v674_v2 = vsel %vm673_vm10, %v670_v55, %v672_v49 }
 0x12d   : > { %5196 = vmatprep.subr.msk.mxu0 %vm723_vm6, %v665_v62  ;;  %5374 = vmatpush3.msk.msra.mxu1 %vm723_vm6, %v664_v60  ;;  %v686_v9 = vsel %vm683_vm11, %v682_v63, %v5774_v45 }
 0x12e   : > { %5197 = vmatpush1.msk.msra.mxu0 %vm723_vm6, %v666_v0  ;;  %5375 = vmatprep.mubr.msk.f32.mxu1 %vm7745_vm3, %v5540_v28 }
 0x12f   : > { %5201 = vmatprep.subr.msk.mxu0 %vm723_vm6, %v675_v1  ;;  %5378 = vmatprep.subr.mxu1 %v5540_v28 }
 0x130   : > { %1103 = vmatprep.mubr.f32.mxu0 %v5540_v28  ;;  %5376 = vmatmul.mubr.msk.f32.vlgmr.msra.gmra.mxu1 %vm720_vm7, %v5768_v36  ;;  %v680_v3 = vpop.permute.xlu0 %679  ;;  %v1498_v4 = vpop.permute.xlu1 %1497 }
 0x131   : > { %5379 = vmatpush3.msk.msra.mxu1 %vm723_vm6, %v674_v2  ;;  %5198 = vmatmul.mubr.msk.f32.vlgmr.msra.gmra.mxu0 %vm720_vm7, %v5768_v36  ;;  %v684_v8 = vsel %vm683_vm11, %v680_v3, %v682_v63  ;;  %v685_v12 = vsel %vm683_vm11, %v5774_v45, %v680_v3 }
 0x132   : > { %5202 = vmatpush1.msk.msra.mxu0 %vm723_vm6, %v676_v5  ;;  %5380 = vmatprep.mubr.msk.f32.mxu1 %vm7745_vm3, %v5540_v28 }
 0x133   : > { %5206 = vmatprep.subr.msk.mxu0 %vm723_vm6, %v5728_v32  ;;  %5383 = vmatprep.subr.mxu1 %v5540_v28  ;;  %v5937_v32 = vld [vmem:[%s7715_s6] sm:$0xff] }
 0x134   : > { %1260 = vmatprep.mubr.f32.mxu0 %v5540_v28  ;;  %5381 = vmatmul.mubr.msk.f32.vlgmr.msra.gmra.mxu1 %vm720_vm7, %v5772_v38  ;;  %v690_v6 = vpop.permute.xlu0 %689  ;;  %v692_v7 = vpop.permute.xlu1 %691 }
 0x135   : > { %5384 = vmatpush3.msk.msra.mxu1 %vm723_vm6, %v5697_v27  ;;  %5203 = vmatmul.mubr.msk.f32.vlgmr.msra.gmra.mxu0 %vm720_vm7, %v5772_v38  ;;  %v694_v13 = vsel %vm693_vm12, %v690_v6, %v692_v7  ;;  %v696_v14 = vsel %vm693_vm12, %v692_v7, %v5779_v48  ;;  %v695_v18 = vsel %vm693_vm12, %v5779_v48, %v690_v6 }
 0x136   : > { %5207 = vmatpush1.msk.msra.mxu0 %vm723_vm6, %v5693_v26  ;;  %5385 = vmatprep.mubr.msk.f32.mxu1 %vm7745_vm3, %v5540_v28 }
 0x137   : > { %5211 = vmatprep.subr.msk.mxu0 %vm723_vm6, %v684_v8  ;;  %5388 = vmatprep.subr.mxu1 %v5540_v28 }
 0x138   : > { %1417 = vmatprep.mubr.f32.mxu0 %v5540_v28  ;;  %5386 = vmatmul.mubr.msk.f32.vlgmr.msra.gmra.mxu1 %vm720_vm7, %v5770_v37  ;;  %v700_v10 = vpop.permute.xlu0 %699  ;;  %v1655_v11 = vpop.permute.xlu1 %1654 }
 0x139   : > { %5389 = vmatpush3.msk.msra.mxu1 %vm723_vm6, %v686_v9  ;;  %5208 = vmatmul.mubr.msk.f32.vlgmr.msra.gmra.mxu0 %vm720_vm7, %v5770_v37  ;;  %v705_v23 = vsel %vm703_vm13, %v5813_v61, %v700_v10 }
 0x13a   : > { %5212 = vmatpush1.msk.msra.mxu0 %vm723_vm6, %v685_v12  ;;  %5390 = vmatprep.mubr.msk.f32.mxu1 %vm7745_vm3, %v5540_v28 }
 0x13b   : > { %5216 = vmatprep.subr.msk.mxu0 %vm723_vm6, %v694_v13  ;;  %5393 = vmatprep.subr.mxu1 %v5540_v28 }
 0x13c   : > { %1574 = vmatprep.mubr.f32.mxu0 %v5540_v28  ;;  %5391 = vmatmul.mubr.msk.f32.vlgmr.msra.gmra.mxu1 %vm720_vm7, %v1498_v4  ;;  %v702_v15 = vpop.permute.xlu1 %701  ;;  %v710_v19 = vpop.permute.xlu0 %709 }
 0x13d   : > { %5394 = vmatpush3.msk.msra.mxu1 %vm723_vm6, %v696_v14  ;;  %5213 = vmatmul.mubr.msk.f32.vlgmr.msra.gmra.mxu0 %vm720_vm7, %v1498_v4  ;;  %v704_v20 = vsel %vm703_vm13, %v700_v10, %v702_v15  ;;  %v706_v21 = vsel %vm703_vm13, %v702_v15, %v5813_v61 }
 0x13e   : > { %5217 = vmatpush1.msk.msra.mxu0 %vm723_vm6, %v695_v18  ;;  %5395 = vmatprep.mubr.msk.f32.mxu1 %vm7745_vm3, %v5540_v28 }
 0x13f   : > { %5221 = vmatprep.subr.msk.mxu0 %vm723_vm6, %v704_v20  ;;  %5398 = vmatprep.subr.mxu1 %v5540_v28 }
 0x140   : > { %1731 = vmatprep.mubr.f32.mxu0 %v5540_v28  ;;  %5396 = vmatmul.mubr.msk.f32.vlgmr.msra.gmra.mxu1 %vm720_vm7, %v1655_v11  ;;  %v1812_v22 = vpop.permute.xlu1 %1811  ;;  %v708_v24 = vpop.permute.xlu0 %707 }
 0x141   : > { %5399 = vmatpush3.msk.msra.mxu1 %vm723_vm6, %v706_v21  ;;  %5218 = vmatmul.mubr.msk.f32.vlgmr.msra.gmra.mxu0 %vm720_vm7, %v1655_v11  ;;  %v715_v29 = vsel %vm7750_vm14, %v708_v24, %v710_v19 }
 0x142   : > { %5222 = vmatpush1.msk.msra.mxu0 %vm723_vm6, %v705_v23  ;;  %5400 = vmatprep.mubr.msk.f32.mxu1 %vm7745_vm3, %v5540_v28 }
 0x143   : > { %1888 = vmatprep.mubr.f32.mxu0 %v5540_v28  ;;  %5403 = vmatprep.subr.mxu1 %v5540_v28 }
 0x144   : > { %5401 = vmatmul.mubr.msk.f32.vlgmr.msra.gmra.mxu1 %vm720_vm7, %v1812_v22  ;;  %v712_v25 = vpop.permute.xlu1 %711 }
 0x145   : > { %5223 = vmatmul.mubr.msk.f32.vlgmr.msra.gmra.mxu0 %vm720_vm7, %v1812_v22  ;;  %v716_v26 = vsel %vm7750_vm14, %v712_v25, %v708_v24  ;;  %v714_v27 = vsel %vm7750_vm14, %v710_v19, %v712_v25  ;;  %5405 = vmatprep.mubr.msk.f32.mxu1 %vm7745_vm3, %v5540_v28 }
 0x146   : > { %5226 = vmatprep.subr.msk.mxu0 %vm723_vm6, %v714_v27  ;;  %5404 = vmatpush3.msk.msra.mxu1 %vm723_vm6, %v716_v26 }
 0x147   : > { %5227 = vmatpush1.msk.msra.mxu0 %vm723_vm6, %v715_v29  ;;  %2045 = vmatprep.mubr.f32.mxu0 %v5540_v28 }
 0x148   : > { %v1969_v31 = vpop.permute.xlu1 %1968 }
 0x149   : > { %5228 = vmatmul.mubr.msk.f32.vlgmr.msra.gmra.mxu0 %vm720_vm7, %v1969_v31  ;;  %5406 = vmatmul.mubr.msk.f32.vlgmr.msra.gmra.mxu1 %vm720_vm7, %v1969_v31 }
 0x14a   : > { %2227 = vmatprep.mubr.f32.mxu0 %v5540_v28  ;;  %5410 = vmatprep.mubr.msk.f32.mxu1 %vm2156_vm15, %v5937_v32 }
 0x14d   : > { %v2128_v27 = vpop.permute.xlu0 %2127 }
 0x1e7   : > { %v870_v34 = vpop.f32.mrf.mxu1 }
 0x1e8   : > { %v799_v35 = vpop.f32.mrf.mxu0 }
 0x1e9   : > { %v5367_v36 = vpop.f32.mrf.mxu1 }
 0x1ea   : > { %v801_v37 = vpop.f32.mrf.mxu0 }
 0x1eb   : > { %v1022_v38 = vpop.f32.mrf.mxu1 }
 0x1ec   : > { %v951_v39 = vpop.f32.mrf.mxu0  ;;  %v1023_v55 = vadd.f32 %v1022_v38, %v870_v34 }
 0x1ed   : > { %v5372_v40 = vpop.f32.mrf.mxu1  ;;  %v952_v56 = vadd.f32 %v951_v39, %v799_v35 }
 0x1ee   : > { %v953_v41 = vpop.f32.mrf.mxu0 }
 0x1ef   : > { %v954_v59 = vadd.f32 %v953_v41, %v801_v37 }
 0x1f0   : > { %v1176_v42 = vpop.f32.mrf.mxu1 }
 0x1f1   : > { %v1105_v43 = vpop.f32.mrf.mxu0  ;;  %v1182_v60 = vadd.f32 %v1176_v42, %v1023_v55 }
 0x1f2   : > { %v5377_v44 = vpop.f32.mrf.mxu1  ;;  %v1180_v61 = vadd.f32 %v1105_v43, %v952_v56 }
 0x1f3   : > { %v1107_v45 = vpop.f32.mrf.mxu0  ;;  %v2145_v44 = vld [vmem:[%s7715_s6 + $0x8] sm:$0xff] }
 0x1f4   : > { %v1333_v46 = vpop.f32.mrf.mxu1  ;;  %v1181_v0 = vadd.f32 %v1107_v45, %v954_v59 }
 0x1f5   : > { %v1262_v48 = vpop.f32.mrf.mxu0  ;;  %v1339_v1 = vadd.f32 %v1333_v46, %v1182_v60 }
 0x1f6   : > { %v5382_v49 = vpop.f32.mrf.mxu1  ;;  %v1337_v2 = vadd.f32 %v1262_v48, %v1180_v61  ;;  %v2154_v48 = vpop.permute.xlu1 %2153 }
 0x1f7   : > { %v1264_v50 = vpop.f32.mrf.mxu0 }
 0x1f8   : > { %v1490_v51 = vpop.f32.mrf.mxu1  ;;  %v1338_v5 = vadd.f32 %v1264_v50, %v1181_v0 }
 0x1f9   : > { %v1419_v52 = vpop.f32.mrf.mxu0  ;;  %v1496_v6 = vadd.f32 %v1490_v51, %v1339_v1 }
 0x1fa   : > { %v5387_v53 = vpop.f32.mrf.mxu1  ;;  %v1494_v7 = vadd.f32 %v1419_v52, %v1337_v2  ;;  %v2149_v52 = vpop.permute.xlu0 %2148 }
 0x1fb   : > { %v1421_v54 = vpop.f32.mrf.mxu0 }
 0x1fc   : > { %v1647_v57 = vpop.f32.mrf.mxu1  ;;  %v1495_v10 = vadd.f32 %v1421_v54, %v1338_v5  ;;  %v2326_v5 = vld [vmem:[%s7718_s9 + $0x8] sm:$0xff] }
 0x1fd   : > { %v1576_v58 = vpop.f32.mrf.mxu0  ;;  %v1653_v11 = vadd.f32 %v1647_v57, %v1496_v6  ;;  %v5242_v6 = vld [vmem:[%s7716_s7 + $0x18] sm:$0xff] }
 0x1fe   : > { %v5392_v62 = vpop.f32.mrf.mxu1  ;;  %v1651_v12 = vadd.f32 %v1576_v58, %v1494_v7  ;;  %v2647_v7 = vld [vmem:[%s7720_s11] sm:$0xff] }
 0x1ff   : > { %v1578_v63 = vpop.f32.mrf.mxu0 }
 0x200   : > { %v1804_v3 = vpop.f32.mrf.mxu1  ;;  %v1652_v15 = vadd.f32 %v1578_v63, %v1495_v10 }
 0x201   : > { %v1733_v4 = vpop.f32.mrf.mxu0  ;;  %v1810_v18 = vadd.f32 %v1804_v3, %v1653_v11  ;;  %v2322_v3 = vld [vmem:[%s7717_s8 + $0x8] sm:$0xff] }
 0x202   : > { %v5397_v8 = vpop.f32.mrf.mxu1  ;;  %v1808_v19 = vadd.f32 %v1733_v4, %v1651_v12  ;;  %v2325_v4 = vld [vmem:[%s7718_s9] sm:$0xff] }
 0x203   : > { %v1735_v9 = vpop.f32.mrf.mxu0  ;;  %v5241_v8 = vld [vmem:[%s7716_s7 + $0x10] sm:$0xff] }
 0x204   : > { %v1961_v13 = vpop.f32.mrf.mxu1  ;;  %v1809_v22 = vadd.f32 %v1735_v9, %v1652_v15 }
 0x205   : > { %v1890_v14 = vpop.f32.mrf.mxu0  ;;  %v1967_v23 = vadd.f32 %v1961_v13, %v1810_v18 }
 0x206   : > { %v5402_v20 = vpop.f32.mrf.mxu1  ;;  %v1965_v24 = vadd.f32 %v1890_v14, %v1808_v19 }
 0x207   : > { %v1892_v21 = vpop.f32.mrf.mxu0 }
 0x208   : > { %v1966_v29 = vadd.f32 %v1892_v21, %v1809_v22 }
 0x209   : > { %v2047_v25 = vpop.f32.mrf.mxu0  ;;  %v2118_v26 = vpop.f32.mrf.mxu1 }
 0x20a   : > { %v2122_v31 = vadd.f32 %v2047_v25, %v1965_v24  ;;  %v2124_v33 = vadd.f32 %v2118_v26, %v1967_v23 }
 0x20b   : > { %v2049_v34 = vpop.f32.mrf.mxu0  ;;  %v5407_v35 = vpop.f32.mrf.mxu1 }
 0x20c   : > { %v2130_v36 = vadd.f32 %v2128_v27, %v2122_v31  ;;  %v2132_v37 = vadd.f32 %v2128_v27, %v2124_v33  ;;  %v2123_v38 = vadd.f32 %v2049_v34, %v1966_v29 }
 0x20e   : > { %v2131_v39 = vadd.f32 %v2128_v27, %v2123_v38  ;;  %vm2135_vm0 = vcmp.ge.f32.partialorder %v2132_v37, 0.0  ;;  %v2138_v40 = vmul.f32 0.1, %v2132_v37  ;;  %v2136_v41 = vmul.f32 0.1, %v2130_v36 }
 0x20f   : > { %vm2133_vm7 = vcmp.ge.f32.partialorder %v2130_v36, 0.0 }
 0x210   : > { %v5944_v42 = vsel %vm2135_vm0, %v2132_v37, %v2138_v40  ;;  %vm2134_vm6 = vcmp.ge.f32.partialorder %v2131_v39, 0.0  ;;  %v2137_v43 = vmul.f32 0.1, %v2131_v39  ;;  %v5955_v46 = vsel %vm2133_vm7, %v2130_v36, %v2136_v41 }
 0x211   : > { %5408 = vmatprep.subr.mxu1 %v5944_v42  ;;  %vm2481_vm0 = vcmask 130048  }
 0x212   : > { %5409 = vmatpush3.msra.mxu1 %v5944_v42  ;;  %v5951_v45 = vsel %vm2134_vm6, %v2131_v39, %v2137_v43 }
 0x213   : > { %2193 = vmatprep.subr.mxu0 %v5951_v45  ;;  %5411 = vmatmul.mubr.msk.f32.vlgmr.msra.gmra.mxu1 %vm2156_vm15, %v2145_v44 }
 0x214   : > { %2194 = vmatpush1.msra.mxu0 %v5955_v46  ;;  %2565 = vmatprep.subr.mxu1 %v5540_v28 }
 0x215   : > { %5231 = vmatmul.mubr.msk.f32.vlgmr.msra.gmra.mxu0 %vm2156_vm15, %v5937_v32  ;;  %5237 = vmatprep.mubr.msk.f32.mxu1 %vm2481_vm0, %v2322_v3 }
 0x216   : > { %2233 = vmatprep.mubr.f32.mxu0 %v5540_v28 }
 0x219   : > { %5232 = vmatmul.mubr.msk.f32.gmra.mxu0 %vm2156_vm15, %v2145_v44 }
 0x21a   : > { %5235 = vmatprep.mubr.msk.f32.mxu0 %vm2481_vm0, %v2322_v3 }
 0x2d3   : > { %v5412_v49 = vpop.f32.mrf.mxu1 }
 0x2d4   : > { %v5963_v50 = vadd.f32 %v5412_v49, %v2154_v48 }
 0x2d5   : > { %v2306_v32 = vpop.f32.mrf.mxu1  ;;  %v2229_v55 = vpop.f32.mrf.mxu0 }
 0x2d6   : > { %v5968_v51 = vsel %vm626_vm2, %v2154_v48, %v5963_v50  ;;  %v5978_v53 = vadd.f32 %v2306_v32, %v2149_v52  ;;  %v5993_v56 = vadd.f32 %v2229_v55, %v2149_v52 }
 0x2d7   : > { %2391 = vrot.lane.b32.xlu1 %v5968_v51, %s7743_s24  ;;  %2445 = vrot.lane.b32.xlu0 %v5968_v51, %s7739_s26  ;;  %v2231_v57 = vpop.f32.mrf.mxu0 }
 0x2d8   : > { %v5987_v54 = vsel %vm626_vm2, %v2149_v52, %v5978_v53  ;;  %v6002_v58 = vsel %vm624_vm1, %v2149_v52, %v5993_v56  ;;  %v6004_v59 = vadd.f32 %v2231_v57, %v2149_v52 }
 0x2d9   : > { %v2235_v61 = vpop.f32.mrf.mxu0 }
 0x2da   : > { %v6013_v60 = vsel %vm625_vm4, %v2149_v52, %v6004_v59  ;;  %v6019_v62 = vadd.f32 %v2235_v61, %v2154_v48 }
 0x2db   : > { %2373 = vrot.lane.b32.xlu1 %v5968_v51, %s7737_s2  ;;  %2427 = vrot.lane.b32.xlu0 %v5968_v51, %s7735_s25  ;;  %v2237_v0 = vpop.f32.mrf.mxu0 }
 0x2dc   : > { %v6028_v63 = vsel %vm624_vm1, %v2154_v48, %v6019_v62  ;;  %v6050_v1 = vadd.f32 %v2237_v0, %v2154_v48 }
 0x2de   : > { %v6059_v2 = vsel %vm625_vm4, %v2154_v48, %v6050_v1 }
 0x2df   : > { %2355 = vrot.lane.b32.xlu1 %v5968_v51, %s7733_s21  ;;  %2409 = vrot.lane.b32.xlu0 %v5968_v51, %s7766_s30 }
 0x2e3   : > { %2443 = vrot.lane.b32.xlu1 %v5987_v54, %s7739_s26  ;;  %2389 = vrot.lane.b32.xlu0 %v5987_v54, %s7743_s24 }
 0x2e7   : > { %2425 = vrot.lane.b32.xlu1 %v5987_v54, %s7735_s25  ;;  %2371 = vrot.lane.b32.xlu0 %v5987_v54, %s7737_s2 }
 0x2eb   : > { %2407 = vrot.lane.b32.xlu1 %v5987_v54, %s7766_s30  ;;  %2435 = vrot.lane.b32.xlu0 %v6002_v58, %s7739_s26 }
 0x2ef   : > { %2385 = vrot.lane.b32.xlu1 %v6013_v60, %s7743_s24  ;;  %2417 = vrot.lane.b32.xlu0 %v6002_v58, %s7735_s25 }
 0x2f3   : > { %2367 = vrot.lane.b32.xlu1 %v6013_v60, %s7737_s2  ;;  %2399 = vrot.lane.b32.xlu0 %v6002_v58, %s7766_s30 }
 0x2f7   : > { %2381 = vrot.lane.b32.xlu0 %v6002_v58, %s7743_s24  ;;  %2437 = vrot.lane.b32.xlu1 %v6028_v63, %s7739_s26 }
 0x2fb   : > { %2363 = vrot.lane.b32.xlu0 %v6002_v58, %s7737_s2  ;;  %2419 = vrot.lane.b32.xlu1 %v6028_v63, %s7735_s25 }
 0x2ff   : > { %2345 = vrot.lane.b32.xlu0 %v6002_v58, %s7733_s21  ;;  %2401 = vrot.lane.b32.xlu1 %v6028_v63, %s7766_s30 }
 0x303   : > { %2439 = vrot.lane.b32.xlu0 %v6013_v60, %s7739_s26  ;;  %2383 = vrot.lane.b32.xlu1 %v6028_v63, %s7743_s24 }
 0x307   : > { %2421 = vrot.lane.b32.xlu0 %v6013_v60, %s7735_s25  ;;  %2365 = vrot.lane.b32.xlu1 %v6028_v63, %s7737_s2 }
 0x30b   : > { %2403 = vrot.lane.b32.xlu0 %v6013_v60, %s7766_s30  ;;  %2347 = vrot.lane.b32.xlu1 %v6028_v63, %s7733_s21 }
 0x30f   : > { %2353 = vrot.lane.b32.xlu0 %v5987_v54, %s7733_s21  ;;  %2441 = vrot.lane.b32.xlu1 %v6059_v2, %s7739_s26  ;;  %s7770_s26 = smov 17  }
 0x313   : > { %2327 = vrot.lane.b32.xlu0 %v6002_v58, %s7767_s22  ;;  %2423 = vrot.lane.b32.xlu1 %v6059_v2, %s7735_s25  ;;  %s7769_s25 = smov 110  }
 0x317   : > { %2335 = vrot.lane.b32.xlu0 %v5987_v54, %s7767_s22  ;;  %2405 = vrot.lane.b32.xlu1 %v6059_v2, %s7766_s30 }
 0x31b   : > { %2463 = vrot.lane.b32.xlu0 %v5968_v51, %s7741_s19  ;;  %2349 = vrot.lane.b32.xlu1 %v6013_v60, %s7733_s21 }
 0x31f   : > { %2387 = vrot.lane.b32.xlu0 %v6059_v2, %s7743_s24  ;;  %2329 = vrot.lane.b32.xlu1 %v6028_v63, %s7767_s22  ;;  %s7768_s24 = smov 1  }
 0x323   : > { %2369 = vrot.lane.b32.xlu0 %v6059_v2, %s7737_s2  ;;  %2337 = vrot.lane.b32.xlu1 %v5968_v51, %s7767_s22  ;;  %s7785_s2 = smul.u32 12, %s7789_s28 }
 0x325   : > { %s575_s4 = scalar_lea.vmem %s7786_s3, %s7785_s2 }
 0x327   : > { %2351 = vrot.lane.b32.xlu0 %v6059_v2, %s7733_s21  ;;  %2331 = vrot.lane.b32.xlu1 %v6013_v60, %s7767_s22  ;;  %s7784_s21 = sld [smem:[#allocation3_spill]] }
 0x32b   : > { %2333 = vrot.lane.b32.xlu0 %v6059_v2, %s7767_s22  ;;  %2455 = vrot.lane.b32.xlu1 %v6028_v63, %s7741_s19 }
 0x32f   : > { %2457 = vrot.lane.b32.xlu0 %v6013_v60, %s7741_s19  ;;  %2459 = vrot.lane.b32.xlu1 %v6059_v2, %s7741_s19 }
 0x333   : > { %2453 = vrot.lane.b32.xlu0 %v6002_v58, %s7741_s19  ;;  %2461 = vrot.lane.b32.xlu1 %v5987_v54, %s7741_s19  ;;  %s7771_s19 = smov 111  }
 0x337   : > { %2473 = vperm.xlu0 %5506, %v2325_v4   ;;  %2478 = vperm.xlu1 %5507, %v2326_v5  }
 0x33b   : > { %2822 = vperm.xlu0 %5506, %v5242_v6   ;;  %2650 = vperm.xlu1 %5507, %v2647_v7  }
 0x33f   : > { %2817 = vperm.xlu1 %5507, %v5241_v8  }
 0x349   : > { %v6121_v9 = vpop.permute.xlu1 %2391  ;;  %v2446_v10 = vpop.permute.xlu0 %2445 }
 0x34d   : > { %v6123_v11 = vpop.permute.xlu1 %2373  ;;  %v2428_v12 = vpop.permute.xlu0 %2427 }
 0x351   : > { %v6125_v13 = vpop.permute.xlu1 %2355  ;;  %v6127_v14 = vpop.permute.xlu0 %2409 }
 0x355   : > { %v2444_v15 = vpop.permute.xlu1 %2443  ;;  %v6129_v18 = vpop.permute.xlu0 %2389 }
 0x359   : > { %v2426_v19 = vpop.permute.xlu1 %2425  ;;  %v6131_v20 = vpop.permute.xlu0 %2371 }
 0x35d   : > { %v6133_v21 = vpop.permute.xlu1 %2407  ;;  %v2436_v22 = vpop.permute.xlu0 %2435 }
 0x35e   : > { %v2451_v33 = vsel %vm703_vm13, %v2444_v15, %v2436_v22 }
 0x361   : > { %v6135_v23 = vpop.permute.xlu1 %2385  ;;  %v2418_v24 = vpop.permute.xlu0 %2417 }
 0x362   : > { %v2433_v37 = vsel %vm693_vm12, %v2426_v19, %v2418_v24 }
 0x365   : > { %v6137_v25 = vpop.permute.xlu1 %2367  ;;  %v6139_v26 = vpop.permute.xlu0 %2399 }
 0x366   : > { %v2415_v41 = vsel %vm683_vm11, %v6133_v21, %v6139_v26 }
 0x369   : > { %v6141_v27 = vpop.permute.xlu0 %2381  ;;  %v2438_v29 = vpop.permute.xlu1 %2437 }
 0x36a   : > { %v2452_v31 = vsel %vm703_vm13, %v2446_v10, %v2438_v29 }
 0x36b   : > { %2566 = vmatpush1.msra.mxu1 %v2452_v31 }
 0x36c   : > { %2567 = vmatprep.subr.mxu1 %v5540_v28 }
 0x36d   : > { %v6148_v34 = vpop.permute.xlu0 %2363  ;;  %2568 = vmatpush1.msra.mxu1 %v2451_v33  ;;  %v2420_v35 = vpop.permute.xlu1 %2419 }
 0x36e   : > { %2569 = vmatprep.subr.mxu1 %v5540_v28  ;;  %v2434_v36 = vsel %vm693_vm12, %v2428_v12, %v2420_v35 }
 0x36f   : > { %2570 = vmatpush1.msra.mxu1 %v2434_v36 }
 0x370   : > { %2571 = vmatprep.subr.mxu1 %v5540_v28 }
 0x371   : > { %v6156_v38 = vpop.permute.xlu0 %2345  ;;  %2572 = vmatpush1.msra.mxu1 %v2433_v37  ;;  %v2402_v39 = vpop.permute.xlu1 %2401 }
 0x372   : > { %2573 = vmatprep.subr.mxu1 %v5540_v28  ;;  %v2416_v40 = vsel %vm683_vm11, %v6127_v14, %v2402_v39 }
 0x373   : > { %2574 = vmatpush1.msra.mxu1 %v2416_v40 }
 0x374   : > { %2575 = vmatprep.subr.mxu1 %v5540_v28 }
 0x375   : > { %v2440_v43 = vpop.permute.xlu0 %2439  ;;  %2576 = vmatpush1.msra.mxu1 %v2415_v41  ;;  %v2384_v44 = vpop.permute.xlu1 %2383 }
 0x376   : > { %2577 = vmatprep.subr.mxu1 %v5540_v28  ;;  %v2449_v4 = vsel %vm703_vm13, %v2436_v22, %v2440_v43 }
 0x377   : > { %2578 = vmatpush1.msra.mxu1 %v5968_v51 }
 0x378   : > { %2579 = vmatprep.subr.mxu1 %v5540_v28 }
 0x379   : > { %v2422_v48 = vpop.permute.xlu0 %2421  ;;  %2580 = vmatpush1.msra.mxu1 %v5987_v54  ;;  %v6171_v49 = vpop.permute.xlu1 %2365  ;;  %v2447_v54 = vsel %vm703_vm13, %v2440_v43, %v2444_v15 }
 0x37a   : > { %2581 = vmatprep.subr.mxu1 %v5540_v28  ;;  %v2429_v7 = vsel %vm693_vm12, %v2422_v48, %v2426_v19  ;;  %v2431_v15 = vsel %vm693_vm12, %v2418_v24, %v2422_v48  ;;  %v2380_v37 = vsel %vm663_vm9, %v6123_v11, %v6171_v49 }
 0x37d   : > { %v2404_v32 = vpop.permute.xlu0 %2403  ;;  %v6174_v52 = vpop.permute.xlu1 %2347 }
 0x37e   : > { %v2411_v19 = vsel %vm683_vm11, %v2404_v32, %v6133_v21  ;;  %v2413_v24 = vsel %vm683_vm11, %v6139_v26, %v2404_v32  ;;  %v2362_v43 = vsel %vm653_vm5, %v6125_v13, %v6174_v52 }
 0x381   : > { %v6176_v55 = vpop.permute.xlu0 %2353  ;;  %v2442_v57 = vpop.permute.xlu1 %2441 }
 0x382   : > { %v2448_v61 = vsel %vm703_vm13, %v2442_v57, %v2446_v10  ;;  %v2450_v51 = vsel %vm703_vm13, %v2438_v29, %v2442_v57 }
 0x383   : > { %2488 = vmatprep.subr.mxu0 %v2448_v61 }
 0x384   : > { %2489 = vmatpush1.msra.mxu0 %v2450_v51 }
 0x385   : > { %v6184_v0 = vpop.permute.xlu0 %2327  ;;  %2490 = vmatprep.subr.mxu0 %v2447_v54  ;;  %v2424_v3 = vpop.permute.xlu1 %2423 }
 0x386   : > { %2491 = vmatpush1.msra.mxu0 %v2449_v4  ;;  %v2430_v5 = vsel %vm693_vm12, %v2424_v3, %v2428_v12  ;;  %v2432_v6 = vsel %vm693_vm12, %v2420_v35, %v2424_v3 }
 0x387   : > { %2492 = vmatprep.subr.mxu0 %v2430_v5 }
 0x388   : > { %2493 = vmatpush1.msra.mxu0 %v2432_v6  ;;  %v2321_v6 = vld [vmem:[%s7717_s8] sm:$0xff] }
 0x389   : > { %v6194_v8 = vpop.permute.xlu0 %2335  ;;  %2494 = vmatprep.subr.mxu0 %v2429_v7  ;;  %v2406_v10 = vpop.permute.xlu1 %2405 }
 0x38a   : > { %2495 = vmatpush1.msra.mxu0 %v2431_v15  ;;  %v2412_v12 = vsel %vm683_vm11, %v2406_v10, %v6127_v14  ;;  %v2414_v22 = vsel %vm683_vm11, %v2402_v39, %v2406_v10  ;;  %v2343_v51 = vsel %vm643_vm8, %v6194_v8, %v6184_v0  ;;  %v2324_v15 = vld [vmem:[%s7717_s8 + $0x18] sm:$0xff] }
 0x38b   : > { %2496 = vmatprep.subr.mxu0 %v2412_v12  ;;  %v2323_v12 = vld [vmem:[%s7717_s8 + $0x10] sm:$0xff] }
 0x38c   : > { %2497 = vmatpush1.msra.mxu0 %v2414_v22 }
 0x38d   : > { %v6206_v29 = vpop.permute.xlu0 %2463  ;;  %2498 = vmatprep.subr.mxu0 %v2411_v19  ;;  %v2350_v31 = vpop.permute.xlu1 %2349 }
 0x38e   : > { %2499 = vmatpush1.msra.mxu0 %v2413_v24 }
 0x38f   : > { %2500 = vmatprep.subr.mxu0 %v6059_v2  ;;  %v2398_v2 = vsel %vm673_vm10, %v6121_v9, %v2384_v44 }
 0x390   : > { %2501 = vmatpush1.msra.mxu0 %v6028_v63 }
 0x391   : > { %v2388_v14 = vpop.permute.xlu0 %2387  ;;  %2502 = vmatprep.subr.mxu0 %v6013_v60  ;;  %v2330_v33 = vpop.permute.xlu1 %2329  ;;  %v2393_v60 = vsel %vm673_vm10, %v6135_v23, %v6129_v18 }
 0x392   : > { %2503 = vmatpush1.msra.mxu0 %v6002_v58  ;;  %v2396_v21 = vsel %vm673_vm10, %v2384_v44, %v2388_v14  ;;  %v2394_v35 = vsel %vm673_vm10, %v2388_v14, %v6121_v9  ;;  %v2395_v58 = vsel %vm673_vm10, %v6141_v27, %v6135_v23  ;;  %v2397_v9 = vsel %vm673_vm10, %v6129_v18, %v6141_v27 }
 0x393   : > { %2504 = vmatprep.subr.mxu0 %v2396_v21  ;;  %2582 = vmatpush1.msra.mxu1 %v2394_v35  ;;  %v2377_v18 = vsel %vm663_vm9, %v6148_v34, %v6137_v25  ;;  %v2375_v27 = vsel %vm663_vm9, %v6137_v25, %v6131_v20 }
 0x394   : > { %2505 = vmatpush1.msra.mxu0 %v2398_v2  ;;  %2583 = vmatprep.subr.mxu1 %v5540_v28 }
 0x395   : > { %v2370_v63 = vpop.permute.xlu0 %2369  ;;  %2506 = vmatprep.subr.mxu0 %v2395_v58  ;;  %2584 = vmatpush1.msra.mxu1 %v2393_v60  ;;  %v2338_v26 = vpop.permute.xlu1 %2337 }
 0x396   : > { %2507 = vmatpush1.msra.mxu0 %v2397_v9  ;;  %2585 = vmatprep.subr.mxu1 %v5540_v28  ;;  %v2378_v36 = vsel %vm663_vm9, %v6171_v49, %v2370_v63  ;;  %v2376_v23 = vsel %vm663_vm9, %v2370_v63, %v6123_v11  ;;  %v2379_v11 = vsel %vm663_vm9, %v6131_v20, %v6148_v34 }
 0x397   : > { %2508 = vmatprep.subr.mxu0 %v2378_v36  ;;  %2586 = vmatpush1.msra.mxu1 %v2376_v23  ;;  %v2359_v20 = vsel %vm653_vm5, %v6156_v38, %v2350_v31  ;;  %v2357_v34 = vsel %vm653_vm5, %v2350_v31, %v6176_v55 }
 0x398   : > { %2509 = vmatpush1.msra.mxu0 %v2380_v37  ;;  %2587 = vmatprep.subr.mxu1 %v5540_v28 }
 0x399   : > { %v2352_v39 = vpop.permute.xlu0 %2351  ;;  %2510 = vmatprep.subr.mxu0 %v2377_v18  ;;  %2588 = vmatpush1.msra.mxu1 %v2375_v27  ;;  %v2332_v40 = vpop.permute.xlu1 %2331  ;;  %v2646_v18 = vld [vmem:[%s7719_s10] sm:$0xff] }
 0x39a   : > { %2511 = vmatpush1.msra.mxu0 %v2379_v11  ;;  %2589 = vmatprep.subr.mxu1 %v5540_v28  ;;  %v2360_v41 = vsel %vm653_vm5, %v6174_v52, %v2352_v39  ;;  %v2358_v25 = vsel %vm653_vm5, %v2352_v39, %v6125_v13  ;;  %v2361_v13 = vsel %vm653_vm5, %v6176_v55, %v6156_v38 }
 0x39b   : > { %2512 = vmatprep.subr.mxu0 %v2360_v41  ;;  %2590 = vmatpush1.msra.mxu1 %v2358_v25  ;;  %v2344_v52 = vsel %vm643_vm8, %v2338_v26, %v2330_v33  ;;  %v2341_v38 = vsel %vm643_vm8, %v6184_v0, %v2332_v40  ;;  %v2339_v55 = vsel %vm643_vm8, %v2332_v40, %v6194_v8 }
 0x39c   : > { %2513 = vmatpush1.msra.mxu0 %v2362_v43  ;;  %2591 = vmatprep.subr.mxu1 %v5540_v28 }
 0x39d   : > { %v2334_v44 = vpop.permute.xlu0 %2333  ;;  %2514 = vmatprep.subr.mxu0 %v2359_v20  ;;  %2592 = vmatpush1.msra.mxu1 %v2357_v34  ;;  %v2456_v48 = vpop.permute.xlu1 %2455 }
 0x39e   : > { %2515 = vmatpush1.msra.mxu0 %v2361_v13  ;;  %2593 = vmatprep.subr.mxu1 %v5540_v28  ;;  %v2342_v49 = vsel %vm643_vm8, %v2330_v33, %v2334_v44  ;;  %v2340_v32 = vsel %vm643_vm8, %v2334_v44, %v2338_v26  ;;  %v2470_v3 = vsel %vm7750_vm14, %v6206_v29, %v2456_v48  ;;  %v5244_v13 = vld [vmem:[%s7715_s6 + $0x18] sm:$0xff] }
 0x39f   : > { %2516 = vmatprep.subr.mxu0 %v2342_v49  ;;  %2594 = vmatpush1.msra.mxu1 %v2340_v32 }
 0x3a0   : > { %2517 = vmatpush1.msra.mxu0 %v2344_v52  ;;  %2595 = vmatprep.subr.mxu1 %v5540_v28 }
 0x3a1   : > { %v2458_v57 = vpop.permute.xlu0 %2457  ;;  %2518 = vmatprep.subr.mxu0 %v2341_v38  ;;  %2596 = vmatpush1.msra.mxu1 %v2339_v55  ;;  %v2460_v61 = vpop.permute.xlu1 %2459 }
 0x3a2   : > { %2519 = vmatpush1.msra.mxu0 %v2343_v51  ;;  %2625 = vmatprep.subr.mxu1 %v5540_v28  ;;  %v2466_v54 = vsel %vm7750_vm14, %v2460_v61, %v6206_v29  ;;  %v2468_v4 = vsel %vm7750_vm14, %v2456_v48, %v2460_v61 }
 0x3a3   : > { %2548 = vmatprep.subr.mxu0 %v2466_v54  ;;  %2626 = vmatpush2.msra.mxu1 %v2470_v3 }
 0x3a4   : > { %2549 = vmatpush2.msra.mxu0 %v2468_v4  ;;  %2627 = vmatprep.subr.mxu1 %v5540_v28 }
 0x3a5   : > { %v2454_v0 = vpop.permute.xlu0 %2453  ;;  %v2462_v5 = vpop.permute.xlu1 %2461 }
 0x3a6   : > { %v2465_v7 = vsel %vm7750_vm14, %v2458_v57, %v2462_v5  ;;  %v2469_v8 = vsel %vm7750_vm14, %v2462_v5, %v2454_v0  ;;  %v2467_v10 = vsel %vm7750_vm14, %v2454_v0, %v2458_v57 }
 0x3a7   : > { %2550 = vmatprep.subr.mxu0 %v2465_v7  ;;  %2628 = vmatpush2.msra.mxu1 %v2469_v8 }
 0x3a8   : > { %2551 = vmatpush2.msra.mxu0 %v2467_v10  ;;  %2630 = vmatmul.mubr.f32.vlgmr.msra.gmra.mxu1 %v2321_v6 }
 0x3a9   : > { %2553 = vmatmul.mubr.f32.vlgmr.msra.gmra.mxu0 %v2321_v6  ;;  %5238 = vmatprep.mubr.msk.f32.mxu1 %vm2481_vm0, %v2324_v15 }
 0x3aa   : > { %5236 = vmatprep.mubr.msk.f32.mxu0 %vm2481_vm0, %v2324_v15  ;;  %5413 = vmatprep.subr.mxu1 %v5540_v28 }
 0x3ac   : > { %2635 = vmatmul.mubr.f32.gmra.mxu1 %v2323_v12 }
 0x3ad   : > { %2559 = vmatmul.mubr.f32.gmra.mxu0 %v2323_v12  ;;  %5417 = vmatprep.mubr.msk.f32.mxu1 %vm7745_vm3, %v5540_v28 }
 0x3ae   : > { %2720 = vmatprep.mubr.f32.mxu0 %v5540_v28 }
 0x3b2   : > { %v2474_v31 = vpop.permute.xlu0 %2473  ;;  %v2479_v14 = vpop.permute.xlu1 %2478 }
 0x468   : > { %v2631_v22 = vpop.f32.mrf.mxu1 }
 0x469   : > { %v2554_v19 = vpop.f32.mrf.mxu0  ;;  %v2632_v21 = vadd.f32 %v2631_v22, %v2474_v31 }
 0x46a   : > { %v2633_v29 = vpop.f32.mrf.mxu1  ;;  %v2555_v37 = vadd.f32 %v2554_v19, %v2474_v31 }
 0x46b   : > { %v2556_v24 = vpop.f32.mrf.mxu0  ;;  %v2642_v23 = vadd.f32 %v2632_v21, %v5978_v53  ;;  %v5264_v21 = vld [vmem:[%s7716_s7 + $0x28] sm:$0xff] }
 0x46c   : > { %v2636_v33 = vpop.f32.mrf.mxu1  ;;  %v2557_v9 = vadd.f32 %v2556_v24, %v2474_v31  ;;  %v2640_v53 = vadd.f32 %v2555_v37, %v5993_v56  ;;  %v5250_v31 = vld [vmem:[%s7717_s8 + $0x28] sm:$0xff]  ;;  %v5254_v24 = vld [vmem:[%s7718_s9 + $0x18] sm:$0xff] }
 0x46d   : > { %v2637_v35 = vadd.f32 %v2636_v33, %v2479_v14  ;;  %v2560_v2 = vpop.f32.mrf.mxu0  ;;  %v5260_v33 = vld [vmem:[%s7720_s11 + $0x8] sm:$0xff] }
 0x46e   : > { %v2638_v58 = vpop.f32.mrf.mxu1  ;;  %v2561_v63 = vadd.f32 %v2560_v2, %v2479_v14 }
 0x46f   : > { %v2645_v60 = vadd.f32 %v2637_v35, %v5963_v50  ;;  %v2562_v26 = vpop.f32.mrf.mxu0  ;;  %v2641_v50 = vadd.f32 %v2557_v9, %v6004_v59  ;;  %v5263_v35 = vld [vmem:[%s7716_s7 + $0x20] sm:$0xff] }
 0x470   : > { %v2563_v36 = vadd.f32 %v2562_v26, %v2479_v14  ;;  %v2643_v39 = vadd.f32 %v2561_v63, %v6019_v62  ;;  %v2651_v62 = vpop.permute.xlu1 %2650  ;;  %v5253_v14 = vld [vmem:[%s7718_s9 + $0x10] sm:$0xff] }
 0x471   : > { %5414 = vmatpush3.msra.mxu1 %v2645_v60 }
 0x472   : > { %v2644_v27 = vadd.f32 %v2563_v36, %v6050_v1  ;;  %5415 = vmatprep.subr.mxu1 %v5540_v28  ;;  %v5243_v1 = vld [vmem:[%s7715_s6 + $0x10] sm:$0xff] }
 0x473   : > { %5416 = vmatpush3.msra.mxu1 %v2642_v23 }
 0x474   : > { %2684 = vmatprep.subr.mxu0 %v2644_v27  ;;  %5418 = vmatmul.mubr.msk.f32.vlgmr.msra.gmra.mxu1 %vm2481_vm0, %v2646_v18  ;;  %v2818_v51 = vpop.permute.xlu1 %2817 }
 0x475   : > { %2685 = vmatpush1.msra.mxu0 %v2643_v39  ;;  %5422 = vmatprep.mubr.msk.f32.mxu1 %vm2156_vm15, %v5243_v1 }
 0x476   : > { %2686 = vmatprep.subr.mxu0 %v2641_v50 }
 0x477   : > { %2687 = vmatpush1.msra.mxu0 %v2640_v53 }
 0x478   : > { %5239 = vmatmul.mubr.msk.f32.vlgmr.msra.gmra.mxu0 %vm2481_vm0, %v2646_v18 }
 0x479   : > { %2895 = vmatprep.mubr.f32.mxu0 %v5540_v28 }
 0x534   : > { %v2793_v59 = vpop.f32.mrf.mxu1 }
 0x535   : > { %v2794_v40 = vadd.f32 %v2793_v59, %v2651_v62 }
 0x536   : > { %v5419_v11 = vpop.f32.mrf.mxu1 }
 0x537   : > { %v2799_v41 = vadd.f32 %v2794_v40, %v5944_v42 }
 0x538   : > { %v2722_v56 = vpop.f32.mrf.mxu0 }
 0x539   : > { %v2723_v25 = vadd.f32 %v2722_v56, %v2651_v62  ;;  %vm2802_vm6 = vcmp.ge.f32.partialorder %v2799_v41, 0.0  ;;  %v2805_v43 = vmul.f32 0.1, %v2799_v41 }
 0x53a   : > { %v2724_v20 = vpop.f32.mrf.mxu0 }
 0x53b   : > { %v2797_v34 = vadd.f32 %v2723_v25, %v5955_v46  ;;  %v2725_v44 = vadd.f32 %v2724_v20, %v2651_v62  ;;  %v6350_v48 = vsel %vm2802_vm6, %v2799_v41, %v2805_v43 }
 0x53c   : > { %5420 = vmatprep.subr.mxu1 %v6350_v48 }
 0x53d   : > { %v2798_v49 = vadd.f32 %v2725_v44, %v5951_v45  ;;  %5421 = vmatpush3.msra.mxu1 %v6350_v48  ;;  %v2803_v42 = vmul.f32 0.1, %v2797_v34  ;;  %vm2800_vm3 = vcmp.ge.f32.partialorder %v2797_v34, 0.0  ;;  %v2823_v45 = vpop.permute.xlu0 %2822 }
 0x53e   : > { %5423 = vmatmul.mubr.msk.f32.vlgmr.msra.gmra.mxu1 %vm2156_vm15, %v5244_v13  ;;  %3234 = vmatprep.subr.mxu1 %v5540_v28 }
 0x53f   : > { %vm2801_vm7 = vcmp.ge.f32.partialorder %v2798_v49, 0.0  ;;  %v2804_v46 = vmul.f32 0.1, %v2798_v49  ;;  %v6363_v52 = vsel %vm2800_vm3, %v2797_v34, %v2803_v42  ;;  %5257 = vmatprep.mubr.msk.f32.mxu1 %vm2481_vm0, %v5250_v31  ;;  %vm7774_vm3 = vmmov 0  }
 0x541   : > { %v6360_v32 = vsel %vm2801_vm7, %v2798_v49, %v2804_v46 }
 0x542   : > { %2861 = vmatprep.subr.mxu0 %v6360_v32 }
 0x543   : > { %2862 = vmatpush1.msra.mxu0 %v6363_v52 }
 0x544   : > { %5245 = vmatmul.mubr.msk.f32.vlgmr.msra.gmra.mxu0 %vm2156_vm15, %v5243_v1 }
 0x545   : > { %2901 = vmatprep.mubr.f32.mxu0 %v5540_v28 }
 0x548   : > { %5246 = vmatmul.mubr.msk.f32.gmra.mxu0 %vm2156_vm15, %v5244_v13 }
 0x549   : > { %5255 = vmatprep.mubr.msk.f32.mxu0 %vm2481_vm0, %v5250_v31 }
 0x5fe   : > { %v5424_v38 = vpop.f32.mrf.mxu1 }
 0x5ff   : > { %v6369_v55 = vadd.f32 %v5424_v38, %v2823_v45 }
 0x600   : > { %v2974_v61 = vpop.f32.mrf.mxu1 }
 0x601   : > { %v6374_v57 = vsel %vm626_vm2, %v2823_v45, %v6369_v55  ;;  %v6384_v54 = vadd.f32 %v2974_v61, %v2818_v51 }
 0x602   : > { %3061 = vrot.lane.b32.xlu0 %v6374_v57, %s7768_s24  ;;  %3115 = vrot.lane.b32.xlu1 %v6374_v57, %s7769_s25 }
 0x603   : > { %v6393_v3 = vsel %vm626_vm2, %v2818_v51, %v6384_v54 }
 0x604   : > { %v2897_v4 = vpop.f32.mrf.mxu0 }
 0x605   : > { %v6399_v0 = vadd.f32 %v2897_v4, %v2818_v51 }
 0x606   : > { %3043 = vrot.lane.b32.xlu0 %v6374_v57, %s7770_s26  ;;  %3097 = vrot.lane.b32.xlu1 %v6374_v57, %s7771_s19  ;;  %v2899_v5 = vpop.f32.mrf.mxu0 }
 0x607   : > { %v6408_v6 = vsel %vm624_vm1, %v2818_v51, %v6399_v0  ;;  %v6410_v7 = vadd.f32 %v2899_v5, %v2818_v51 }
 0x608   : > { %v2903_v10 = vpop.f32.mrf.mxu0 }
 0x609   : > { %v6419_v8 = vsel %vm625_vm4, %v2818_v51, %v6410_v7  ;;  %v6425_v15 = vadd.f32 %v2903_v10, %v2823_v45 }
 0x60a   : > { %3025 = vrot.lane.b32.xlu0 %v6374_v57, %s7772_s29  ;;  %3079 = vrot.lane.b32.xlu1 %v6374_v57, %s7766_s30  ;;  %v2905_v22 = vpop.f32.mrf.mxu0 }
 0x60b   : > { %v6434_v12 = vsel %vm624_vm1, %v2823_v45, %v6425_v15  ;;  %v6456_v19 = vadd.f32 %v2905_v22, %v2823_v45 }
 0x60d   : > { %v6465_v29 = vsel %vm625_vm4, %v2823_v45, %v6456_v19 }
 0x60e   : > { %3059 = vrot.lane.b32.xlu1 %v6393_v3, %s7768_s24  ;;  %3113 = vrot.lane.b32.xlu0 %v6393_v3, %s7769_s25 }
 0x612   : > { %3041 = vrot.lane.b32.xlu1 %v6393_v3, %s7770_s26  ;;  %3095 = vrot.lane.b32.xlu0 %v6393_v3, %s7771_s19 }
 0x616   : > { %3077 = vrot.lane.b32.xlu0 %v6393_v3, %s7766_s30  ;;  %3105 = vrot.lane.b32.xlu1 %v6408_v6, %s7769_s25 }
 0x61a   : > { %3055 = vrot.lane.b32.xlu0 %v6419_v8, %s7768_s24  ;;  %3087 = vrot.lane.b32.xlu1 %v6408_v6, %s7771_s19 }
 0x61e   : > { %3037 = vrot.lane.b32.xlu0 %v6419_v8, %s7770_s26  ;;  %3069 = vrot.lane.b32.xlu1 %v6408_v6, %s7766_s30 }
 0x622   : > { %3107 = vrot.lane.b32.xlu0 %v6434_v12, %s7769_s25  ;;  %3051 = vrot.lane.b32.xlu1 %v6408_v6, %s7768_s24 }
 0x626   : > { %3089 = vrot.lane.b32.xlu0 %v6434_v12, %s7771_s19  ;;  %3033 = vrot.lane.b32.xlu1 %v6408_v6, %s7770_s26 }
 0x62a   : > { %3071 = vrot.lane.b32.xlu0 %v6434_v12, %s7766_s30  ;;  %3015 = vrot.lane.b32.xlu1 %v6408_v6, %s7772_s29 }
 0x62e   : > { %3053 = vrot.lane.b32.xlu0 %v6434_v12, %s7768_s24  ;;  %3109 = vrot.lane.b32.xlu1 %v6419_v8, %s7769_s25 }
 0x632   : > { %3035 = vrot.lane.b32.xlu0 %v6434_v12, %s7770_s26  ;;  %3091 = vrot.lane.b32.xlu1 %v6419_v8, %s7771_s19 }
 0x636   : > { %3017 = vrot.lane.b32.xlu0 %v6434_v12, %s7772_s29  ;;  %3073 = vrot.lane.b32.xlu1 %v6419_v8, %s7766_s30 }
 0x63a   : > { %3111 = vrot.lane.b32.xlu0 %v6465_v29, %s7769_s25  ;;  %3023 = vrot.lane.b32.xlu1 %v6393_v3, %s7772_s29 }
 0x63e   : > { %3093 = vrot.lane.b32.xlu0 %v6465_v29, %s7771_s19  ;;  %2997 = vrot.lane.b32.xlu1 %v6408_v6, %s7767_s22 }
 0x642   : > { %3075 = vrot.lane.b32.xlu0 %v6465_v29, %s7766_s30  ;;  %3005 = vrot.lane.b32.xlu1 %v6393_v3, %s7767_s22 }
 0x646   : > { %3019 = vrot.lane.b32.xlu0 %v6419_v8, %s7772_s29  ;;  %3133 = vrot.lane.b32.xlu1 %v6374_v57, %s7773_s0 }
 0x64a   : > { %2999 = vrot.lane.b32.xlu0 %v6434_v12, %s7767_s22  ;;  %3057 = vrot.lane.b32.xlu1 %v6465_v29, %s7768_s24 }
 0x64e   : > { %3007 = vrot.lane.b32.xlu0 %v6374_v57, %s7767_s22  ;;  %3039 = vrot.lane.b32.xlu1 %v6465_v29, %s7770_s26 }
 0x652   : > { %3001 = vrot.lane.b32.xlu0 %v6419_v8, %s7767_s22  ;;  %3021 = vrot.lane.b32.xlu1 %v6465_v29, %s7772_s29 }
 0x656   : > { %3125 = vrot.lane.b32.xlu0 %v6434_v12, %s7773_s0  ;;  %3003 = vrot.lane.b32.xlu1 %v6465_v29, %s7767_s22 }
 0x65a   : > { %3129 = vrot.lane.b32.xlu0 %v6465_v29, %s7773_s0  ;;  %3127 = vrot.lane.b32.xlu1 %v6419_v8, %s7773_s0 }
 0x65e   : > { %3131 = vrot.lane.b32.xlu0 %v6393_v3, %s7773_s0  ;;  %3123 = vrot.lane.b32.xlu1 %v6408_v6, %s7773_s0 }
 0x662   : > { %3148 = vperm.xlu0 %5506, %v5254_v24   ;;  %3143 = vperm.xlu1 %5507, %v5253_v14  }
 0x666   : > { %3321 = vperm.xlu0 %5506, %v5260_v33   ;;  %3484 = vperm.xlu1 %5507, %v5264_v21  }
 0x66a   : > { %3479 = vperm.xlu0 %5506, %v5263_v35  }
 0x674   : > { %v6527_v2 = vpop.permute.xlu0 %3061  ;;  %v3116_v58 = vpop.permute.xlu1 %3115 }
 0x678   : > { %v6529_v60 = vpop.permute.xlu0 %3043  ;;  %v3098_v63 = vpop.permute.xlu1 %3097 }
 0x67c   : > { %v6531_v26 = vpop.permute.xlu0 %3025  ;;  %v6533_v9 = vpop.permute.xlu1 %3079 }
 0x680   : > { %v3114_v36 = vpop.permute.xlu0 %3113  ;;  %v6535_v23 = vpop.permute.xlu1 %3059 }
 0x684   : > { %v3096_v37 = vpop.permute.xlu0 %3095  ;;  %v6537_v18 = vpop.permute.xlu1 %3041 }
 0x688   : > { %v6539_v27 = vpop.permute.xlu0 %3077  ;;  %v3106_v39 = vpop.permute.xlu1 %3105 }
 0x689   : > { %v3121_v41 = vsel %vm703_vm13, %v3114_v36, %v3106_v39 }
 0x68c   : > { %v6541_v50 = vpop.permute.xlu0 %3055  ;;  %v3088_v53 = vpop.permute.xlu1 %3087 }
 0x68d   : > { %v3103_v20 = vsel %vm693_vm12, %v3096_v37, %v3088_v53 }
 0x690   : > { %v6543_v1 = vpop.permute.xlu0 %3037  ;;  %v6545_v62 = vpop.permute.xlu1 %3069 }
 0x691   : > { %v3085_v49 = vsel %vm683_vm11, %v6539_v27, %v6545_v62 }
 0x694   : > { %v3108_v59 = vpop.permute.xlu0 %3107  ;;  %v6547_v40 = vpop.permute.xlu1 %3051 }
 0x695   : > { %v3122_v11 = vsel %vm703_vm13, %v3116_v58, %v3108_v59 }
 0x696   : > { %3235 = vmatpush1.msra.mxu1 %v3122_v11 }
 0x697   : > { %3236 = vmatprep.subr.mxu1 %v5540_v28 }
 0x698   : > { %v3090_v56 = vpop.permute.xlu0 %3089  ;;  %3237 = vmatpush1.msra.mxu1 %v3121_v41  ;;  %v6554_v25 = vpop.permute.xlu1 %3033 }
 0x699   : > { %3238 = vmatprep.subr.mxu1 %v5540_v28  ;;  %v3104_v43 = vsel %vm693_vm12, %v3098_v63, %v3090_v56 }
 0x69a   : > { %3239 = vmatpush1.msra.mxu1 %v3104_v43 }
 0x69b   : > { %3240 = vmatprep.subr.mxu1 %v5540_v28 }
 0x69c   : > { %v3072_v34 = vpop.permute.xlu0 %3071  ;;  %3241 = vmatpush1.msra.mxu1 %v3103_v20  ;;  %v6562_v44 = vpop.permute.xlu1 %3015 }
 0x69d   : > { %3242 = vmatprep.subr.mxu1 %v5540_v28  ;;  %v3086_v13 = vsel %vm683_vm11, %v6533_v9, %v3072_v34 }
 0x69e   : > { %3243 = vmatpush1.msra.mxu1 %v3086_v13 }
 0x69f   : > { %3244 = vmatprep.subr.mxu1 %v5540_v28 }
 0x6a0   : > { %v3054_v42 = vpop.permute.xlu0 %3053  ;;  %3245 = vmatpush1.msra.mxu1 %v3085_v49  ;;  %v3110_v46 = vpop.permute.xlu1 %3109 }
 0x6a1   : > { %3246 = vmatprep.subr.mxu1 %v5540_v28  ;;  %v3119_v24 = vsel %vm703_vm13, %v3106_v39, %v3110_v46 }
 0x6a2   : > { %3247 = vmatpush1.msra.mxu1 %v6374_v57 }
 0x6a3   : > { %3248 = vmatprep.subr.mxu1 %v5540_v28 }
 0x6a4   : > { %v6576_v45 = vpop.permute.xlu0 %3035  ;;  %3249 = vmatpush1.msra.mxu1 %v6393_v3  ;;  %v3092_v38 = vpop.permute.xlu1 %3091  ;;  %v3117_v3 = vsel %vm703_vm13, %v3110_v46, %v3114_v36 }
 0x6a5   : > { %3250 = vmatprep.subr.mxu1 %v5540_v28  ;;  %v3099_v21 = vsel %vm693_vm12, %v3092_v38, %v3096_v37  ;;  %v3101_v36 = vsel %vm693_vm12, %v3088_v53, %v3092_v38  ;;  %v3050_v20 = vsel %vm663_vm9, %v6529_v60, %v6576_v45 }
 0x6a8   : > { %v6580_v61 = vpop.permute.xlu0 %3017  ;;  %v3074_v51 = vpop.permute.xlu1 %3073 }
 0x6a9   : > { %v3081_v37 = vsel %vm683_vm11, %v3074_v51, %v6539_v27  ;;  %v3083_v53 = vsel %vm683_vm11, %v6545_v62, %v3074_v51 }
 0x6ac   : > { %v3112_v4 = vpop.permute.xlu0 %3111  ;;  %v6582_v5 = vpop.permute.xlu1 %3023 }
 0x6ad   : > { %v3118_v10 = vsel %vm703_vm13, %v3112_v4, %v3116_v58  ;;  %v3120_v57 = vsel %vm703_vm13, %v3108_v59, %v3112_v4 }
 0x6ae   : > { %3157 = vmatprep.subr.mxu0 %v3118_v10 }
 0x6af   : > { %3158 = vmatpush1.msra.mxu0 %v3120_v57 }
 0x6b0   : > { %v3094_v22 = vpop.permute.xlu0 %3093  ;;  %3159 = vmatprep.subr.mxu0 %v3117_v3  ;;  %v6590_v31 = vpop.permute.xlu1 %2997 }
 0x6b1   : > { %3160 = vmatpush1.msra.mxu0 %v3119_v24  ;;  %v3100_v14 = vsel %vm693_vm12, %v3094_v22, %v3098_v63  ;;  %v3102_v33 = vsel %vm693_vm12, %v3090_v56, %v3094_v22 }
 0x6b2   : > { %3161 = vmatprep.subr.mxu0 %v3100_v14 }
 0x6b3   : > { %3162 = vmatpush1.msra.mxu0 %v3102_v33  ;;  %v5249_v33 = vld [vmem:[%s7717_s8 + $0x20] sm:$0xff] }
 0x6b4   : > { %v3076_v35 = vpop.permute.xlu0 %3075  ;;  %3163 = vmatprep.subr.mxu0 %v3099_v21  ;;  %v6600_v58 = vpop.permute.xlu1 %3005 }
 0x6b5   : > { %3164 = vmatpush1.msra.mxu0 %v3101_v36  ;;  %v3082_v63 = vsel %vm683_vm11, %v3076_v35, %v6533_v9  ;;  %v3084_v39 = vsel %vm683_vm11, %v3072_v34, %v3076_v35  ;;  %v3013_v57 = vsel %vm643_vm8, %v6600_v58, %v6590_v31  ;;  %v5252_v36 = vld [vmem:[%s7717_s8 + $0x38] sm:$0xff] }
 0x6b6   : > { %3165 = vmatprep.subr.mxu0 %v3082_v63  ;;  %v5251_v63 = vld [vmem:[%s7717_s8 + $0x30] sm:$0xff] }
 0x6b7   : > { %3166 = vmatpush1.msra.mxu0 %v3084_v39 }
 0x6b8   : > { %v3020_v59 = vpop.permute.xlu0 %3019  ;;  %3167 = vmatprep.subr.mxu0 %v3081_v37  ;;  %v6612_v11 = vpop.permute.xlu1 %3133 }
 0x6b9   : > { %3168 = vmatpush1.msra.mxu0 %v3083_v53 }
 0x6ba   : > { %3169 = vmatprep.subr.mxu0 %v6465_v29  ;;  %v3068_v29 = vsel %vm673_vm10, %v6527_v2, %v3054_v42 }
 0x6bb   : > { %3170 = vmatpush1.msra.mxu0 %v6434_v12 }
 0x6bc   : > { %v3000_v9 = vpop.permute.xlu0 %2999  ;;  %3171 = vmatprep.subr.mxu0 %v6419_v8  ;;  %v3058_v41 = vpop.permute.xlu1 %3057  ;;  %v3063_v8 = vsel %vm673_vm10, %v6541_v50, %v6535_v23 }
 0x6bd   : > { %3172 = vmatpush1.msra.mxu0 %v6408_v6  ;;  %v3066_v27 = vsel %vm673_vm10, %v3054_v42, %v3058_v41  ;;  %v3064_v56 = vsel %vm673_vm10, %v3058_v41, %v6527_v2  ;;  %v3065_v6 = vsel %vm673_vm10, %v6547_v40, %v6541_v50  ;;  %v3067_v2 = vsel %vm673_vm10, %v6535_v23, %v6547_v40 }
 0x6be   : > { %3173 = vmatprep.subr.mxu0 %v3066_v27  ;;  %3251 = vmatpush1.msra.mxu1 %v3064_v56  ;;  %v3047_v23 = vsel %vm663_vm9, %v6554_v25, %v6543_v1  ;;  %v3045_v40 = vsel %vm663_vm9, %v6543_v1, %v6537_v18  ;;  %v3032_v42 = vsel %vm653_vm5, %v6531_v26, %v6580_v61 }
 0x6bf   : > { %3174 = vmatpush1.msra.mxu0 %v3068_v29  ;;  %3252 = vmatprep.subr.mxu1 %v5540_v28 }
 0x6c0   : > { %v3008_v12 = vpop.permute.xlu0 %3007  ;;  %3175 = vmatprep.subr.mxu0 %v3065_v6  ;;  %3253 = vmatpush1.msra.mxu1 %v3063_v8  ;;  %v3040_v62 = vpop.permute.xlu1 %3039 }
 0x6c1   : > { %3176 = vmatpush1.msra.mxu0 %v3067_v2  ;;  %3254 = vmatprep.subr.mxu1 %v5540_v28  ;;  %v3048_v43 = vsel %vm663_vm9, %v6576_v45, %v3040_v62  ;;  %v3046_v50 = vsel %vm663_vm9, %v3040_v62, %v6529_v60  ;;  %v3049_v60 = vsel %vm663_vm9, %v6537_v18, %v6554_v25 }
 0x6c2   : > { %3177 = vmatprep.subr.mxu0 %v3048_v43  ;;  %3255 = vmatpush1.msra.mxu1 %v3046_v50  ;;  %v3029_v18 = vsel %vm653_vm5, %v6562_v44, %v3020_v59  ;;  %v3027_v25 = vsel %vm653_vm5, %v3020_v59, %v6582_v5  ;;  %v3014_v51 = vsel %vm643_vm8, %v3008_v12, %v3000_v9 }
 0x6c3   : > { %3178 = vmatpush1.msra.mxu0 %v3050_v20  ;;  %3256 = vmatprep.subr.mxu1 %v5540_v28 }
 0x6c4   : > { %v3002_v34 = vpop.permute.xlu0 %3001  ;;  %3179 = vmatprep.subr.mxu0 %v3047_v23  ;;  %3257 = vmatpush1.msra.mxu1 %v3045_v40  ;;  %v3022_v13 = vpop.permute.xlu1 %3021  ;;  %v5259_v23 = vld [vmem:[%s7719_s10 + $0x8] sm:$0xff] }
 0x6c5   : > { %3180 = vmatpush1.msra.mxu0 %v3049_v60  ;;  %3258 = vmatprep.subr.mxu1 %v5540_v28  ;;  %v3030_v49 = vsel %vm653_vm5, %v6580_v61, %v3022_v13  ;;  %v3028_v1 = vsel %vm653_vm5, %v3022_v13, %v6531_v26  ;;  %v3031_v26 = vsel %vm653_vm5, %v6582_v5, %v6562_v44 }
 0x6c6   : > { %3181 = vmatprep.subr.mxu0 %v3030_v49  ;;  %3259 = vmatpush1.msra.mxu1 %v3028_v1  ;;  %v3011_v44 = vsel %vm643_vm8, %v6590_v31, %v3002_v34  ;;  %v3009_v4 = vsel %vm643_vm8, %v3002_v34, %v6600_v58  ;;  %v5266_v1 = vld [vmem:[%s7715_s6 + $0x28] sm:$0xff] }
 0x6c7   : > { %3182 = vmatpush1.msra.mxu0 %v3032_v42  ;;  %3260 = vmatprep.subr.mxu1 %v5540_v28 }
 0x6c8   : > { %v3126_v46 = vpop.permute.xlu0 %3125  ;;  %3183 = vmatprep.subr.mxu0 %v3029_v18  ;;  %3261 = vmatpush1.msra.mxu1 %v3027_v25  ;;  %v3004_v45 = vpop.permute.xlu1 %3003 }
 0x6c9   : > { %3184 = vmatpush1.msra.mxu0 %v3031_v26  ;;  %3262 = vmatprep.subr.mxu1 %v5540_v28  ;;  %v3012_v38 = vsel %vm643_vm8, %v3000_v9, %v3004_v45  ;;  %v3010_v61 = vsel %vm643_vm8, %v3004_v45, %v3008_v12  ;;  %v3140_v22 = vsel %vm7750_vm14, %v6612_v11, %v3126_v46 }
 0x6ca   : > { %3185 = vmatprep.subr.mxu0 %v3012_v38  ;;  %3263 = vmatpush1.msra.mxu1 %v3010_v61 }
 0x6cb   : > { %3186 = vmatpush1.msra.mxu0 %v3014_v51  ;;  %3264 = vmatprep.subr.mxu1 %v5540_v28 }
 0x6cc   : > { %v3130_v5 = vpop.permute.xlu0 %3129  ;;  %3187 = vmatprep.subr.mxu0 %v3011_v44  ;;  %3265 = vmatpush1.msra.mxu1 %v3009_v4  ;;  %v3128_v10 = vpop.permute.xlu1 %3127 }
 0x6cd   : > { %3188 = vmatpush1.msra.mxu0 %v3013_v57  ;;  %3294 = vmatprep.subr.mxu1 %v5540_v28  ;;  %v3136_v3 = vsel %vm7750_vm14, %v3130_v5, %v6612_v11  ;;  %v3138_v24 = vsel %vm7750_vm14, %v3126_v46, %v3130_v5 }
 0x6ce   : > { %3217 = vmatprep.subr.mxu0 %v3136_v3  ;;  %3295 = vmatpush2.msra.mxu1 %v3140_v22 }
 0x6cf   : > { %3218 = vmatpush2.msra.mxu0 %v3138_v24  ;;  %3296 = vmatprep.subr.mxu1 %v5540_v28 }
 0x6d0   : > { %v3132_v31 = vpop.permute.xlu0 %3131  ;;  %v3124_v14 = vpop.permute.xlu1 %3123 }
 0x6d1   : > { %v3135_v21 = vsel %vm7750_vm14, %v3128_v10, %v3132_v31  ;;  %v3139_v35 = vsel %vm7750_vm14, %v3132_v31, %v3124_v14  ;;  %v3137_v58 = vsel %vm7750_vm14, %v3124_v14, %v3128_v10 }
 0x6d2   : > { %3219 = vmatprep.subr.mxu0 %v3135_v21  ;;  %3297 = vmatpush2.msra.mxu1 %v3139_v35 }
 0x6d3   : > { %3220 = vmatpush2.msra.mxu0 %v3137_v58  ;;  %3299 = vmatmul.mubr.f32.vlgmr.msra.gmra.mxu1 %v5249_v33  ;;  %v5272_v58 = vld [vmem:[%s7717_s8 + $0x48] sm:$0xff] }
 0x6d4   : > { %3222 = vmatmul.mubr.f32.vlgmr.msra.gmra.mxu0 %v5249_v33  ;;  %5258 = vmatprep.mubr.msk.f32.mxu1 %vm2481_vm0, %v5252_v36 }
 0x6d5   : > { %5256 = vmatprep.mubr.msk.f32.mxu0 %vm2481_vm0, %v5252_v36  ;;  %5425 = vmatprep.subr.mxu1 %v5540_v28  ;;  %v5275_v36 = vld [vmem:[%s7718_s9 + $0x20] sm:$0xff] }
 0x6d7   : > { %3304 = vmatmul.mubr.f32.gmra.mxu1 %v5251_v63 }
 0x6d8   : > { %3228 = vmatmul.mubr.f32.gmra.mxu0 %v5251_v63  ;;  %5429 = vmatprep.mubr.msk.f32.mxu1 %vm7774_vm3, %v5540_v28  ;;  %v5276_v63 = vld [vmem:[%s7718_s9 + $0x28] sm:$0xff] }
 0x6d9   : > { %3391 = vmatprep.mubr.f32.mxu0 %v5540_v28 }
 0x6dd   : > { %v3149_v11 = vpop.permute.xlu0 %3148  ;;  %v3144_v9 = vpop.permute.xlu1 %3143 }
 0x6e1   : > { %v3485_v45 = vpop.permute.xlu1 %3484 }
 0x793   : > { %v3300_v39 = vpop.f32.mrf.mxu1 }
 0x794   : > { %v3223_v37 = vpop.f32.mrf.mxu0  ;;  %v3301_v27 = vadd.f32 %v3300_v39, %v3144_v9  ;;  %v5286_v39 = vld [vmem:[%s7716_s7 + $0x38] sm:$0xff] }
 0x795   : > { %v3302_v59 = vpop.f32.mrf.mxu1  ;;  %v3224_v20 = vadd.f32 %v3223_v37, %v3144_v9  ;;  %v5282_v37 = vld [vmem:[%s7720_s11 + $0x10] sm:$0xff] }
 0x796   : > { %v3225_v53 = vpop.f32.mrf.mxu0  ;;  %v3311_v50 = vadd.f32 %v3301_v27, %v6384_v54  ;;  %v5285_v59 = vld [vmem:[%s7716_s7 + $0x30] sm:$0xff] }
 0x797   : > { %v3305_v41 = vpop.f32.mrf.mxu1  ;;  %v3226_v2 = vadd.f32 %v3225_v53, %v3144_v9  ;;  %v3309_v54 = vadd.f32 %v3224_v20, %v6399_v0 }
 0x798   : > { %v3306_v56 = vadd.f32 %v3305_v41, %v3149_v11  ;;  %v3229_v29 = vpop.f32.mrf.mxu0 }
 0x799   : > { %v3307_v6 = vpop.f32.mrf.mxu1  ;;  %v3230_v12 = vadd.f32 %v3229_v29, %v3149_v11 }
 0x79a   : > { %v3314_v8 = vadd.f32 %v3306_v56, %v6369_v55  ;;  %v3231_v62 = vpop.f32.mrf.mxu0  ;;  %v3310_v55 = vadd.f32 %v3226_v2, %v6410_v7 }
 0x79b   : > { %v3232_v43 = vadd.f32 %v3231_v62, %v3149_v11  ;;  %v3312_v34 = vadd.f32 %v3230_v12, %v6425_v15  ;;  %v3322_v15 = vpop.permute.xlu0 %3321 }
 0x79c   : > { %5426 = vmatpush3.msra.mxu1 %v3314_v8 }
 0x79d   : > { %v3313_v40 = vadd.f32 %v3232_v43, %v6456_v19  ;;  %5427 = vmatprep.subr.mxu1 %v5540_v28  ;;  %v5265_v19 = vld [vmem:[%s7715_s6 + $0x20] sm:$0xff] }
 0x79e   : > { %5428 = vmatpush3.msra.mxu1 %v3311_v50 }
 0x79f   : > { %3355 = vmatprep.subr.mxu0 %v3313_v40  ;;  %5430 = vmatmul.mubr.msk.f32.vlgmr.msra.gmra.mxu1 %vm2481_vm0, %v5259_v23  ;;  %v3480_v61 = vpop.permute.xlu0 %3479 }
 0x7a0   : > { %3356 = vmatpush1.msra.mxu0 %v3312_v34  ;;  %5434 = vmatprep.mubr.msk.f32.mxu1 %vm2156_vm15, %v5265_v19 }
 0x7a1   : > { %3357 = vmatprep.subr.mxu0 %v3310_v55 }
 0x7a2   : > { %3358 = vmatpush1.msra.mxu0 %v3309_v54 }
 0x7a3   : > { %5261 = vmatmul.mubr.msk.f32.vlgmr.msra.gmra.mxu0 %vm2481_vm0, %v5259_v23 }
 0x7a4   : > { %3557 = vmatprep.mubr.f32.mxu0 %v5540_v28 }
 0x85f   : > { %v3464_v7 = vpop.f32.mrf.mxu1 }
 0x860   : > { %v3465_v13 = vadd.f32 %v3464_v7, %v3322_v15 }
 0x861   : > { %v5431_v60 = vpop.f32.mrf.mxu1 }
 0x862   : > { %v6755_v49 = vadd.f32 %v3465_v13, %v6350_v48 }
 0x863   : > { %v3393_v0 = vpop.f32.mrf.mxu0 }
 0x864   : > { %5432 = vmatprep.subr.mxu1 %v6755_v49  ;;  %v3394_v42 = vadd.f32 %v3393_v0, %v3322_v15 }
 0x865   : > { %v3395_v18 = vpop.f32.mrf.mxu0  ;;  %5433 = vmatpush3.msra.mxu1 %v6755_v49 }
 0x866   : > { %v3396_v25 = vadd.f32 %v3395_v18, %v3322_v15  ;;  %5435 = vmatmul.mubr.msk.f32.vlgmr.msra.gmra.mxu1 %vm2156_vm15, %v5266_v1  ;;  %3896 = vmatprep.subr.mxu1 %v5540_v28  ;;  %v6768_v48 = vadd.f32 %v3394_v42, %v6363_v52 }
 0x867   : > { %5279 = vmatprep.mubr.msk.f32.mxu1 %vm2481_vm0, %v5272_v58 }
 0x868   : > { %v6765_v46 = vadd.f32 %v3396_v25, %v6360_v32 }
 0x86a   : > { %3523 = vmatprep.subr.mxu0 %v6765_v46 }
 0x86b   : > { %3524 = vmatpush1.msra.mxu0 %v6768_v48 }
 0x86c   : > { %5267 = vmatmul.mubr.msk.f32.vlgmr.msra.gmra.mxu0 %vm2156_vm15, %v5265_v19 }
 0x86d   : > { %3563 = vmatprep.mubr.f32.mxu0 %v5540_v28 }
 0x870   : > { %5268 = vmatmul.mubr.msk.f32.gmra.mxu0 %vm2156_vm15, %v5266_v1 }
 0x871   : > { %5277 = vmatprep.mubr.msk.f32.mxu0 %vm2481_vm0, %v5272_v58 }
 0x926   : > { %v5436_v26 = vpop.f32.mrf.mxu1 }
 0x927   : > { %v6775_v38 = vadd.f32 %v5436_v26, %v3485_v45 }
 0x928   : > { %v3636_v52 = vpop.f32.mrf.mxu1 }
 0x929   : > { %v6780_v32 = vsel %vm626_vm2, %v3485_v45, %v6775_v38  ;;  %v6790_v51 = vadd.f32 %v3636_v52, %v3480_v61 }
 0x92a   : > { %3723 = vrot.lane.b32.xlu1 %v6780_v32, %s7768_s24  ;;  %3777 = vrot.lane.b32.xlu0 %v6780_v32, %s7769_s25 }
 0x92b   : > { %v6799_v44 = vsel %vm626_vm2, %v3480_v61, %v6790_v51 }
 0x92c   : > { %v3559_v4 = vpop.f32.mrf.mxu0 }
 0x92d   : > { %v6805_v5 = vadd.f32 %v3559_v4, %v3480_v61 }
 0x92e   : > { %3705 = vrot.lane.b32.xlu1 %v6780_v32, %s7770_s26  ;;  %3759 = vrot.lane.b32.xlu0 %v6780_v32, %s7771_s19  ;;  %v3561_v10 = vpop.f32.mrf.mxu0 }
 0x92f   : > { %v6814_v57 = vsel %vm624_vm1, %v3480_v61, %v6805_v5  ;;  %v6816_v3 = vadd.f32 %v3561_v10, %v3480_v61 }
 0x930   : > { %v3565_v24 = vpop.f32.mrf.mxu0 }
 0x931   : > { %v6825_v22 = vsel %vm625_vm4, %v3480_v61, %v6816_v3  ;;  %v6831_v31 = vadd.f32 %v3565_v24, %v3485_v45 }
 0x932   : > { %3687 = vrot.lane.b32.xlu1 %v6780_v32, %s7772_s29  ;;  %3741 = vrot.lane.b32.xlu0 %v6780_v32, %s7766_s30  ;;  %v3567_v33 = vpop.f32.mrf.mxu0 }
 0x933   : > { %v6840_v14 = vsel %vm624_vm1, %v3485_v45, %v6831_v31  ;;  %v6862_v21 = vadd.f32 %v3567_v33, %v3485_v45 }
 0x935   : > { %v6871_v35 = vsel %vm625_vm4, %v3485_v45, %v6862_v21 }
 0x936   : > { %3775 = vrot.lane.b32.xlu1 %v6799_v44, %s7769_s25  ;;  %3721 = vrot.lane.b32.xlu0 %v6799_v44, %s7768_s24 }
 0x93a   : > { %3757 = vrot.lane.b32.xlu1 %v6799_v44, %s7771_s19  ;;  %3703 = vrot.lane.b32.xlu0 %v6799_v44, %s7770_s26 }
 0x93e   : > { %3739 = vrot.lane.b32.xlu1 %v6799_v44, %s7766_s30  ;;  %3767 = vrot.lane.b32.xlu0 %v6814_v57, %s7769_s25 }
 0x942   : > { %3717 = vrot.lane.b32.xlu1 %v6825_v22, %s7768_s24  ;;  %3749 = vrot.lane.b32.xlu0 %v6814_v57, %s7771_s19 }
 0x946   : > { %3699 = vrot.lane.b32.xlu1 %v6825_v22, %s7770_s26  ;;  %3731 = vrot.lane.b32.xlu0 %v6814_v57, %s7766_s30 }
 0x94a   : > { %3713 = vrot.lane.b32.xlu0 %v6814_v57, %s7768_s24  ;;  %3769 = vrot.lane.b32.xlu1 %v6840_v14, %s7769_s25 }
 0x94e   : > { %3695 = vrot.lane.b32.xlu0 %v6814_v57, %s7770_s26  ;;  %3751 = vrot.lane.b32.xlu1 %v6840_v14, %s7771_s19 }
 0x952   : > { %3677 = vrot.lane.b32.xlu0 %v6814_v57, %s7772_s29  ;;  %3733 = vrot.lane.b32.xlu1 %v6840_v14, %s7766_s30 }
 0x956   : > { %3771 = vrot.lane.b32.xlu0 %v6825_v22, %s7769_s25  ;;  %3715 = vrot.lane.b32.xlu1 %v6840_v14, %s7768_s24 }
 0x95a   : > { %3753 = vrot.lane.b32.xlu0 %v6825_v22, %s7771_s19  ;;  %3697 = vrot.lane.b32.xlu1 %v6840_v14, %s7770_s26 }
 0x95e   : > { %3735 = vrot.lane.b32.xlu0 %v6825_v22, %s7766_s30  ;;  %3679 = vrot.lane.b32.xlu1 %v6840_v14, %s7772_s29 }
 0x962   : > { %3685 = vrot.lane.b32.xlu0 %v6799_v44, %s7772_s29  ;;  %3773 = vrot.lane.b32.xlu1 %v6871_v35, %s7769_s25 }
 0x966   : > { %3659 = vrot.lane.b32.xlu0 %v6814_v57, %s7767_s22  ;;  %3755 = vrot.lane.b32.xlu1 %v6871_v35, %s7771_s19 }
 0x96a   : > { %3667 = vrot.lane.b32.xlu0 %v6799_v44, %s7767_s22  ;;  %3737 = vrot.lane.b32.xlu1 %v6871_v35, %s7766_s30 }
 0x96e   : > { %3795 = vrot.lane.b32.xlu0 %v6780_v32, %s7773_s0  ;;  %3681 = vrot.lane.b32.xlu1 %v6825_v22, %s7772_s29 }
 0x972   : > { %3719 = vrot.lane.b32.xlu0 %v6871_v35, %s7768_s24  ;;  %3661 = vrot.lane.b32.xlu1 %v6840_v14, %s7767_s22 }
 0x976   : > { %3701 = vrot.lane.b32.xlu0 %v6871_v35, %s7770_s26  ;;  %3669 = vrot.lane.b32.xlu1 %v6780_v32, %s7767_s22 }
 0x97a   : > { %3683 = vrot.lane.b32.xlu0 %v6871_v35, %s7772_s29  ;;  %3663 = vrot.lane.b32.xlu1 %v6825_v22, %s7767_s22 }
 0x97e   : > { %3665 = vrot.lane.b32.xlu0 %v6871_v35, %s7767_s22  ;;  %3787 = vrot.lane.b32.xlu1 %v6840_v14, %s7773_s0 }
 0x982   : > { %3789 = vrot.lane.b32.xlu0 %v6825_v22, %s7773_s0  ;;  %3791 = vrot.lane.b32.xlu1 %v6871_v35, %s7773_s0 }
 0x986   : > { %3785 = vrot.lane.b32.xlu0 %v6814_v57, %s7773_s0  ;;  %3793 = vrot.lane.b32.xlu1 %v6799_v44, %s7773_s0 }
 0x98a   : > { %3805 = vperm.xlu0 %5506, %v5275_v36   ;;  %3810 = vperm.xlu1 %5507, %v5276_v63  }
 0x98e   : > { %4155 = vperm.xlu0 %5506, %v5286_v39   ;;  %3983 = vperm.xlu1 %5507, %v5282_v37  }
 0x992   : > { %4150 = vperm.xlu1 %5507, %v5285_v59  }
 0x99c   : > { %v6933_v11 = vpop.permute.xlu1 %3723  ;;  %v3778_v53 = vpop.permute.xlu0 %3777 }
 0x9a0   : > { %v6935_v9 = vpop.permute.xlu1 %3705  ;;  %v3760_v41 = vpop.permute.xlu0 %3759 }
 0x9a4   : > { %v6937_v27 = vpop.permute.xlu1 %3687  ;;  %v6939_v56 = vpop.permute.xlu0 %3741 }
 0x9a8   : > { %v3776_v29 = vpop.permute.xlu1 %3775  ;;  %v6941_v6 = vpop.permute.xlu0 %3721 }
 0x9ac   : > { %v3758_v8 = vpop.permute.xlu1 %3757  ;;  %v6943_v12 = vpop.permute.xlu0 %3703 }
 0x9b0   : > { %v6945_v62 = vpop.permute.xlu1 %3739  ;;  %v3768_v2 = vpop.permute.xlu0 %3767 }
 0x9b1   : > { %v3783_v54 = vsel %vm703_vm13, %v3776_v29, %v3768_v2 }
 0x9b4   : > { %v6947_v43 = vpop.permute.xlu1 %3717  ;;  %v3750_v50 = vpop.permute.xlu0 %3749 }
 0x9b5   : > { %v3765_v13 = vsel %vm693_vm12, %v3758_v8, %v3750_v50 }
 0x9b8   : > { %v6949_v20 = vpop.permute.xlu1 %3699  ;;  %v6951_v23 = vpop.permute.xlu0 %3731 }
 0x9b9   : > { %v3747_v42 = vsel %vm683_vm11, %v6945_v62, %v6951_v23 }
 0x9bc   : > { %v6953_v40 = vpop.permute.xlu0 %3713  ;;  %v3770_v34 = vpop.permute.xlu1 %3769 }
 0x9bd   : > { %v3784_v55 = vsel %vm703_vm13, %v3778_v53, %v3770_v34 }
 0x9be   : > { %3897 = vmatpush1.msra.mxu1 %v3784_v55 }
 0x9bf   : > { %3898 = vmatprep.subr.mxu1 %v5540_v28 }
 0x9c0   : > { %v6960_v19 = vpop.permute.xlu0 %3695  ;;  %3899 = vmatpush1.msra.mxu1 %v3783_v54  ;;  %v3752_v15 = vpop.permute.xlu1 %3751 }
 0x9c1   : > { %3900 = vmatprep.subr.mxu1 %v5540_v28  ;;  %v3766_v7 = vsel %vm693_vm12, %v3760_v41, %v3752_v15 }
 0x9c2   : > { %3901 = vmatpush1.msra.mxu1 %v3766_v7 }
 0x9c3   : > { %3902 = vmatprep.subr.mxu1 %v5540_v28 }
 0x9c4   : > { %v6968_v60 = vpop.permute.xlu0 %3677  ;;  %3903 = vmatpush1.msra.mxu1 %v3765_v13  ;;  %v3734_v0 = vpop.permute.xlu1 %3733 }
 0x9c5   : > { %3904 = vmatprep.subr.mxu1 %v5540_v28  ;;  %v3748_v1 = vsel %vm683_vm11, %v6939_v56, %v3734_v0 }
 0x9c6   : > { %3905 = vmatpush1.msra.mxu1 %v3748_v1 }
 0x9c7   : > { %3906 = vmatprep.subr.mxu1 %v5540_v28 }
 0x9c8   : > { %v3772_v18 = vpop.permute.xlu0 %3771  ;;  %3907 = vmatpush1.msra.mxu1 %v3747_v42  ;;  %v3716_v25 = vpop.permute.xlu1 %3715 }
 0x9c9   : > { %3908 = vmatprep.subr.mxu1 %v5540_v28  ;;  %v3781_v36 = vsel %vm703_vm13, %v3768_v2, %v3772_v18 }
 0x9ca   : > { %3909 = vmatpush1.msra.mxu1 %v6780_v32 }
 0x9cb   : > { %3910 = vmatprep.subr.mxu1 %v5540_v28 }
 0x9cc   : > { %v3754_v45 = vpop.permute.xlu0 %3753  ;;  %3911 = vmatpush1.msra.mxu1 %v6799_v44  ;;  %v6983_v26 = vpop.permute.xlu1 %3697  ;;  %v3779_v44 = vsel %vm703_vm13, %v3772_v18, %v3776_v29 }
 0x9cd   : > { %3912 = vmatprep.subr.mxu1 %v5540_v28  ;;  %v3761_v37 = vsel %vm693_vm12, %v3754_v45, %v3758_v8  ;;  %v3763_v29 = vsel %vm693_vm12, %v3750_v50, %v3754_v45  ;;  %v3712_v13 = vsel %vm663_vm9, %v6935_v9, %v6983_v26 }
 0x9d0   : > { %v3736_v52 = vpop.permute.xlu0 %3735  ;;  %v6986_v61 = vpop.permute.xlu1 %3679 }
 0x9d1   : > { %v3743_v8 = vsel %vm683_vm11, %v3736_v52, %v6945_v62  ;;  %v3745_v50 = vsel %vm683_vm11, %v6951_v23, %v3736_v52  ;;  %v3694_v18 = vsel %vm653_vm5, %v6937_v27, %v6986_v61 }
 0x9d4   : > { %v6988_v4 = vpop.permute.xlu0 %3685  ;;  %v3774_v10 = vpop.permute.xlu1 %3773 }
 0x9d5   : > { %v3780_v24 = vsel %vm703_vm13, %v3774_v10, %v3778_v53  ;;  %v3782_v32 = vsel %vm703_vm13, %v3770_v34, %v3774_v10 }
 0x9d6   : > { %3819 = vmatprep.subr.mxu0 %v3780_v24 }
 0x9d7   : > { %3820 = vmatpush1.msra.mxu0 %v3782_v32 }
 0x9d8   : > { %v6996_v33 = vpop.permute.xlu0 %3659  ;;  %3821 = vmatprep.subr.mxu0 %v3779_v44  ;;  %v3756_v58 = vpop.permute.xlu1 %3755 }
 0x9d9   : > { %3822 = vmatpush1.msra.mxu0 %v3781_v36  ;;  %v3762_v63 = vsel %vm693_vm12, %v3756_v58, %v3760_v41  ;;  %v3764_v39 = vsel %vm693_vm12, %v3752_v15, %v3756_v58 }
 0x9da   : > { %3823 = vmatprep.subr.mxu0 %v3762_v63 }
 0x9db   : > { %3824 = vmatpush1.msra.mxu0 %v3764_v39  ;;  %v5271_v39 = vld [vmem:[%s7717_s8 + $0x40] sm:$0xff] }
 0x9dc   : > { %v7006_v59 = vpop.permute.xlu0 %3667  ;;  %3825 = vmatprep.subr.mxu0 %v3761_v37  ;;  %v3738_v53 = vpop.permute.xlu1 %3737 }
 0x9dd   : > { %3826 = vmatpush1.msra.mxu0 %v3763_v29  ;;  %v3744_v41 = vsel %vm683_vm11, %v3738_v53, %v6939_v56  ;;  %v3746_v2 = vsel %vm683_vm11, %v3734_v0, %v3738_v53  ;;  %v3675_v32 = vsel %vm643_vm8, %v7006_v59, %v6996_v33  ;;  %v5274_v29 = vld [vmem:[%s7717_s8 + $0x58] sm:$0xff] }
 0x9de   : > { %3827 = vmatprep.subr.mxu0 %v3744_v41  ;;  %v5273_v41 = vld [vmem:[%s7717_s8 + $0x50] sm:$0xff] }
 0x9df   : > { %3828 = vmatpush1.msra.mxu0 %v3746_v2 }
 0x9e0   : > { %v7018_v34 = vpop.permute.xlu0 %3795  ;;  %3829 = vmatprep.subr.mxu0 %v3743_v8  ;;  %v3682_v55 = vpop.permute.xlu1 %3681 }
 0x9e1   : > { %3830 = vmatpush1.msra.mxu0 %v3745_v50 }
 0x9e2   : > { %3831 = vmatprep.subr.mxu0 %v6871_v35  ;;  %v3730_v35 = vsel %vm673_vm10, %v6933_v11, %v3716_v25 }
 0x9e3   : > { %3832 = vmatpush1.msra.mxu0 %v6840_v14 }
 0x9e4   : > { %v3720_v56 = vpop.permute.xlu0 %3719  ;;  %3833 = vmatprep.subr.mxu0 %v6825_v22  ;;  %v3662_v54 = vpop.permute.xlu1 %3661  ;;  %v3727_v22 = vsel %vm673_vm10, %v6953_v40, %v6947_v43 }
 0x9e5   : > { %v3726_v62 = vsel %vm673_vm10, %v3720_v56, %v6933_v11  ;;  %3834 = vmatpush1.msra.mxu0 %v6814_v57  ;;  %v3728_v15 = vsel %vm673_vm10, %v3716_v25, %v3720_v56  ;;  %v3725_v57 = vsel %vm673_vm10, %v6947_v43, %v6941_v6  ;;  %v3729_v11 = vsel %vm673_vm10, %v6941_v6, %v6953_v40 }
 0x9e6   : > { %3835 = vmatprep.subr.mxu0 %v3728_v15  ;;  %3913 = vmatpush1.msra.mxu1 %v3726_v62  ;;  %v3709_v6 = vsel %vm663_vm9, %v6960_v19, %v6949_v20  ;;  %v3707_v40 = vsel %vm663_vm9, %v6949_v20, %v6943_v12 }
 0x9e7   : > { %3836 = vmatpush1.msra.mxu0 %v3730_v35  ;;  %3914 = vmatprep.subr.mxu1 %v5540_v28 }
 0x9e8   : > { %v3702_v14 = vpop.permute.xlu0 %3701  ;;  %3837 = vmatprep.subr.mxu0 %v3727_v22  ;;  %3915 = vmatpush1.msra.mxu1 %v3725_v57  ;;  %v3670_v23 = vpop.permute.xlu1 %3669 }
 0x9e9   : > { %v3708_v7 = vsel %vm663_vm9, %v3702_v14, %v6935_v9  ;;  %3838 = vmatpush1.msra.mxu0 %v3729_v11  ;;  %3916 = vmatprep.subr.mxu1 %v5540_v28  ;;  %v3710_v43 = vsel %vm663_vm9, %v6983_v26, %v3702_v14  ;;  %v3711_v9 = vsel %vm663_vm9, %v6943_v12, %v6960_v19 }
 0x9ea   : > { %3839 = vmatprep.subr.mxu0 %v3710_v43  ;;  %3917 = vmatpush1.msra.mxu1 %v3708_v7  ;;  %v3691_v12 = vsel %vm653_vm5, %v6968_v60, %v3682_v55  ;;  %v3689_v19 = vsel %vm653_vm5, %v3682_v55, %v6988_v4 }
 0x9eb   : > { %3840 = vmatpush1.msra.mxu0 %v3712_v13  ;;  %3918 = vmatprep.subr.mxu1 %v5540_v28 }
 0x9ec   : > { %v3684_v0 = vpop.permute.xlu0 %3683  ;;  %3841 = vmatprep.subr.mxu0 %v3709_v6  ;;  %3919 = vmatpush1.msra.mxu1 %v3707_v40  ;;  %v3664_v1 = vpop.permute.xlu1 %3663  ;;  %v5281_v6 = vld [vmem:[%s7719_s10 + $0x10] sm:$0xff] }
 0x9ed   : > { %v3690_v42 = vsel %vm653_vm5, %v3684_v0, %v6937_v27  ;;  %3842 = vmatpush1.msra.mxu0 %v3711_v9  ;;  %3920 = vmatprep.subr.mxu1 %v5540_v28  ;;  %v3692_v20 = vsel %vm653_vm5, %v6986_v61, %v3684_v0  ;;  %v3693_v27 = vsel %vm653_vm5, %v6988_v4, %v6968_v60 }
 0x9ee   : > { %3843 = vmatprep.subr.mxu0 %v3692_v20  ;;  %3921 = vmatpush1.msra.mxu1 %v3690_v42  ;;  %v3676_v61 = vsel %vm643_vm8, %v3670_v23, %v3662_v54  ;;  %v3671_v10 = vsel %vm643_vm8, %v3664_v1, %v7006_v59  ;;  %v3673_v60 = vsel %vm643_vm8, %v6996_v33, %v3664_v1 }
 0x9ef   : > { %3844 = vmatpush1.msra.mxu0 %v3694_v18  ;;  %3922 = vmatprep.subr.mxu1 %v5540_v28 }
 0x9f0   : > { %v3666_v25 = vpop.permute.xlu0 %3665  ;;  %3845 = vmatprep.subr.mxu0 %v3691_v12  ;;  %3923 = vmatpush1.msra.mxu1 %v3689_v19  ;;  %v3788_v45 = vpop.permute.xlu1 %3787 }
 0x9f1   : > { %v3672_v26 = vsel %vm643_vm8, %v3666_v25, %v3670_v23  ;;  %3846 = vmatpush1.msra.mxu0 %v3693_v27  ;;  %3924 = vmatprep.subr.mxu1 %v5540_v28  ;;  %v3674_v52 = vsel %vm643_vm8, %v3662_v54, %v3666_v25  ;;  %v3802_v44 = vsel %vm7750_vm14, %v7018_v34, %v3788_v45  ;;  %v5288_v27 = vld [vmem:[%s7715_s6 + $0x38] sm:$0xff] }
 0x9f2   : > { %3847 = vmatprep.subr.mxu0 %v3674_v52  ;;  %3925 = vmatpush1.msra.mxu1 %v3672_v26 }
 0x9f3   : > { %3848 = vmatpush1.msra.mxu0 %v3676_v61  ;;  %3926 = vmatprep.subr.mxu1 %v5540_v28 }
 0x9f4   : > { %v3790_v4 = vpop.permute.xlu0 %3789  ;;  %3849 = vmatprep.subr.mxu0 %v3673_v60  ;;  %3927 = vmatpush1.msra.mxu1 %v3671_v10  ;;  %v3792_v24 = vpop.permute.xlu1 %3791 }
 0x9f5   : > { %v3800_v58 = vsel %vm7750_vm14, %v3788_v45, %v3792_v24  ;;  %3850 = vmatpush1.msra.mxu0 %v3675_v32  ;;  %3956 = vmatprep.subr.mxu1 %v5540_v28  ;;  %v3798_v36 = vsel %vm7750_vm14, %v3792_v24, %v7018_v34 }
 0x9f6   : > { %3879 = vmatprep.subr.mxu0 %v3798_v36  ;;  %3957 = vmatpush2.msra.mxu1 %v3802_v44 }
 0x9f7   : > { %3880 = vmatpush2.msra.mxu0 %v3800_v58  ;;  %3958 = vmatprep.subr.mxu1 %v5540_v28 }
 0x9f8   : > { %v3786_v33 = vpop.permute.xlu0 %3785  ;;  %v3794_v63 = vpop.permute.xlu1 %3793 }
 0x9f9   : > { %v3799_v37 = vsel %vm7750_vm14, %v3786_v33, %v3790_v4  ;;  %v3801_v59 = vsel %vm7750_vm14, %v3794_v63, %v3786_v33  ;;  %v3797_v53 = vsel %vm7750_vm14, %v3790_v4, %v3794_v63 }
 0x9fa   : > { %3881 = vmatprep.subr.mxu0 %v3797_v53  ;;  %3959 = vmatpush2.msra.mxu1 %v3801_v59 }
 0x9fb   : > { %3882 = vmatpush2.msra.mxu0 %v3799_v37  ;;  %3961 = vmatmul.mubr.f32.vlgmr.msra.gmra.mxu1 %v5271_v39 }
 0x9fc   : > { %3884 = vmatmul.mubr.f32.vlgmr.msra.gmra.mxu0 %v5271_v39  ;;  %5280 = vmatprep.mubr.msk.f32.mxu1 %vm2481_vm0, %v5274_v29 }
 0x9fd   : > { %5278 = vmatprep.mubr.msk.f32.mxu0 %vm2481_vm0, %v5274_v29  ;;  %5437 = vmatprep.subr.mxu1 %v5540_v28 }
 0x9ff   : > { %3966 = vmatmul.mubr.f32.gmra.mxu1 %v5273_v41 }
 0xa00   : > { %3890 = vmatmul.mubr.f32.gmra.mxu0 %v5273_v41  ;;  %5441 = vmatprep.mubr.msk.f32.mxu1 %vm7774_vm3, %v5540_v28 }
 0xa01   : > { %4053 = vmatprep.mubr.f32.mxu0 %v5540_v28 }
 0xa05   : > { %v3806_v55 = vpop.permute.xlu0 %3805  ;;  %v3811_v56 = vpop.permute.xlu1 %3810 }
 0xabb   : > { %v3962_v2 = vpop.f32.mrf.mxu1 }
 0xabc   : > { %v3885_v8 = vpop.f32.mrf.mxu0  ;;  %v3963_v62 = vadd.f32 %v3962_v2, %v3806_v55 }
 0xabd   : > { %v3964_v34 = vpop.f32.mrf.mxu1  ;;  %v3886_v13 = vadd.f32 %v3885_v8, %v3806_v55 }
 0xabe   : > { %v3887_v50 = vpop.f32.mrf.mxu0  ;;  %v3973_v43 = vadd.f32 %v3963_v62, %v6790_v51  ;;  %v4813_v62 = vld [vmem:[%s7721_s12] sm:$0xff] }
 0xabf   : > { %v3967_v54 = vpop.f32.mrf.mxu1  ;;  %v3888_v11 = vadd.f32 %v3887_v50, %v3806_v55  ;;  %v3971_v51 = vadd.f32 %v3886_v13, %v6805_v5  ;;  %v5294_v55 = vld [vmem:[%s7717_s8 + $0x68] sm:$0xff]  ;;  %v5298_v50 = vld [vmem:[%s7718_s9 + $0x38] sm:$0xff] }
 0xac0   : > { %v3968_v15 = vadd.f32 %v3967_v54, %v3811_v56  ;;  %v3891_v35 = vpop.f32.mrf.mxu0  ;;  %v5304_v54 = vld [vmem:[%s7720_s11 + $0x18] sm:$0xff] }
 0xac1   : > { %v3969_v22 = vpop.f32.mrf.mxu1  ;;  %v3892_v14 = vadd.f32 %v3891_v35, %v3811_v56 }
 0xac2   : > { %v3976_v57 = vadd.f32 %v3968_v15, %v6775_v38  ;;  %v3893_v23 = vpop.f32.mrf.mxu0  ;;  %v3972_v38 = vadd.f32 %v3888_v11, %v6816_v3  ;;  %v4822_v15 = vld [vmem:[%s7722_s13] sm:$0xff] }
 0xac3   : > { %v3894_v7 = vadd.f32 %v3893_v23, %v3811_v56  ;;  %v3974_v0 = vadd.f32 %v3892_v14, %v6831_v31  ;;  %v3984_v31 = vpop.permute.xlu1 %3983  ;;  %v5297_v56 = vld [vmem:[%s7718_s9 + $0x30] sm:$0xff] }
 0xac4   : > { %5438 = vmatpush3.msra.mxu1 %v3976_v57 }
 0xac5   : > { %v3975_v40 = vadd.f32 %v3894_v7, %v6862_v21  ;;  %5439 = vmatprep.subr.mxu1 %v5540_v28  ;;  %v5287_v21 = vld [vmem:[%s7715_s6 + $0x30] sm:$0xff] }
 0xac6   : > { %5440 = vmatpush3.msra.mxu1 %v3973_v43 }
 0xac7   : > { %4017 = vmatprep.subr.mxu0 %v3975_v40  ;;  %5442 = vmatmul.mubr.msk.f32.vlgmr.msra.gmra.mxu1 %vm2481_vm0, %v5281_v6  ;;  %v4151_v32 = vpop.permute.xlu1 %4150 }
 0xac8   : > { %4018 = vmatpush1.msra.mxu0 %v3974_v0  ;;  %5446 = vmatprep.mubr.msk.f32.mxu1 %vm2156_vm15, %v5287_v21 }
 0xac9   : > { %4019 = vmatprep.subr.mxu0 %v3972_v38 }
 0xaca   : > { %4020 = vmatpush1.msra.mxu0 %v3971_v51 }
 0xacb   : > { %5283 = vmatmul.mubr.msk.f32.vlgmr.msra.gmra.mxu0 %vm2481_vm0, %v5281_v6 }
 0xacc   : > { %4228 = vmatprep.mubr.f32.mxu0 %v5540_v28 }
 0xb87   : > { %v4126_v3 = vpop.f32.mrf.mxu1 }
 0xb88   : > { %v4127_v1 = vadd.f32 %v4126_v3, %v3984_v31 }
 0xb89   : > { %v5443_v9 = vpop.f32.mrf.mxu1 }
 0xb8a   : > { %v4132_v42 = vadd.f32 %v4127_v1, %v6755_v49 }
 0xb8b   : > { %v4055_v5 = vpop.f32.mrf.mxu0 }
 0xb8c   : > { %v4056_v20 = vadd.f32 %v4055_v5, %v3984_v31  ;;  %vm4135_vm6 = vcmp.ge.f32.partialorder %v4132_v42, 0.0  ;;  %v4138_v18 = vmul.f32 0.1, %v4132_v42 }
 0xb8d   : > { %v4057_v12 = vpop.f32.mrf.mxu0 }
 0xb8e   : > { %v4130_v19 = vadd.f32 %v4056_v20, %v6768_v48  ;;  %v4058_v25 = vadd.f32 %v4057_v12, %v3984_v31  ;;  %v7162_v45 = vsel %vm4135_vm6, %v4132_v42, %v4138_v18 }
 0xb8f   : > { %5444 = vmatprep.subr.mxu1 %v7162_v45 }
 0xb90   : > { %v4131_v26 = vadd.f32 %v4058_v25, %v6765_v46  ;;  %5445 = vmatpush3.msra.mxu1 %v7162_v45  ;;  %v4136_v49 = vmul.f32 0.1, %v4130_v19  ;;  %vm4133_vm14 = vcmp.ge.f32.partialorder %v4130_v19, 0.0  ;;  %v4156_v46 = vpop.permute.xlu0 %4155 }
 0xb91   : > { %5447 = vmatmul.mubr.msk.f32.vlgmr.msra.gmra.mxu1 %vm2156_vm15, %v5288_v27  ;;  %4567 = vmatprep.subr.mxu1 %v5540_v28 }
 0xb92   : > { %vm4134_vm7 = vcmp.ge.f32.partialorder %v4131_v26, 0.0  ;;  %v4137_v48 = vmul.f32 0.1, %v4131_v26  ;;  %v7175_v61 = vsel %vm4133_vm14, %v4130_v19, %v4136_v49  ;;  %5301 = vmatprep.mubr.msk.f32.mxu1 %vm2481_vm0, %v5294_v55  ;;  %vm7775_vm14 = vcmp.lt.s32.totalorder %v5777_v47, 109 }
 0xb93   : > { %vm7777_vm6 = vmmov %vm7775_vm14 }
 0xb94   : > { %v7172_v52 = vsel %vm4134_vm7, %v4131_v26, %v4137_v48  ;;  %vm7778_vm7 = vmmov %vm7777_vm6 }
 0xb95   : > { %4194 = vmatprep.subr.mxu0 %v7172_v52 }
 0xb96   : > { %4195 = vmatpush1.msra.mxu0 %v7175_v61 }
 0xb97   : > { %5289 = vmatmul.mubr.msk.f32.vlgmr.msra.gmra.mxu0 %vm2156_vm15, %v5287_v21 }
 0xb98   : > { %4234 = vmatprep.mubr.f32.mxu0 %v5540_v28 }
 0xb9b   : > { %5290 = vmatmul.mubr.msk.f32.gmra.mxu0 %vm2156_vm15, %v5288_v27  ;;  %vm7776_vm15 = vmmov %vm7775_vm14 }
 0xb9c   : > { %5299 = vmatprep.mubr.msk.f32.mxu0 %vm2481_vm0, %v5294_v55 }
 0xc51   : > { %v5448_v10 = vpop.f32.mrf.mxu1 }
 0xc52   : > { %v7181_v60 = vadd.f32 %v5448_v10, %v4156_v46 }
 0xc53   : > { %v4307_v24 = vpop.f32.mrf.mxu1 }
 0xc54   : > { %v7186_v4 = vsel %vm626_vm2, %v4156_v46, %v7181_v60  ;;  %v7196_v44 = vadd.f32 %v4307_v24, %v4151_v32 }
 0xc55   : > { %4394 = vrot.lane.b32.xlu0 %v7186_v4, %s7768_s24  ;;  %4448 = vrot.lane.b32.xlu1 %v7186_v4, %s7769_s25 }
 0xc56   : > { %v7205_v58 = vsel %vm626_vm2, %v4151_v32, %v7196_v44 }
 0xc57   : > { %v4230_v36 = vpop.f32.mrf.mxu0 }
 0xc58   : > { %v7211_v33 = vadd.f32 %v4230_v36, %v4151_v32 }
 0xc59   : > { %4376 = vrot.lane.b32.xlu0 %v7186_v4, %s7770_s26  ;;  %4430 = vrot.lane.b32.xlu1 %v7186_v4, %s7771_s19  ;;  %v4232_v63 = vpop.f32.mrf.mxu0 }
 0xc5a   : > { %v7220_v39 = vsel %vm624_vm1, %v4151_v32, %v7211_v33  ;;  %v7222_v37 = vadd.f32 %v4232_v63, %v4151_v32 }
 0xc5b   : > { %v4236_v53 = vpop.f32.mrf.mxu0 }
 0xc5c   : > { %v7231_v59 = vsel %vm625_vm4, %v4151_v32, %v7222_v37  ;;  %v7237_v29 = vadd.f32 %v4236_v53, %v4156_v46 }
 0xc5d   : > { %4358 = vrot.lane.b32.xlu0 %v7186_v4, %s7772_s29  ;;  %4412 = vrot.lane.b32.xlu1 %v7186_v4, %s7766_s30  ;;  %v4238_v2 = vpop.f32.mrf.mxu0 }
 0xc5e   : > { %v7246_v41 = vsel %vm624_vm1, %v4156_v46, %v7237_v29  ;;  %v7268_v8 = vadd.f32 %v4238_v2, %v4156_v46 }
 0xc60   : > { %v7277_v34 = vsel %vm625_vm4, %v4156_v46, %v7268_v8 }
 0xc61   : > { %4392 = vrot.lane.b32.xlu1 %v7205_v58, %s7768_s24  ;;  %4446 = vrot.lane.b32.xlu0 %v7205_v58, %s7769_s25 }
 0xc65   : > { %4374 = vrot.lane.b32.xlu1 %v7205_v58, %s7770_s26  ;;  %4428 = vrot.lane.b32.xlu0 %v7205_v58, %s7771_s19 }
 0xc69   : > { %4410 = vrot.lane.b32.xlu0 %v7205_v58, %s7766_s30  ;;  %4438 = vrot.lane.b32.xlu1 %v7220_v39, %s7769_s25 }
 0xc6d   : > { %4388 = vrot.lane.b32.xlu0 %v7231_v59, %s7768_s24  ;;  %4420 = vrot.lane.b32.xlu1 %v7220_v39, %s7771_s19 }
 0xc71   : > { %4370 = vrot.lane.b32.xlu0 %v7231_v59, %s7770_s26  ;;  %4402 = vrot.lane.b32.xlu1 %v7220_v39, %s7766_s30 }
 0xc75   : > { %4440 = vrot.lane.b32.xlu0 %v7246_v41, %s7769_s25  ;;  %4384 = vrot.lane.b32.xlu1 %v7220_v39, %s7768_s24 }
 0xc79   : > { %4422 = vrot.lane.b32.xlu0 %v7246_v41, %s7771_s19  ;;  %4366 = vrot.lane.b32.xlu1 %v7220_v39, %s7770_s26 }
 0xc7d   : > { %4404 = vrot.lane.b32.xlu0 %v7246_v41, %s7766_s30  ;;  %4348 = vrot.lane.b32.xlu1 %v7220_v39, %s7772_s29 }
 0xc81   : > { %4386 = vrot.lane.b32.xlu0 %v7246_v41, %s7768_s24  ;;  %4442 = vrot.lane.b32.xlu1 %v7231_v59, %s7769_s25 }
 0xc85   : > { %4368 = vrot.lane.b32.xlu0 %v7246_v41, %s7770_s26  ;;  %4424 = vrot.lane.b32.xlu1 %v7231_v59, %s7771_s19 }
 0xc89   : > { %4350 = vrot.lane.b32.xlu0 %v7246_v41, %s7772_s29  ;;  %4406 = vrot.lane.b32.xlu1 %v7231_v59, %s7766_s30 }
 0xc8d   : > { %4444 = vrot.lane.b32.xlu0 %v7277_v34, %s7769_s25  ;;  %4356 = vrot.lane.b32.xlu1 %v7205_v58, %s7772_s29 }
 0xc91   : > { %4426 = vrot.lane.b32.xlu0 %v7277_v34, %s7771_s19  ;;  %4330 = vrot.lane.b32.xlu1 %v7220_v39, %s7767_s22 }
 0xc95   : > { %4408 = vrot.lane.b32.xlu0 %v7277_v34, %s7766_s30  ;;  %4338 = vrot.lane.b32.xlu1 %v7205_v58, %s7767_s22 }
 0xc99   : > { %4352 = vrot.lane.b32.xlu0 %v7231_v59, %s7772_s29  ;;  %4466 = vrot.lane.b32.xlu1 %v7186_v4, %s7773_s0 }
 0xc9d   : > { %4332 = vrot.lane.b32.xlu0 %v7246_v41, %s7767_s22  ;;  %4390 = vrot.lane.b32.xlu1 %v7277_v34, %s7768_s24 }
 0xca1   : > { %4340 = vrot.lane.b32.xlu0 %v7186_v4, %s7767_s22  ;;  %4372 = vrot.lane.b32.xlu1 %v7277_v34, %s7770_s26 }
 0xca5   : > { %4334 = vrot.lane.b32.xlu0 %v7231_v59, %s7767_s22  ;;  %4354 = vrot.lane.b32.xlu1 %v7277_v34, %s7772_s29 }
 0xca9   : > { %4458 = vrot.lane.b32.xlu0 %v7246_v41, %s7773_s0  ;;  %4336 = vrot.lane.b32.xlu1 %v7277_v34, %s7767_s22 }
 0xcad   : > { %4462 = vrot.lane.b32.xlu0 %v7277_v34, %s7773_s0  ;;  %4460 = vrot.lane.b32.xlu1 %v7231_v59, %s7773_s0 }
 0xcb1   : > { %4464 = vrot.lane.b32.xlu0 %v7205_v58, %s7773_s0  ;;  %4456 = vrot.lane.b32.xlu1 %v7220_v39, %s7773_s0 }
 0xcb5   : > { %4481 = vperm.xlu0 %5506, %v5298_v50   ;;  %4476 = vperm.xlu1 %5507, %v5297_v56  }
 0xcb9   : > { %4654 = vperm.xlu0 %5506, %v5304_v54   ;;  %4816 = vperm.xlu1 %5507, %v4813_v62  }
 0xcbd   : > { %4825 = vperm.xlu0 %5506, %v4822_v15  }
 0xcc7   : > { %v7339_v35 = vpop.permute.xlu0 %4394  ;;  %v4449_v22 = vpop.permute.xlu1 %4448 }
 0xccb   : > { %v7341_v57 = vpop.permute.xlu0 %4376  ;;  %v4431_v14 = vpop.permute.xlu1 %4430 }
 0xccf   : > { %v7343_v23 = vpop.permute.xlu0 %4358  ;;  %v7345_v11 = vpop.permute.xlu1 %4412 }
 0xcd3   : > { %v4447_v7 = vpop.permute.xlu0 %4446  ;;  %v7347_v43 = vpop.permute.xlu1 %4392 }
 0xcd7   : > { %v4429_v13 = vpop.permute.xlu0 %4428  ;;  %v7349_v6 = vpop.permute.xlu1 %4374 }
 0xcdb   : > { %v7351_v40 = vpop.permute.xlu0 %4410  ;;  %v4439_v0 = vpop.permute.xlu1 %4438 }
 0xcdc   : > { %v4454_v42 = vsel %vm703_vm13, %v4447_v7, %v4439_v0 }
 0xcdf   : > { %v7353_v38 = vpop.permute.xlu0 %4388  ;;  %v4421_v51 = vpop.permute.xlu1 %4420 }
 0xce0   : > { %v4436_v12 = vsel %vm693_vm12, %v4429_v13, %v4421_v51 }
 0xce3   : > { %v7355_v21 = vpop.permute.xlu0 %4370  ;;  %v7357_v31 = vpop.permute.xlu1 %4402 }
 0xce4   : > { %v4418_v26 = vsel %vm683_vm11, %v7351_v40, %v7357_v31 }
 0xce7   : > { %v4441_v3 = vpop.permute.xlu0 %4440  ;;  %v7359_v1 = vpop.permute.xlu1 %4384 }
 0xce8   : > { %v4455_v9 = vsel %vm703_vm13, %v4449_v22, %v4441_v3 }
 0xce9   : > { %4568 = vmatpush1.msra.mxu1 %v4455_v9 }
 0xcea   : > { %4569 = vmatprep.subr.mxu1 %v5540_v28 }
 0xceb   : > { %v4423_v5 = vpop.permute.xlu0 %4422  ;;  %4570 = vmatpush1.msra.mxu1 %v4454_v42  ;;  %v7366_v20 = vpop.permute.xlu1 %4366 }
 0xcec   : > { %v4437_v18 = vsel %vm693_vm12, %v4431_v14, %v4423_v5  ;;  %4571 = vmatprep.subr.mxu1 %v5540_v28 }
 0xced   : > { %4572 = vmatpush1.msra.mxu1 %v4437_v18 }
 0xcee   : > { %4573 = vmatprep.subr.mxu1 %v5540_v28 }
 0xcef   : > { %v4405_v19 = vpop.permute.xlu0 %4404  ;;  %4574 = vmatpush1.msra.mxu1 %v4436_v12  ;;  %v7374_v25 = vpop.permute.xlu1 %4348  ;;  %v4380_v12 = vsel %vm663_vm9, %v7366_v20, %v7355_v21 }
 0xcf0   : > { %v4419_v27 = vsel %vm683_vm11, %v7345_v11, %v4405_v19  ;;  %4575 = vmatprep.subr.mxu1 %v5540_v28 }
 0xcf1   : > { %4576 = vmatpush1.msra.mxu1 %v4419_v27 }
 0xcf2   : > { %4577 = vmatprep.subr.mxu1 %v5540_v28 }
 0xcf3   : > { %v4387_v49 = vpop.permute.xlu0 %4386  ;;  %4578 = vmatpush1.msra.mxu1 %v4418_v26  ;;  %v4443_v48 = vpop.permute.xlu1 %4442 }
 0xcf4   : > { %4579 = vmatprep.subr.mxu1 %v5540_v28  ;;  %v4452_v2 = vsel %vm703_vm13, %v4439_v0, %v4443_v48 }
 0xcf5   : > { %4580 = vmatpush1.msra.mxu1 %v7186_v4 }
 0xcf6   : > { %4581 = vmatprep.subr.mxu1 %v5540_v28 }
 0xcf7   : > { %v7388_v46 = vpop.permute.xlu0 %4368  ;;  %4582 = vmatpush1.msra.mxu1 %v7205_v58  ;;  %v4425_v10 = vpop.permute.xlu1 %4424  ;;  %v4450_v58 = vsel %vm703_vm13, %v4443_v48, %v4447_v7 }
 0xcf8   : > { %4583 = vmatprep.subr.mxu1 %v5540_v28  ;;  %v4432_v62 = vsel %vm693_vm12, %v4425_v10, %v4429_v13  ;;  %v4434_v15 = vsel %vm693_vm12, %v4421_v51, %v4425_v10 }
 0xcfb   : > { %v7392_v24 = vpop.permute.xlu0 %4350  ;;  %v4407_v32 = vpop.permute.xlu1 %4406 }
 0xcfc   : > { %v4414_v13 = vsel %vm683_vm11, %v4407_v32, %v7351_v40  ;;  %v4416_v51 = vsel %vm683_vm11, %v7357_v31, %v4407_v32 }
 0xcff   : > { %v4445_v36 = vpop.permute.xlu0 %4444  ;;  %v7394_v63 = vpop.permute.xlu1 %4356 }
 0xd00   : > { %v4453_v53 = vsel %vm703_vm13, %v4441_v3, %v4445_v36  ;;  %v4451_v4 = vsel %vm703_vm13, %v4445_v36, %v4449_v22  ;;  %v4364_v48 = vsel %vm653_vm5, %v7394_v63, %v7374_v25 }
 0xd01   : > { %4490 = vmatprep.subr.mxu0 %v4451_v4 }
 0xd02   : > { %4491 = vmatpush1.msra.mxu0 %v4453_v53 }
 0xd03   : > { %v4427_v55 = vpop.permute.xlu0 %4426  ;;  %4492 = vmatprep.subr.mxu0 %v4450_v58  ;;  %v7404_v50 = vpop.permute.xlu1 %4330 }
 0xd04   : > { %v4435_v56 = vsel %vm693_vm12, %v4423_v5, %v4427_v55  ;;  %4493 = vmatpush1.msra.mxu0 %v4452_v2  ;;  %v4433_v54 = vsel %vm693_vm12, %v4427_v55, %v4431_v14  ;;  %v4401_v5 = vsel %vm673_vm10, %v7339_v35, %v4387_v49 }
 0xd05   : > { %4494 = vmatprep.subr.mxu0 %v4433_v54  ;;  %v5293_v54 = vld [vmem:[%s7717_s8 + $0x60] sm:$0xff] }
 0xd06   : > { %4495 = vmatpush1.msra.mxu0 %v4435_v56 }
 0xd07   : > { %v4409_v22 = vpop.permute.xlu0 %4408  ;;  %4496 = vmatprep.subr.mxu0 %v4432_v62  ;;  %v7414_v7 = vpop.permute.xlu1 %4338 }
 0xd08   : > { %v4417_v0 = vsel %vm683_vm11, %v4405_v19, %v4409_v22  ;;  %4497 = vmatpush1.msra.mxu0 %v4434_v15  ;;  %v4415_v14 = vsel %vm683_vm11, %v4409_v22, %v7345_v11 }
 0xd09   : > { %4498 = vmatprep.subr.mxu0 %v4415_v14 }
 0xd0a   : > { %4499 = vmatpush1.msra.mxu0 %v4417_v0  ;;  %v5295_v0 = vld [vmem:[%s7717_s8 + $0x70] sm:$0xff] }
 0xd0b   : > { %v4353_v3 = vpop.permute.xlu0 %4352  ;;  %4500 = vmatprep.subr.mxu0 %v4414_v13  ;;  %v7427_v9 = vpop.permute.xlu1 %4466 }
 0xd0c   : > { %4501 = vmatpush1.msra.mxu0 %v4416_v51 }
 0xd0d   : > { %4502 = vmatprep.subr.mxu0 %v7277_v34 }
 0xd0e   : > { %4503 = vmatpush1.msra.mxu0 %v7246_v41  ;;  %v4400_v41 = vsel %vm673_vm10, %v7347_v43, %v7359_v1 }
 0xd0f   : > { %v4333_v11 = vpop.permute.xlu0 %4332  ;;  %4504 = vmatprep.subr.mxu0 %v7231_v59  ;;  %v4391_v42 = vpop.permute.xlu1 %4390  ;;  %v4396_v59 = vsel %vm673_vm10, %v7353_v38, %v7347_v43  ;;  %v4383_v43 = vsel %vm663_vm9, %v7341_v57, %v7388_v46 }
 0xd10   : > { %v4397_v40 = vsel %vm673_vm10, %v4391_v42, %v7339_v35  ;;  %4505 = vmatpush1.msra.mxu0 %v7220_v39  ;;  %v4399_v31 = vsel %vm673_vm10, %v4387_v49, %v4391_v42  ;;  %v4398_v39 = vsel %vm673_vm10, %v7359_v1, %v7353_v38  ;;  %v4378_v1 = vsel %vm663_vm9, %v7355_v21, %v7349_v6 }
 0xd11   : > { %4506 = vmatprep.subr.mxu0 %v4399_v31  ;;  %4584 = vmatpush1.msra.mxu1 %v4397_v40  ;;  %v4362_v49 = vsel %vm653_vm5, %v7374_v25, %v4353_v3 }
 0xd12   : > { %4507 = vmatpush1.msra.mxu0 %v4401_v5  ;;  %4585 = vmatprep.subr.mxu1 %v5540_v28 }
 0xd13   : > { %v4341_v34 = vpop.permute.xlu0 %4340  ;;  %4508 = vmatprep.subr.mxu0 %v4398_v39  ;;  %4586 = vmatpush1.msra.mxu1 %v4396_v59  ;;  %v4373_v35 = vpop.permute.xlu1 %4372 }
 0xd14   : > { %v4379_v18 = vsel %vm663_vm9, %v4373_v35, %v7341_v57  ;;  %4509 = vmatpush1.msra.mxu0 %v4400_v41  ;;  %4587 = vmatprep.subr.mxu1 %v5540_v28  ;;  %v4381_v38 = vsel %vm663_vm9, %v7388_v46, %v4373_v35  ;;  %v4382_v57 = vsel %vm663_vm9, %v7349_v6, %v7366_v20 }
 0xd15   : > { %4510 = vmatprep.subr.mxu0 %v4381_v38  ;;  %4588 = vmatpush1.msra.mxu1 %v4379_v18  ;;  %v4365_v6 = vsel %vm653_vm5, %v7343_v23, %v7392_v24  ;;  %v4360_v20 = vsel %vm653_vm5, %v4353_v3, %v7394_v63  ;;  %v4347_v32 = vsel %vm643_vm8, %v4341_v34, %v4333_v11 }
 0xd16   : > { %4511 = vmatpush1.msra.mxu0 %v4383_v43  ;;  %4589 = vmatprep.subr.mxu1 %v5540_v28  ;;  %v4346_v63 = vsel %vm643_vm8, %v7414_v7, %v7404_v50 }
 0xd17   : > { %v4335_v19 = vpop.permute.xlu0 %4334  ;;  %4512 = vmatprep.subr.mxu0 %v4380_v12  ;;  %4590 = vmatpush1.msra.mxu1 %v4378_v1  ;;  %v4355_v27 = vpop.permute.xlu1 %4354  ;;  %v5303_v1 = vld [vmem:[%s7719_s10 + $0x18] sm:$0xff] }
 0xd18   : > { %v4361_v26 = vsel %vm653_vm5, %v4355_v27, %v7343_v23  ;;  %4513 = vmatpush1.msra.mxu0 %v4382_v57  ;;  %4591 = vmatprep.subr.mxu1 %v5540_v28  ;;  %v4363_v21 = vsel %vm653_vm5, %v7392_v24, %v4355_v27  ;;  %v4342_v25 = vsel %vm643_vm8, %v4335_v19, %v7414_v7  ;;  %v5296_v7 = vld [vmem:[%s7717_s8 + $0x78] sm:$0xff] }
 0xd19   : > { %4514 = vmatprep.subr.mxu0 %v4363_v21  ;;  %4592 = vmatpush1.msra.mxu1 %v4361_v26  ;;  %v4344_v36 = vsel %vm643_vm8, %v7404_v50, %v4335_v19 }
 0xd1a   : > { %4515 = vmatpush1.msra.mxu0 %v4365_v6  ;;  %4593 = vmatprep.subr.mxu1 %v5540_v28 }
 0xd1b   : > { %v4459_v46 = vpop.permute.xlu0 %4458  ;;  %4516 = vmatprep.subr.mxu0 %v4362_v49  ;;  %4594 = vmatpush1.msra.mxu1 %v4360_v20  ;;  %v4337_v23 = vpop.permute.xlu1 %4336 }
 0xd1c   : > { %v4343_v10 = vsel %vm643_vm8, %v4337_v23, %v4341_v34  ;;  %4517 = vmatpush1.msra.mxu0 %v4364_v48  ;;  %4595 = vmatprep.subr.mxu1 %v5540_v28  ;;  %v4345_v24 = vsel %vm643_vm8, %v4333_v11, %v4337_v23  ;;  %v4473_v58 = vsel %vm7775_vm14, %v7427_v9, %v4459_v46  ;;  %vm7779_vm14 = vmmov %vm7777_vm6 }
 0xd1d   : > { %4518 = vmatprep.subr.mxu0 %v4345_v24  ;;  %4596 = vmatpush1.msra.mxu1 %v4343_v10 }
 0xd1e   : > { %4519 = vmatpush1.msra.mxu0 %v4347_v32  ;;  %4597 = vmatprep.subr.mxu1 %v5540_v28 }
 0xd1f   : > { %v4463_v53 = vpop.permute.xlu0 %4462  ;;  %4520 = vmatprep.subr.mxu0 %v4344_v36  ;;  %4598 = vmatpush1.msra.mxu1 %v4342_v25  ;;  %v4461_v4 = vpop.permute.xlu1 %4460 }
 0xd20   : > { %v4471_v2 = vsel %vm7776_vm15, %v4459_v46, %v4463_v53  ;;  %4521 = vmatpush1.msra.mxu0 %v4346_v63  ;;  %4627 = vmatprep.subr.mxu1 %v5540_v28  ;;  %v4469_v55 = vsel %vm7777_vm6, %v4463_v53, %v7427_v9  ;;  %vm7780_vm15 = vmmov %vm7777_vm6 }
 0xd21   : > { %4550 = vmatprep.subr.mxu0 %v4469_v55  ;;  %4628 = vmatpush2.msra.mxu1 %v4473_v58  ;;  %v5067_v55 = vld [vmem:[%s7726_s17] sm:$0xf] }
 0xd22   : > { %4551 = vmatpush2.msra.mxu0 %v4471_v2  ;;  %4629 = vmatprep.subr.mxu1 %v5540_v28  ;;  %v4835_v2 = vld [vmem:[%s7724_s15] sm:$0xf] }
 0xd23   : > { %v4465_v50 = vpop.permute.xlu0 %4464  ;;  %v4457_v56 = vpop.permute.xlu1 %4456 }
 0xd24   : > { %v4470_v62 = vsel %vm7778_vm7, %v4457_v56, %v4461_v4  ;;  %v4472_v15 = vsel %vm7779_vm14, %v4465_v50, %v4457_v56  ;;  %v4468_v22 = vsel %vm7780_vm15, %v4461_v4, %v4465_v50 }
 0xd25   : > { %4552 = vmatprep.subr.mxu0 %v4468_v22  ;;  %4630 = vmatpush2.msra.mxu1 %v4472_v15 }
 0xd26   : > { %4553 = vmatpush2.msra.mxu0 %v4470_v62  ;;  %4632 = vmatmul.mubr.f32.vlgmr.msra.gmra.mxu1 %v5293_v54 }
 0xd27   : > { %4555 = vmatmul.mubr.f32.vlgmr.msra.gmra.mxu0 %v5293_v54  ;;  %5302 = vmatprep.mubr.msk.f32.mxu1 %vm2481_vm0, %v5296_v7 }
 0xd28   : > { %5300 = vmatprep.mubr.msk.f32.mxu0 %vm2481_vm0, %v5296_v7  ;;  %5449 = vmatprep.subr.mxu1 %v5540_v28 }
 0xd2a   : > { %4637 = vmatmul.mubr.f32.gmra.mxu1 %v5295_v0 }
 0xd2b   : > { %4561 = vmatmul.mubr.f32.gmra.mxu0 %v5295_v0  ;;  %5453 = vmatprep.mubr.msk.f32.mxu1 %vm7774_vm3, %v5540_v28 }
 0xd2c   : > { %4724 = vmatprep.mubr.f32.mxu0 %v5540_v28 }
 0xd30   : > { %v4482_v3 = vpop.permute.xlu0 %4481  ;;  %v4477_v11 = vpop.permute.xlu1 %4476 }
 0xd34   : > { %v4817_v6 = vpop.permute.xlu1 %4816 }
 0xde6   : > { %v4633_v14 = vpop.f32.mrf.mxu1 }
 0xde7   : > { %v4556_v13 = vpop.f32.mrf.mxu0  ;;  %v4634_v40 = vadd.f32 %v4633_v14, %v4477_v11 }
 0xde8   : > { %v4635_v51 = vpop.f32.mrf.mxu1  ;;  %v4557_v43 = vadd.f32 %v4556_v13, %v4477_v11 }
 0xde9   : > { %v4558_v9 = vpop.f32.mrf.mxu0  ;;  %v4644_v38 = vadd.f32 %v4634_v40, %v7196_v44 }
 0xdea   : > { %v4638_v42 = vpop.f32.mrf.mxu1  ;;  %v4559_v35 = vadd.f32 %v4558_v9, %v4477_v11  ;;  %v4642_v44 = vadd.f32 %v4557_v43, %v7211_v33 }
 0xdeb   : > { %v4639_v31 = vadd.f32 %v4638_v42, %v4482_v3  ;;  %v4562_v5 = vpop.f32.mrf.mxu0 }
 0xdec   : > { %v4640_v59 = vpop.f32.mrf.mxu1  ;;  %v4563_v41 = vadd.f32 %v4562_v5, %v4482_v3 }
 0xded   : > { %v4647_v39 = vadd.f32 %v4639_v31, %v7181_v60  ;;  %v4564_v34 = vpop.f32.mrf.mxu0  ;;  %v4643_v60 = vadd.f32 %v4559_v35, %v7222_v37 }
 0xdee   : > { %v4565_v18 = vadd.f32 %v4564_v34, %v4482_v3  ;;  %v4645_v57 = vadd.f32 %v4563_v41, %v7237_v29  ;;  %v4655_v29 = vpop.permute.xlu0 %4654 }
 0xdef   : > { %5450 = vmatpush3.msra.mxu1 %v4647_v39 }
 0xdf0   : > { %v4646_v12 = vadd.f32 %v4565_v18, %v7268_v8  ;;  %5451 = vmatprep.subr.mxu1 %v5540_v28 }
 0xdf1   : > { %5452 = vmatpush3.msra.mxu1 %v4644_v38 }
 0xdf2   : > { %4688 = vmatprep.subr.mxu0 %v4646_v12  ;;  %5454 = vmatmul.mubr.msk.f32.vlgmr.msra.gmra.mxu1 %vm2481_vm0, %v5303_v1  ;;  %v4826_v46 = vpop.permute.xlu0 %4825 }
 0xdf3   : > { %4689 = vmatpush1.msra.mxu0 %v4645_v57  ;;  %5456 = vmatprep.subr.mxu1 %v5540_v28 }
 0xdf4   : > { %4690 = vmatprep.subr.mxu0 %v4643_v60  ;;  %5474 = vmatprep.mubr.msk.f32.mxu1 %vm7774_vm3, %v5540_v28 }
 0xdf5   : > { %4691 = vmatpush1.msra.mxu0 %v4642_v44 }
 0xdf6   : > { %5305 = vmatmul.mubr.msk.f32.vlgmr.msra.gmra.mxu0 %vm2481_vm0, %v5303_v1 }
 0xdf7   : > { %4981 = vmatprep.mubr.f32.mxu0 %v5540_v28 }
 0xeb2   : > { %v4797_v8 = vpop.f32.mrf.mxu1 }
 0xeb3   : > { %v4798_v37 = vadd.f32 %v4797_v8, %v4655_v29 }
 0xeb4   : > { %v5455_v19 = vpop.f32.mrf.mxu1 }
 0xeb5   : > { %v4803_v27 = vadd.f32 %v4798_v37, %v7162_v45 }
 0xeb6   : > { %v4726_v26 = vpop.f32.mrf.mxu0 }
 0xeb7   : > { %vm4806_vm6 = vcmp.ge.f32.partialorder %v4803_v27, 0.0  ;;  %v4809_v33 = vmul.f32 0.1, %v4803_v27  ;;  %v4727_v21 = vadd.f32 %v4726_v26, %v4655_v29 }
 0xeb8   : > { %v4728_v24 = vpop.f32.mrf.mxu0 }
 0xeb9   : > { %v4812_v20 = vsel %vm4806_vm6, %v4803_v27, %v4809_v33  ;;  %v4801_v49 = vadd.f32 %v4727_v21, %v7175_v61  ;;  %v4729_v45 = vadd.f32 %v4728_v24, %v4655_v29 }
 0xeba   : > { %v4821_v48 = vmul.f32 %v4817_v6, %v4812_v20 }
 0xebb   : > { %v4807_v23 = vmul.f32 0.1, %v4801_v49  ;;  %vm4804_vm0 = vcmp.ge.f32.partialorder %v4801_v49, 0.0  ;;  %v4802_v61 = vadd.f32 %v4729_v45, %v7172_v52 }
 0xebc   : > { %v4830_v10 = vadd.f32 %v4826_v46, %v4821_v48 }
 0xebd   : > { %v4810_v25 = vsel %vm4804_vm0, %v4801_v49, %v4807_v23  ;;  %v4808_v63 = vmul.f32 0.1, %v4802_v61 }
 0xebe   : > { %v7569_v32 = vsel %vm626_vm2, %v4826_v46, %v4830_v10  ;;  %v4819_v36 = vmul.f32 %v4817_v6, %v4810_v25  ;;  %vm4805_vm2 = vcmp.ge.f32.partialorder %v4802_v61, 0.0  ;;  %v4834_v10 = vld [vmem:[%s7723_s14] sm:$0xf] }
 0xebf   : > { %4894 = vrot.lane.b32.xlu1 %v7569_v32, %s7769_s25  ;;  %4903 = vrot.lane.b32.xlu0 %v7569_v32, %s7773_s0  ;;  %v4811_v52 = vsel %vm4805_vm2, %v4802_v61, %v4808_v63 }
 0xec0   : > { %v4828_v17 = vadd.f32 %v4826_v46, %v4819_v36  ;;  %v4820_v4 = vmul.f32 %v4817_v6, %v4811_v52 }
 0xec2   : > { %v7586_v53 = vsel %vm624_vm1, %v4826_v46, %v4828_v17  ;;  %v4829_v58 = vadd.f32 %v4826_v46, %v4820_v4  ;;  %vm7781_vm1 = vmmov %vm7778_vm7 }
 0xec3   : > { %4876 = vrot.lane.b32.xlu1 %v7569_v32, %s7766_s30  ;;  %4885 = vrot.lane.b32.xlu0 %v7569_v32, %s7771_s19  ;;  %vm7783_vm3 = vmmov %vm7781_vm1 }
 0xec4   : > { %v7602_v16 = vsel %vm625_vm4, %v4826_v46, %v4829_v58  ;;  %vm7782_vm4 = vmmov %vm7781_vm1 }
 0xec7   : > { %4867 = vrot.lane.b32.xlu1 %v7569_v32, %s7768_s24  ;;  %4858 = vrot.lane.b32.xlu0 %v7569_v32, %s7770_s26 }
 0xecb   : > { %4890 = vrot.lane.b32.xlu0 %v7586_v53, %s7769_s25  ;;  %4899 = vrot.lane.b32.xlu1 %v7586_v53, %s7773_s0 }
 0xecf   : > { %4872 = vrot.lane.b32.xlu0 %v7586_v53, %s7766_s30  ;;  %4881 = vrot.lane.b32.xlu1 %v7586_v53, %s7771_s19 }
 0xed3   : > { %4854 = vrot.lane.b32.xlu0 %v7586_v53, %s7770_s26  ;;  %4863 = vrot.lane.b32.xlu1 %v7586_v53, %s7768_s24 }
 0xed7   : > { %4892 = vrot.lane.b32.xlu0 %v7602_v16, %s7769_s25  ;;  %4845 = vrot.lane.b32.xlu1 %v7586_v53, %s7772_s29 }
 0xedb   : > { %4836 = vrot.lane.b32.xlu0 %v7586_v53, %s7767_s22  ;;  %4901 = vrot.lane.b32.xlu1 %v7602_v16, %s7773_s0 }
 0xedf   : > { %4874 = vrot.lane.b32.xlu0 %v7602_v16, %s7766_s30  ;;  %4883 = vrot.lane.b32.xlu1 %v7602_v16, %s7771_s19 }
 0xee3   : > { %4865 = vrot.lane.b32.xlu0 %v7602_v16, %s7768_s24  ;;  %4849 = vrot.lane.b32.xlu1 %v7569_v32, %s7772_s29 }
 0xee7   : > { %4847 = vrot.lane.b32.xlu0 %v7602_v16, %s7772_s29  ;;  %4856 = vrot.lane.b32.xlu1 %v7602_v16, %s7770_s26 }
 0xeeb   : > { %4840 = vrot.lane.b32.xlu0 %v7569_v32, %s7767_s22  ;;  %4838 = vrot.lane.b32.xlu1 %v7602_v16, %s7767_s22 }
 0xeef   : > { %5061 = vperm.xlu0 %5506, %v5058_v30   ;;  %4910 = vperm.xlu1 %5507, %v4835_v2  }
 0xef3   : > { %5070 = vperm.xlu1 %5507, %v5067_v55  }
 0xf31   : > { %v4895_v50 = vpop.permute.xlu1 %4894  ;;  %v4904_v56 = vpop.permute.xlu0 %4903 }
 0xf35   : > { %v4877_v54 = vpop.permute.xlu1 %4876  ;;  %v4886_v62 = vpop.permute.xlu0 %4885 }
 0xf39   : > { %v4868_v15 = vpop.permute.xlu1 %4867  ;;  %v4859_v22 = vpop.permute.xlu0 %4858 }
 0xf3d   : > { %v4891_v7 = vpop.permute.xlu0 %4890  ;;  %v4900_v0 = vpop.permute.xlu1 %4899 }
 0xf3e   : > { %v4907_v14 = vsel %vm7781_vm1, %v4904_v56, %v4900_v0  ;;  %v4898_v13 = vsel %vm703_vm13, %v4895_v50, %v4891_v7 }
 0xf3f   : > { %5457 = vmatpush3.msra.mxu1 %v4907_v14 }
 0xf40   : > { %5458 = vmatprep.subr.mxu1 %v5540_v28 }
 0xf41   : > { %v4873_v51 = vpop.permute.xlu0 %4872  ;;  %5459 = vmatpush3.msra.mxu1 %v4898_v13  ;;  %v4882_v3 = vpop.permute.xlu1 %4881 }
 0xf42   : > { %v4889_v9 = vsel %vm693_vm12, %v4886_v62, %v4882_v3  ;;  %5460 = vmatprep.subr.mxu1 %v5540_v28  ;;  %v4880_v11 = vsel %vm683_vm11, %v4877_v54, %v4873_v51 }
 0xf43   : > { %5461 = vmatpush3.msra.mxu1 %v4889_v9 }
 0xf44   : > { %5462 = vmatprep.subr.mxu1 %v5540_v28 }
 0xf45   : > { %v4855_v42 = vpop.permute.xlu0 %4854  ;;  %5463 = vmatpush3.msra.mxu1 %v4880_v11  ;;  %v4864_v40 = vpop.permute.xlu1 %4863 }
 0xf46   : > { %5464 = vmatprep.subr.mxu1 %v5540_v28  ;;  %v4871_v19 = vsel %vm673_vm10, %v4868_v15, %v4864_v40  ;;  %v4862_v6 = vsel %vm663_vm9, %v4859_v22, %v4855_v42 }
 0xf47   : > { %5465 = vmatpush3.msra.mxu1 %v7569_v32 }
 0xf48   : > { %5466 = vmatprep.subr.mxu1 %v5540_v28 }
 0xf49   : > { %v4893_v31 = vpop.permute.xlu0 %4892  ;;  %v4846_v5 = vpop.permute.xlu1 %4845 }
 0xf4a   : > { %v4896_v35 = vsel %vm703_vm13, %v4893_v31, %v4895_v50  ;;  %v4897_v18 = vsel %vm703_vm13, %v4891_v7, %v4893_v31 }
 0xf4d   : > { %v4837_v59 = vpop.permute.xlu0 %4836  ;;  %v4902_v39 = vpop.permute.xlu1 %4901 }
 0xf4e   : > { %v4906_v41 = vsel %vm7782_vm4, %v4900_v0, %v4902_v39  ;;  %v4905_v34 = vsel %vm7783_vm3, %v4902_v39, %v4904_v56 }
 0xf4f   : > { %4931 = vmatprep.subr.mxu0 %v4905_v34 }
 0xf50   : > { %4932 = vmatpush1.msra.mxu0 %v4906_v41 }
 0xf51   : > { %v4875_v38 = vpop.permute.xlu0 %4874  ;;  %4933 = vmatprep.subr.mxu0 %v4896_v35  ;;  %v4884_v43 = vpop.permute.xlu1 %4883 }
 0xf52   : > { %v4888_v1 = vsel %vm693_vm12, %v4882_v3, %v4884_v43  ;;  %4934 = vmatpush1.msra.mxu0 %v4897_v18  ;;  %v4887_v12 = vsel %vm693_vm12, %v4884_v43, %v4886_v62  ;;  %v4878_v57 = vsel %vm683_vm11, %v4875_v38, %v4877_v54  ;;  %v4879_v60 = vsel %vm683_vm11, %v4873_v51, %v4875_v38 }
 0xf53   : > { %4935 = vmatprep.subr.mxu0 %v4887_v12 }
 0xf54   : > { %4936 = vmatpush1.msra.mxu0 %v4888_v1 }
 0xf55   : > { %v4866_v44 = vpop.permute.xlu0 %4865  ;;  %4937 = vmatprep.subr.mxu0 %v4878_v57  ;;  %v4850_v29 = vpop.permute.xlu1 %4849 }
 0xf56   : > { %v4869_v8 = vsel %vm673_vm10, %v4866_v44, %v4868_v15  ;;  %4938 = vmatpush1.msra.mxu0 %v4879_v60  ;;  %v4870_v37 = vsel %vm673_vm10, %v4864_v40, %v4866_v44  ;;  %v4853_v48 = vsel %vm653_vm5, %v4850_v29, %v4846_v5  ;;  %v5521_v44 = vld [vmem:[%s7784_s21] sm:$0xff] }
 0xf57   : > { %4939 = vmatprep.subr.mxu0 %v7602_v16  ;;  %5467 = vmatpush3.msra.mxu1 %v4869_v8 }
 0xf58   : > { %4940 = vmatpush1.msra.mxu0 %v7586_v53  ;;  %5468 = vmatprep.subr.mxu1 %v5540_v28 }
 0xf59   : > { %v4848_v27 = vpop.permute.xlu0 %4847  ;;  %4941 = vmatprep.subr.mxu0 %v4870_v37  ;;  %v4857_v26 = vpop.permute.xlu1 %4856  ;;  %v5522_v37 = vld [vmem:[%s7784_s21 + $0x8] sm:$0xf] }
 0xf5a   : > { %v4860_v33 = vsel %vm663_vm9, %v4857_v26, %v4859_v22  ;;  %4942 = vmatpush1.msra.mxu0 %v4871_v19  ;;  %v4861_v21 = vsel %vm663_vm9, %v4855_v42, %v4857_v26  ;;  %v4851_v20 = vsel %vm653_vm5, %v4848_v27, %v4850_v29  ;;  %v4852_v49 = vsel %vm653_vm5, %v4846_v5, %v4848_v27 }
 0xf5b   : > { %4943 = vmatprep.subr.mxu0 %v4861_v21  ;;  %5469 = vmatpush3.msra.mxu1 %v4860_v33  ;;  %vm4913_vm9 = vcmask 588800   ;;  %v5113_v29 = vcombine.high %v5521_v44, %v5521_v44 }
 0xf5c   : > { %4944 = vmatpush1.msra.mxu0 %v4862_v6  ;;  %5470 = vmatprep.subr.mxu1 %v5540_v28 }
 0xf5d   : > { %v4841_v46 = vpop.permute.xlu0 %4840  ;;  %4945 = vmatprep.subr.mxu0 %v4852_v49  ;;  %5471 = vmatpush3.msra.mxu1 %v4851_v20  ;;  %v4839_v23 = vpop.permute.xlu1 %4838 }
 0xf5e   : > { %v4844_v24 = vsel %vm643_vm8, %v4841_v46, %v4837_v59  ;;  %v4842_v32 = vsel %vm643_vm8, %v4839_v23, %v4841_v46  ;;  %4946 = vmatpush1.msra.mxu0 %v4853_v48  ;;  %5472 = vmatprep.subr.mxu1 %v5540_v28  ;;  %v4843_v25 = vsel %vm643_vm8, %v4837_v59, %v4839_v23 }
 0xf5f   : > { %4947 = vmatprep.subr.mxu0 %v4843_v25  ;;  %5473 = vmatpush3.msra.mxu1 %v4842_v32 }
 0xf60   : > { %4948 = vmatpush1.msra.mxu0 %v4844_v24  ;;  %5475 = vmatmul.mubr.msk.f32.vlgmr.msra.gmra.mxu1 %vm4913_vm9, %v4834_v10 }
 0xf61   : > { %5307 = vmatmul.mubr.msk.f32.vlgmr.msra.gmra.mxu0 %vm4913_vm9, %v4834_v10 }
 0xf6a   : > { %v4911_v45 = vpop.permute.xlu1 %4910  ;;  %v5062_v63 = vpop.permute.xlu0 %5061 }
 0xf6e   : > { %v5071_v16 = vpop.permute.xlu1 %5070 }
0x1020   : > { %v5054_v36 = vpop.f32.mrf.mxu1 }
0x1021   : > { %v5055_v61 = vadd.f32 %v5054_v36, %v4911_v45  ;;  %v4983_v17 = vpop.f32.mrf.mxu0 }
0x1022   : > { %v4984_v53 = vadd.f32 %v4983_v17, %v4911_v45  ;;  %v5476_v52 = vpop.f32.mrf.mxu1 }
0x1023   : > { %v5066_v4 = vmul.f32 %v5062_v63, %v5055_v61  ;;  %v4985_v58 = vpop.f32.mrf.mxu0 }
0x1024   : > { %v5064_v30 = vmul.f32 %v5062_v63, %v4984_v53  ;;  %v4986_v28 = vadd.f32 %v4985_v58, %v4911_v45 }
0x1025   : > { %v5075_v2 = vadd.f32 %v5071_v16, %v5066_v4 }
0x1026   : > { %v5073_v47 = vadd.f32 %v5071_v16, %v5064_v30  ;;  %v5065_v55 = vmul.f32 %v5062_v63, %v4986_v28 }
0x1027   : > { %v5078_v50 = vand.u32 2147483647, %v5075_v2  ;;  %vm5105_vm5 = vcmp.ge.f32.partialorder %v5075_v2, 0.0 }
0x1028   : > { %v5076_v56 = vand.u32 2147483647, %v5073_v47  ;;  %v5074_v54 = vadd.f32 %v5071_v16, %v5065_v55  ;;  %vm5103_vm8 = vcmp.ge.f32.partialorder %v5073_v47, 0.0 }
0x1029   : > { %v5081_v62 = vsub.f32 0.0, %v5078_v50 }
0x102a   : > { %v5079_v15 = vsub.f32 0.0, %v5076_v56  ;;  %v5077_v22 = vand.u32 2147483647, %v5074_v54  ;;  %vm5104_vm10 = vcmp.ge.f32.partialorder %v5074_v54, 0.0 }
0x102b   : > { %v5086_v7 = vmul.f32 1.442695, %v5081_v62 }
0x102c   : > { %v5082_v0 = vmul.f32 1.442695, %v5079_v15  ;;  %v5080_v14 = vsub.f32 0.0, %v5077_v22 }
0x102d   : > { %5509 = vpow2.f32 %v5086_v7 }
0x102e   : > { %5511 = vpow2.f32 %v5082_v0  ;;  %v5084_v13 = vmul.f32 1.442695, %v5080_v14 }
0x1030   : > { %5513 = vpow2.f32 %v5084_v13 }
0x103a   : > { %v5510_v51 = vpop.eup %5509 }
0x103b   : > { %v5512_v3 = vpop.eup %5511  ;;  %v5090_v9 = vadd.f32 1.0, %v5510_v51 }
0x103c   : > { %v5088_v11 = vadd.f32 1.0, %v5512_v3 }
0x103d   : > { %v5514_v42 = vpop.eup %5513  ;;  %5515 = vrcp.f32 %v5090_v9 }
0x103e   : > { %5517 = vrcp.f32 %v5088_v11  ;;  %v5089_v40 = vadd.f32 1.0, %v5514_v42 }
0x1040   : > { %5519 = vrcp.f32 %v5089_v40 }
0x104a   : > { %v5516_v31 = vpop.eup %5515 }
0x104b   : > { %v5518_v5 = vpop.eup %5517  ;;  %v5096_v59 = vmul.f32 %v5516_v31, %v5090_v9 }
0x104c   : > { %v5094_v39 = vmul.f32 %v5518_v5, %v5088_v11 }
0x104d   : > { %v5520_v41 = vpop.eup %5519  ;;  %v5099_v34 = vsub.f32 2.0, %v5096_v59 }
0x104e   : > { %v5097_v35 = vsub.f32 2.0, %v5094_v39  ;;  %v5095_v18 = vmul.f32 %v5520_v41, %v5089_v40 }
0x104f   : > { %v5102_v38 = vmul.f32 %v5516_v31, %v5099_v34 }
0x1050   : > { %v5100_v43 = vmul.f32 %v5518_v5, %v5097_v35  ;;  %v5098_v1 = vsub.f32 2.0, %v5095_v18 }
0x1051   : > { %v5108_v12 = vmul.f32 %v5510_v51, %v5102_v38 }
0x1052   : > { %v5106_v57 = vmul.f32 %v5512_v3, %v5100_v43  ;;  %v5101_v60 = vmul.f32 %v5520_v41, %v5098_v1 }
0x1053   : > { %v5111_v8 = vsel %vm5105_vm5, %v5102_v38, %v5108_v12 }
0x1054   : > { %v5117_v19 = vmul.f32 %v5522_v37, %v5111_v8  ;;  %v5109_v27 = vsel %vm5103_vm8, %v5100_v43, %v5106_v57  ;;  %v5107_v26 = vmul.f32 %v5514_v42, %v5101_v60 }
0x1055   : > { %v5115_v21 = vmul.f32 %v5521_v44, %v5109_v27 }
0x1056   : > { %5123 = vst [vmem:[%s575_s4 + $0x8] sm:$0xf] %v5117_v19  ;;  %v5110_v33 = vsel %vm5104_vm10, %v5101_v60, %v5107_v26 }
0x1057   : > { %v5116_v6 = vmul.f32 %v5113_v29, %v5110_v33 }
0x1059   : > { %v5120_v20 = vcombine.low %v5115_v21, %v5116_v6 }
0x105b   : > { %5122 = vst [vmem:[%s575_s4] sm:$0xff] %v5120_v20 }
0x105c PF: > { %s7787_s28 = sld [smem:[#allocation2_spill]] }
0x1062   : > { %s28_s27 = sadd.s32 1, %s7787_s28  }
0x1063   : > { %p25_p4 = scmp.ge.s32.totalorder %s28_s27, 4  }
0x1065   :  { %27 = sbr.rel (!%p25_p4) target bundleno = 8 (0x8), region = 140 }

</bundles_post_ra>
